<compile_context>
chip_gen: v5e
topology: v5e:2x2
jax: 0.10.0
libtpu: 0.0.40
codegen_flags: <defaults>
</compile_context>

<pallas_src>
import functools

import jax
import jax.numpy as jnp
from jax import lax
from jax.experimental import pallas as pl
from jax.experimental.pallas import tpu as pltpu


# ----------------------------------------------------------------------------
# Fused kernel: LSTM layer 1 (bidir, fused dirs) -> LSTM layer 2 -> head.
# ----------------------------------------------------------------------------
def _bieflstm_kernel(x_ref, wih1c_ref, b1c_ref, whh1bd_ref,
                     wih2f_ref, b2f_ref, whh2f_ref,
                     wih2b_ref, b2b_ref,
                     wfc1_ref, bfc1_ref, wfc2_ref, bfc2_ref,
                     out_ref,
                     l1f_ref, l1b_ref,
                     *, T, B, H):
    f32 = jnp.float32
    G = 4 * H                                   # gates per direction
    unroll = True if T <= 32 else 8             # bounded unroll for long sequences
    zeros_bh = jnp.zeros((B, H), f32)

    def cell1(gates, c):
        """Single-direction LSTM cell; gate columns packed [i, f, o, g]."""
        sg = jax.nn.sigmoid(gates[:, :3 * H])   # one EUP push covers i, f, o
        g = jnp.tanh(gates[:, 3 * H:])          # one EUP push for g
        c_new = sg[:, H:2 * H] * c + sg[:, :H] * g
        h_new = sg[:, 2 * H:] * jnp.tanh(c_new)
        return h_new, c_new

    # ---------------- layer 1: fwd + bwd fused into one recurrence ----------------
    def layer1(gx1f_ref, gx1b_ref):
        # Hoisted input projection for BOTH directions: one (T*B, d) @ (d, 8H) matmul,
        # bias broadcast once.  Column order: [fwd i,f,o,g | bwd i,f,o,g].
        g1 = jnp.dot(x_ref[...], wih1c_ref[...],
                     preferred_element_type=f32) + b1c_ref[...]
        gx1f_ref[...] = g1[:, :G]
        gx1b_ref[...] = g1[:, G:]

        whh1bd = whh1bd_ref[...]                # (2H, 8H) block-diagonal, hoisted

        def body(t, carry):
            h_cat, c_f, c_b = carry             # h_cat = [h_f | h_b]   (B, 2H)
            s = T - 1 - t                       # bwd direction walks time backwards
            row_t = pl.multiple_of(t * B, B)
            row_s = pl.multiple_of(s * B, B)
            # ONE fused recurrent matmul for both directions
            gr = jnp.dot(h_cat, whh1bd, preferred_element_type=f32)    # (B, 8H)
            gf = gr[:, :G] + gx1f_ref[pl.ds(row_t, B), :]
            gb = gr[:, G:] + gx1b_ref[pl.ds(row_s, B), :]
            sf = jax.nn.sigmoid(gf[:, :3 * H]); tf_ = jnp.tanh(gf[:, 3 * H:])
            sb = jax.nn.sigmoid(gb[:, :3 * H]); tb_ = jnp.tanh(gb[:, 3 * H:])
            c_f = sf[:, H:2 * H] * c_f + sf[:, :H] * tf_
            c_b = sb[:, H:2 * H] * c_b + sb[:, :H] * tb_
            h_f = sf[:, 2 * H:] * jnp.tanh(c_f)
            h_b = sb[:, 2 * H:] * jnp.tanh(c_b)
            l1f_ref[pl.ds(row_t, B), :] = h_f   # layer-1 outputs stay in VMEM,
            l1b_ref[pl.ds(row_s, B), :] = h_b   # stored in original time order
            return jnp.concatenate([h_f, h_b], axis=1), c_f, c_b

        lax.fori_loop(0, T, body,
                      (jnp.zeros((B, 2 * H), f32), zeros_bh, zeros_bh),
                      unroll=unroll)

    pl.run_scoped(layer1,
                  pltpu.VMEM((T * B, G), f32),
                  pltpu.VMEM((T * B, G), f32))

    # ------------- layer 2 + head (gx2 region reuses layer-1's scratch VMEM) -------
    def layer2_and_head(gx2_ref):
        # Hoisted layer-2 forward input projection over all timesteps.
        l1f = l1f_ref[...]
        l1b = l1b_ref[...]
        wih2f = wih2f_ref[...]                  # (2H, 4H)
        gx2_ref[...] = (jnp.dot(l1f, wih2f[:H, :], preferred_element_type=f32)
                        + jnp.dot(l1b, wih2f[H:, :], preferred_element_type=f32)
                        + b2f_ref[...])

        whh2f = whh2f_ref[...]

        def body(t, carry):
            h, c = carry
            row = pl.multiple_of(t * B, B)
            gates = gx2_ref[pl.ds(row, B), :] + jnp.dot(
                h, whh2f, preferred_element_type=f32)
            return cell1(gates, c)

        h2f, _ = lax.fori_loop(0, T, body, (zeros_bh, zeros_bh), unroll=unroll)

        # Layer-2 backward direction: the head reads only output[-1]; for the bwd LSTM
        # that is its FIRST step (input at t = T-1, zero initial state), so the
        # recurrent term is zero and its W_hh is mathematically unused.
        # NOTE: valid only while the head consumes output[-1] alone.
        wih2b = wih2b_ref[...]
        l1f_last = l1f_ref[pl.ds((T - 1) * B, B), :]
        l1b_last = l1b_ref[pl.ds((T - 1) * B, B), :]
        gb2 = (jnp.dot(l1f_last, wih2b[:H, :], preferred_element_type=f32)
               + jnp.dot(l1b_last, wih2b[H:, :], preferred_element_type=f32)
               + b2b_ref[...])
        h2b, _ = cell1(gb2, zeros_bh)

        # Head: fc1 (eval-mode BatchNorm folded in) -> ReLU -> fc2.
        # TODO(synk): Dropout omitted (eval-mode identity); training-mode masking not modeled.
        wfc1 = wfc1_ref[...]
        y = (jnp.dot(h2f, wfc1[:H, :], preferred_element_type=f32)
             + jnp.dot(h2b, wfc1[H:, :], preferred_element_type=f32)
             + bfc1_ref[...])
        y = jnp.maximum(y, 0.0)
        out_ref[...] = (jnp.dot(y, wfc2_ref[...], preferred_element_type=f32)
                        + bfc2_ref[...]).astype(out_ref.dtype)

    pl.run_scoped(layer2_and_head, pltpu.VMEM((T * B, G), f32))


# ----------------------------------------------------------------------------
# Wrapper: pack PyTorch-layout weights into kernel layout and call pallas_call.
# ----------------------------------------------------------------------------
def _perm_ifog(w):
    """Reorder PyTorch's [i, f, g, o] gate blocks (axis 0) to kernel order [i, f, o, g]."""
    H = w.shape[0] // 4
    return jnp.concatenate([w[:2 * H], w[3 * H:], w[2 * H:3 * H]], axis=0)


def _padded_f32_bytes(shape):
    """Rough VMEM footprint of an f32 array with (8, 128) tile padding."""
    if len(shape) == 1:
        return 4 * pl.cdiv(max(shape[0], 1), 128) * 128
    n = 1
    for d_ in shape[:-2]:
        n *= d_
    n *= pl.cdiv(shape[-2], 8) * 8
    n *= pl.cdiv(shape[-1], 128) * 128
    return 4 * n


def bieflstm_forward(params, x):
    T, B, d = x.shape
    l1, l2 = params["lstm"]
    H = l1["fwd"]["whh"].shape[1]
    O = params["fc2"]["w"].shape[0]
    f32 = jnp.float32

    # ---- layer 1: fused input projection (both dirs), gate order [i,f,o,g] ----
    wih1c = jnp.concatenate([_perm_ifog(l1["fwd"]["wih"]).T,
                             _perm_ifog(l1["bwd"]["wih"]).T], axis=1)          # (d, 8H)
    b1c = jnp.concatenate([_perm_ifog(l1["fwd"]["bih"] + l1["fwd"]["bhh"]),
                           _perm_ifog(l1["bwd"]["bih"] + l1["bwd"]["bhh"])]
                          ).reshape(1, 8 * H)
    # block-diagonal recurrent weight -> ONE per-step matmul for both directions
    z = jnp.zeros((H, 4 * H), f32)
    whh1bd = jnp.concatenate(
        [jnp.concatenate([_perm_ifog(l1["fwd"]["whh"]).T, z], axis=1),
         jnp.concatenate([z, _perm_ifog(l1["bwd"]["whh"]).T], axis=1)], axis=0)  # (2H, 8H)

    # ---- layer 2 ----
    wih2f = _perm_ifog(l2["fwd"]["wih"]).T                                      # (2H, 4H)
    b2f = _perm_ifog(l2["fwd"]["bih"] + l2["fwd"]["bhh"]).reshape(1, 4 * H)
    whh2f = _perm_ifog(l2["fwd"]["whh"]).T                                      # (H, 4H)
    wih2b = _perm_ifog(l2["bwd"]["wih"]).T                                      # (2H, 4H)
    b2b = _perm_ifog(l2["bwd"]["bih"] + l2["bwd"]["bhh"]).reshape(1, 4 * H)
    # layer-2 bwd W_hh is mathematically unused (head reads only output[-1]) -> not passed

    # ---- fold eval-mode BatchNorm1d into fc1 ----
    bn = params["bn1"]
    scale = bn["gamma"] * jax.lax.rsqrt(bn["var"] + 1e-5)                       # (H,)
    wfc1 = params["fc1"]["w"].T * scale[None, :]                                # (2H, H)
    bfc1 = ((params["fc1"]["b"] - bn["mean"]) * scale + bn["beta"]).reshape(1, -1)
    wfc2 = params["fc2"]["w"].T                                                 # (H, O)
    bfc2 = params["fc2"]["b"].reshape(1, O)

    x_flat = x.reshape(T * B, d)   # flatten once in the wrapper, not in the kernel

    ins = (x_flat, wih1c, b1c, whh1bd, wih2f, b2f, whh2f, wih2b, b2b,
           wfc1, bfc1, wfc2, bfc2)

    # Explicit VMEM budget: inputs + output + persistent scratch + peak scoped region
    # (gx1 region; gx2 region reuses the same offset).
    est = sum(_padded_f32_bytes(a.shape) for a in ins)
    est += _padded_f32_bytes((B, O))
    est += 2 * _padded_f32_bytes((T * B, H))        # l1f / l1b persistent scratch
    est += 2 * _padded_f32_bytes((T * B, 4 * H))    # peak run_scoped region (layer 1)
    # TODO(synk): for production T*B this needs the chunked-over-T variant; capped at
    # 60 MiB so the limit also fits v7x's 64 MiB physical VMEM.
    vmem_limit = int(min(max(2 * est, 32 * 1024 * 1024), 60 * 1024 * 1024))

    kernel = functools.partial(_bieflstm_kernel, T=T, B=B, H=H)
    return pl.pallas_call(
        kernel,
        out_shape=jax.ShapeDtypeStruct((B, O), f32),
        scratch_shapes=[
            pltpu.VMEM((T * B, H), f32),   # layer-1 fwd hidden states (row block t)
            pltpu.VMEM((T * B, H), f32),   # layer-1 bwd hidden states (row block t)
        ],
        compiler_params=pltpu.CompilerParams(vmem_limit_bytes=vmem_limit),
    )(*ins)


# ----------------------------------------------------------------------------
# Parameter construction (PyTorch-style shapes/init, deterministic).
# ----------------------------------------------------------------------------
def init_params(key, d, h, output_dim, num_layers=2):
    params = {"lstm": []}
    bound = 1.0 / jnp.sqrt(jnp.float32(h))
    layer_in = d
    for _ in range(num_layers):
        layer_p = {}
        for direction in ("fwd", "bwd"):
            key, k1, k2, k3, k4 = jax.random.split(key, 5)
            layer_p[direction] = {
                "wih": jax.random.uniform(k1, (4 * h, layer_in), jnp.float32, -bound, bound),
                "whh": jax.random.uniform(k2, (4 * h, h), jnp.float32, -bound, bound),
                "bih": jax.random.uniform(k3, (4 * h,), jnp.float32, -bound, bound),
                "bhh": jax.random.uniform(k4, (4 * h,), jnp.float32, -bound, bound),
            }
        params["lstm"].append(layer_p)
        layer_in = 2 * h

    key, k1, k2, k3, k4 = jax.random.split(key, 5)
    b1 = 1.0 / jnp.sqrt(jnp.float32(2 * h))
    params["fc1"] = {"w": jax.random.uniform(k1, (h, 2 * h), jnp.float32, -b1, b1),
                     "b": jax.random.uniform(k2, (h,), jnp.float32, -b1, b1)}
    b2 = 1.0 / jnp.sqrt(jnp.float32(h))
    params["fc2"] = {"w": jax.random.uniform(k3, (output_dim, h), jnp.float32, -b2, b2),
                     "b": jax.random.uniform(k4, (output_dim,), jnp.float32, -b2, b2)}
    params["bn1"] = {"gamma": jnp.ones((h,), jnp.float32),
                     "beta": jnp.zeros((h,), jnp.float32),
                     "mean": jnp.zeros((h,), jnp.float32),
                     "var": jnp.ones((h,), jnp.float32)}
    return params


# ----------------------------------------------------------------------------
# Pure-JAX reference (eval-mode PyTorch semantics) for correctness checking.
# ----------------------------------------------------------------------------
def _ref_cell(x, h, c, p, H):
    gates = x @ p["wih"].T + p["bih"] + h @ p["whh"].T + p["bhh"]
    i = jax.nn.sigmoid(gates[:, 0 * H:1 * H])
    f = jax.nn.sigmoid(gates[:, 1 * H:2 * H])
    g = jnp.tanh(gates[:, 2 * H:3 * H])
    o = jax.nn.sigmoid(gates[:, 3 * H:4 * H])
    c = f * c + i * g
    return o * jnp.tanh(c), c


def ref_forward(params, x):
    T, B, _ = x.shape
    H = params["lstm"][0]["fwd"]["whh"].shape[1]
    inp = x
    for layer in params["lstm"]:
        hf = cf = hb = cb = jnp.zeros((B, H), jnp.float32)
        outs_f, outs_b = [], []
        for t in range(T):
            hf, cf = _ref_cell(inp[t], hf, cf, layer["fwd"], H)
            outs_f.append(hf)
        for t in reversed(range(T)):
            hb, cb = _ref_cell(inp[t], hb, cb, layer["bwd"], H)
            outs_b.append(hb)
        outs_b = outs_b[::-1]
        inp = jnp.stack([jnp.concatenate([outs_f[t], outs_b[t]], axis=-1) for t in range(T)])
    last_hs = inp[-1]
    bn = params["bn1"]
    y = last_hs @ params["fc1"]["w"].T + params["fc1"]["b"]
    y = (y - bn["mean"]) * jax.lax.rsqrt(bn["var"] + 1e-5) * bn["gamma"] + bn["beta"]
    y = jnp.maximum(y, 0.0)
    return y @ params["fc2"]["w"].T + params["fc2"]["b"]


if __name__ == "__main__":
    T, B, d, h, output_dim = 8, 8, 16, 32, 4

    key = jax.random.PRNGKey(0)
    key, kp, kx = jax.random.split(key, 3)
    params = init_params(kp, d, h, output_dim, num_layers=2)
    x = jax.random.normal(kx, (T, B, d), jnp.float32)        # (seq_len, batch, input_size)

    out = jax.block_until_ready(bieflstm_forward(params, x))
    assert out.shape == (B, output_dim), out.shape
    assert bool(jnp.all(jnp.isfinite(out)))

    ref = jax.block_until_ready(ref_forward(params, x))
    assert bool(jnp.allclose(out, ref, atol=5e-2, rtol=5e-2)), \
        float(jnp.max(jnp.abs(out - ref)))
    print("KERNEL_OK")
</pallas_src>

<mosaic_0001>
module attributes {stable_mosaic.version = 11 : i64} {
  func.func @_bieflstm_kernel(%arg0: memref<64x16xf32, #tpu.memory_space<vmem>>, %arg1: memref<16x256xf32, #tpu.memory_space<vmem>>, %arg2: memref<1x256xf32, #tpu.memory_space<vmem>>, %arg3: memref<64x256xf32, #tpu.memory_space<vmem>>, %arg4: memref<64x128xf32, #tpu.memory_space<vmem>>, %arg5: memref<1x128xf32, #tpu.memory_space<vmem>>, %arg6: memref<32x128xf32, #tpu.memory_space<vmem>>, %arg7: memref<64x128xf32, #tpu.memory_space<vmem>>, %arg8: memref<1x128xf32, #tpu.memory_space<vmem>>, %arg9: memref<64x32xf32, #tpu.memory_space<vmem>>, %arg10: memref<1x32xf32, #tpu.memory_space<vmem>>, %arg11: memref<32x4xf32, #tpu.memory_space<vmem>>, %arg12: memref<1x4xf32, #tpu.memory_space<vmem>>, %arg13: memref<8x4xf32, #tpu.memory_space<vmem>>, %arg14: memref<64x32xf32, #tpu.memory_space<vmem>>, %arg15: memref<64x32xf32, #tpu.memory_space<vmem>>) attributes {dimension_semantics = [], scalar_prefetch = 0 : i64, scratch_operands = 2 : i64, tpu.core_type = #tpu.core_type<tc>} {
    %cst = arith.constant 0.000000e+00 : f32
    %0 = vector.broadcast %cst : f32 to vector<8x32xf32>
    "tpu.region"() ({
      %alloca = memref.alloca() : memref<64x128xf32, #tpu.memory_space<vmem>>
      %alloca_0 = memref.alloca() : memref<64x128xf32, #tpu.memory_space<vmem>>
      %c0 = arith.constant 0 : index
      %c0_1 = arith.constant 0 : index
      %1 = vector.load %arg0[%c0, %c0_1] : memref<64x16xf32, #tpu.memory_space<vmem>>, vector<64x16xf32>
      %c0_2 = arith.constant 0 : index
      %c0_3 = arith.constant 0 : index
      %2 = vector.load %arg1[%c0_2, %c0_3] : memref<16x256xf32, #tpu.memory_space<vmem>>, vector<16x256xf32>
      %cst_4 = arith.constant dense<0.000000e+00> : vector<64x256xf32>
      %3 = tpu.matmul %1, %2, %cst_4 {dimension_numbers = #tpu.dot_dimension_numbers<[1], [0], [0], [1], [0, 0, 1, 1], [], []>} : vector<64x16xf32>, vector<16x256xf32>, vector<64x256xf32> -> vector<64x256xf32>
      %c0_5 = arith.constant 0 : index
      %c0_6 = arith.constant 0 : index
      %4 = vector.load %arg2[%c0_5, %c0_6] : memref<1x256xf32, #tpu.memory_space<vmem>>, vector<1x256xf32>
      %5 = vector.broadcast %4 : vector<1x256xf32> to vector<64x256xf32>
      %6 = arith.addf %3, %5 : vector<64x256xf32>
      %7 = vector.extract_strided_slice %6 {offsets = [0, 0], sizes = [64, 128], strides = [1, 1]} : vector<64x256xf32> to vector<64x128xf32>
      %c0_7 = arith.constant 0 : index
      %c0_8 = arith.constant 0 : index
      %8 = vector.load %alloca[%c0_7, %c0_8] : memref<64x128xf32, #tpu.memory_space<vmem>>, vector<64x128xf32>
      tpu.vector_store %alloca[%c0_7, %c0_8], %7 {strides = array<i32>} : memref<64x128xf32, #tpu.memory_space<vmem>>, vector<64x128xf32>,
      %9 = vector.extract_strided_slice %6 {offsets = [0, 128], sizes = [64, 128], strides = [1, 1]} : vector<64x256xf32> to vector<64x128xf32>
      %c0_9 = arith.constant 0 : index
      %c0_10 = arith.constant 0 : index
      %10 = vector.load %alloca_0[%c0_9, %c0_10] : memref<64x128xf32, #tpu.memory_space<vmem>>, vector<64x128xf32>
      tpu.vector_store %alloca_0[%c0_9, %c0_10], %9 {strides = array<i32>} : memref<64x128xf32, #tpu.memory_space<vmem>>, vector<64x128xf32>,
      %c0_11 = arith.constant 0 : index
      %c0_12 = arith.constant 0 : index
      %11 = vector.load %arg3[%c0_11, %c0_12] : memref<64x256xf32, #tpu.memory_space<vmem>>, vector<64x256xf32>
      %cst_13 = arith.constant 0.000000e+00 : f32
      %12 = vector.broadcast %cst_13 : f32 to vector<8x64xf32>
      %c0_i32 = arith.constant 0 : i32
      %c7_i32 = arith.constant 7 : i32
      %13 = arith.subi %c7_i32, %c0_i32 : i32
      %c8_i32 = arith.constant 8 : i32
      %14 = arith.muli %c0_i32, %c8_i32 : i32
      %15 = tpu.assume_multiple %14, 8 : i32
      %c8_i32_14 = arith.constant 8 : i32
      %16 = arith.muli %13, %c8_i32_14 : i32
      %17 = tpu.assume_multiple %16, 8 : i32
      %cst_15 = arith.constant dense<0.000000e+00> : vector<8x256xf32>
      %18 = tpu.matmul %12, %11, %cst_15 {dimension_numbers = #tpu.dot_dimension_numbers<[1], [0], [0], [1], [0, 0, 1, 1], [], []>} : vector<8x64xf32>, vector<64x256xf32>, vector<8x256xf32> -> vector<8x256xf32>
      %19 = vector.extract_strided_slice %18 {offsets = [0, 0], sizes = [8, 128], strides = [1, 1]} : vector<8x256xf32> to vector<8x128xf32>
      %20 = arith.index_cast %15 : i32 to index
      %c0_16 = arith.constant 0 : index
      %21 = vector.load %alloca[%20, %c0_16] : memref<64x128xf32, #tpu.memory_space<vmem>>, vector<8x128xf32>
      %22 = arith.addf %19, %21 : vector<8x128xf32>
      %23 = vector.extract_strided_slice %18 {offsets = [0, 128], sizes = [8, 128], strides = [1, 1]} : vector<8x256xf32> to vector<8x128xf32>
      %24 = arith.index_cast %17 : i32 to index
      %c0_17 = arith.constant 0 : index
      %25 = vector.load %alloca_0[%24, %c0_17] : memref<64x128xf32, #tpu.memory_space<vmem>>, vector<8x128xf32>
      %26 = arith.addf %23, %25 : vector<8x128xf32>
      %27 = vector.extract_strided_slice %22 {offsets = [0, 0], sizes = [8, 96], strides = [1, 1]} : vector<8x128xf32> to vector<8x96xf32>
      %28 = arith.negf %27 : vector<8x96xf32>
      %29 = math.exp %28 : vector<8x96xf32>
      %cst_18 = arith.constant 1.000000e+00 : f32
      %30 = vector.broadcast %cst_18 : f32 to vector<8x96xf32>
      %31 = arith.addf %30, %29 : vector<8x96xf32>
      %32 = arith.divf %30, %31 : vector<8x96xf32>
      %33 = vector.extract_strided_slice %22 {offsets = [0, 96], sizes = [8, 32], strides = [1, 1]} : vector<8x128xf32> to vector<8x32xf32>
      %34 = math.tanh %33 : vector<8x32xf32>
      %35 = vector.extract_strided_slice %26 {offsets = [0, 0], sizes = [8, 96], strides = [1, 1]} : vector<8x128xf32> to vector<8x96xf32>
      %36 = arith.negf %35 : vector<8x96xf32>
      %37 = math.exp %36 : vector<8x96xf32>
      %cst_19 = arith.constant 1.000000e+00 : f32
      %38 = vector.broadcast %cst_19 : f32 to vector<8x96xf32>
      %39 = arith.addf %38, %37 : vector<8x96xf32>
      %40 = arith.divf %38, %39 : vector<8x96xf32>
      %41 = vector.extract_strided_slice %26 {offsets = [0, 96], sizes = [8, 32], strides = [1, 1]} : vector<8x128xf32> to vector<8x32xf32>
      %42 = math.tanh %41 : vector<8x32xf32>
      %43 = vector.extract_strided_slice %32 {offsets = [0, 32], sizes = [8, 32], strides = [1, 1]} : vector<8x96xf32> to vector<8x32xf32>
      %44 = arith.mulf %43, %0 : vector<8x32xf32>
      %45 = vector.extract_strided_slice %32 {offsets = [0, 0], sizes = [8, 32], strides = [1, 1]} : vector<8x96xf32> to vector<8x32xf32>
      %46 = arith.mulf %45, %34 : vector<8x32xf32>
      %47 = arith.addf %44, %46 : vector<8x32xf32>
      %48 = vector.extract_strided_slice %40 {offsets = [0, 32], sizes = [8, 32], strides = [1, 1]} : vector<8x96xf32> to vector<8x32xf32>
      %49 = arith.mulf %48, %0 : vector<8x32xf32>
      %50 = vector.extract_strided_slice %40 {offsets = [0, 0], sizes = [8, 32], strides = [1, 1]} : vector<8x96xf32> to vector<8x32xf32>
      %51 = arith.mulf %50, %42 : vector<8x32xf32>
      %52 = arith.addf %49, %51 : vector<8x32xf32>
      %53 = vector.extract_strided_slice %32 {offsets = [0, 64], sizes = [8, 32], strides = [1, 1]} : vector<8x96xf32> to vector<8x32xf32>
      %54 = math.tanh %47 : vector<8x32xf32>
      %55 = arith.mulf %53, %54 : vector<8x32xf32>
      %56 = vector.extract_strided_slice %40 {offsets = [0, 64], sizes = [8, 32], strides = [1, 1]} : vector<8x96xf32> to vector<8x32xf32>
      %57 = math.tanh %52 : vector<8x32xf32>
      %58 = arith.mulf %56, %57 : vector<8x32xf32>
      %59 = arith.index_cast %15 : i32 to index
      %c0_20 = arith.constant 0 : index
      %60 = vector.load %arg14[%59, %c0_20] : memref<64x32xf32, #tpu.memory_space<vmem>>, vector<8x32xf32>
      tpu.vector_store %arg14[%59, %c0_20], %55 {strides = array<i32>} : memref<64x32xf32, #tpu.memory_space<vmem>>, vector<8x32xf32>,
      %61 = arith.index_cast %17 : i32 to index
      %c0_21 = arith.constant 0 : index
      %62 = vector.load %arg15[%61, %c0_21] : memref<64x32xf32, #tpu.memory_space<vmem>>, vector<8x32xf32>
      tpu.vector_store %arg15[%61, %c0_21], %58 {strides = array<i32>} : memref<64x32xf32, #tpu.memory_space<vmem>>, vector<8x32xf32>,
      %63 = tpu.concatenate %55, %58 in 1 : vector<8x32xf32>, vector<8x32xf32> -> vector<8x64xf32>
      %c1_i32 = arith.constant 1 : i32
      %c7_i32_22 = arith.constant 7 : i32
      %64 = arith.subi %c7_i32_22, %c1_i32 : i32
      %c8_i32_23 = arith.constant 8 : i32
      %65 = arith.muli %c1_i32, %c8_i32_23 : i32
      %66 = tpu.assume_multiple %65, 8 : i32
      %c8_i32_24 = arith.constant 8 : i32
      %67 = arith.muli %64, %c8_i32_24 : i32
      %68 = tpu.assume_multiple %67, 8 : i32
      %cst_25 = arith.constant dense<0.000000e+00> : vector<8x256xf32>
      %69 = tpu.matmul %63, %11, %cst_25 {dimension_numbers = #tpu.dot_dimension_numbers<[1], [0], [0], [1], [0, 0, 1, 1], [], []>} : vector<8x64xf32>, vector<64x256xf32>, vector<8x256xf32> -> vector<8x256xf32>
      %70 = vector.extract_strided_slice %69 {offsets = [0, 0], sizes = [8, 128], strides = [1, 1]} : vector<8x256xf32> to vector<8x128xf32>
      %71 = arith.index_cast %66 : i32 to index
      %c0_26 = arith.constant 0 : index
      %72 = vector.load %alloca[%71, %c0_26] : memref<64x128xf32, #tpu.memory_space<vmem>>, vector<8x128xf32>
      %73 = arith.addf %70, %72 : vector<8x128xf32>
      %74 = vector.extract_strided_slice %69 {offsets = [0, 128], sizes = [8, 128], strides = [1, 1]} : vector<8x256xf32> to vector<8x128xf32>
      %75 = arith.index_cast %68 : i32 to index
      %c0_27 = arith.constant 0 : index
      %76 = vector.load %alloca_0[%75, %c0_27] : memref<64x128xf32, #tpu.memory_space<vmem>>, vector<8x128xf32>
      %77 = arith.addf %74, %76 : vector<8x128xf32>
      %78 = vector.extract_strided_slice %73 {offsets = [0, 0], sizes = [8, 96], strides = [1, 1]} : vector<8x128xf32> to vector<8x96xf32>
      %79 = arith.negf %78 : vector<8x96xf32>
      %80 = math.exp %79 : vector<8x96xf32>
      %cst_28 = arith.constant 1.000000e+00 : f32
      %81 = vector.broadcast %cst_28 : f32 to vector<8x96xf32>
      %82 = arith.addf %81, %80 : vector<8x96xf32>
      %83 = arith.divf %81, %82 : vector<8x96xf32>
      %84 = vector.extract_strided_slice %73 {offsets = [0, 96], sizes = [8, 32], strides = [1, 1]} : vector<8x128xf32> to vector<8x32xf32>
      %85 = math.tanh %84 : vector<8x32xf32>
      %86 = vector.extract_strided_slice %77 {offsets = [0, 0], sizes = [8, 96], strides = [1, 1]} : vector<8x128xf32> to vector<8x96xf32>
      %87 = arith.negf %86 : vector<8x96xf32>
      %88 = math.exp %87 : vector<8x96xf32>
      %cst_29 = arith.constant 1.000000e+00 : f32
      %89 = vector.broadcast %cst_29 : f32 to vector<8x96xf32>
      %90 = arith.addf %89, %88 : vector<8x96xf32>
      %91 = arith.divf %89, %90 : vector<8x96xf32>
      %92 = vector.extract_strided_slice %77 {offsets = [0, 96], sizes = [8, 32], strides = [1, 1]} : vector<8x128xf32> to vector<8x32xf32>
      %93 = math.tanh %92 : vector<8x32xf32>
      %94 = vector.extract_strided_slice %83 {offsets = [0, 32], sizes = [8, 32], strides = [1, 1]} : vector<8x96xf32> to vector<8x32xf32>
      %95 = arith.mulf %94, %47 : vector<8x32xf32>
      %96 = vector.extract_strided_slice %83 {offsets = [0, 0], sizes = [8, 32], strides = [1, 1]} : vector<8x96xf32> to vector<8x32xf32>
      %97 = arith.mulf %96, %85 : vector<8x32xf32>
      %98 = arith.addf %95, %97 : vector<8x32xf32>
      %99 = vector.extract_strided_slice %91 {offsets = [0, 32], sizes = [8, 32], strides = [1, 1]} : vector<8x96xf32> to vector<8x32xf32>
      %100 = arith.mulf %99, %52 : vector<8x32xf32>
      %101 = vector.extract_strided_slice %91 {offsets = [0, 0], sizes = [8, 32], strides = [1, 1]} : vector<8x96xf32> to vector<8x32xf32>
      %102 = arith.mulf %101, %93 : vector<8x32xf32>
      %103 = arith.addf %100, %102 : vector<8x32xf32>
      %104 = vector.extract_strided_slice %83 {offsets = [0, 64], sizes = [8, 32], strides = [1, 1]} : vector<8x96xf32> to vector<8x32xf32>
      %105 = math.tanh %98 : vector<8x32xf32>
      %106 = arith.mulf %104, %105 : vector<8x32xf32>
      %107 = vector.extract_strided_slice %91 {offsets = [0, 64], sizes = [8, 32], strides = [1, 1]} : vector<8x96xf32> to vector<8x32xf32>
      %108 = math.tanh %103 : vector<8x32xf32>
      %109 = arith.mulf %107, %108 : vector<8x32xf32>
      %110 = arith.index_cast %66 : i32 to index
      %c0_30 = arith.constant 0 : index
      %111 = vector.load %arg14[%110, %c0_30] : memref<64x32xf32, #tpu.memory_space<vmem>>, vector<8x32xf32>
      tpu.vector_store %arg14[%110, %c0_30], %106 {strides = array<i32>} : memref<64x32xf32, #tpu.memory_space<vmem>>, vector<8x32xf32>,
      %112 = arith.index_cast %68 : i32 to index
      %c0_31 = arith.constant 0 : index
      %113 = vector.load %arg15[%112, %c0_31] : memref<64x32xf32, #tpu.memory_space<vmem>>, vector<8x32xf32>
      tpu.vector_store %arg15[%112, %c0_31], %109 {strides = array<i32>} : memref<64x32xf32, #tpu.memory_space<vmem>>, vector<8x32xf32>,
      %114 = tpu.concatenate %106, %109 in 1 : vector<8x32xf32>, vector<8x32xf32> -> vector<8x64xf32>
      %c2_i32 = arith.constant 2 : i32
      %c7_i32_32 = arith.constant 7 : i32
      %115 = arith.subi %c7_i32_32, %c2_i32 : i32
      %c8_i32_33 = arith.constant 8 : i32
      %116 = arith.muli %c2_i32, %c8_i32_33 : i32
      %117 = tpu.assume_multiple %116, 8 : i32
      %c8_i32_34 = arith.constant 8 : i32
      %118 = arith.muli %115, %c8_i32_34 : i32
      %119 = tpu.assume_multiple %118, 8 : i32
      %cst_35 = arith.constant dense<0.000000e+00> : vector<8x256xf32>
      %120 = tpu.matmul %114, %11, %cst_35 {dimension_numbers = #tpu.dot_dimension_numbers<[1], [0], [0], [1], [0, 0, 1, 1], [], []>} : vector<8x64xf32>, vector<64x256xf32>, vector<8x256xf32> -> vector<8x256xf32>
      %121 = vector.extract_strided_slice %120 {offsets = [0, 0], sizes = [8, 128], strides = [1, 1]} : vector<8x256xf32> to vector<8x128xf32>
      %122 = arith.index_cast %117 : i32 to index
      %c0_36 = arith.constant 0 : index
      %123 = vector.load %alloca[%122, %c0_36] : memref<64x128xf32, #tpu.memory_space<vmem>>, vector<8x128xf32>
      %124 = arith.addf %121, %123 : vector<8x128xf32>
      %125 = vector.extract_strided_slice %120 {offsets = [0, 128], sizes = [8, 128], strides = [1, 1]} : vector<8x256xf32> to vector<8x128xf32>
      %126 = arith.index_cast %119 : i32 to index
      %c0_37 = arith.constant 0 : index
      %127 = vector.load %alloca_0[%126, %c0_37] : memref<64x128xf32, #tpu.memory_space<vmem>>, vector<8x128xf32>
      %128 = arith.addf %125, %127 : vector<8x128xf32>
      %129 = vector.extract_strided_slice %124 {offsets = [0, 0], sizes = [8, 96], strides = [1, 1]} : vector<8x128xf32> to vector<8x96xf32>
      %130 = arith.negf %129 : vector<8x96xf32>
      %131 = math.exp %130 : vector<8x96xf32>
      %cst_38 = arith.constant 1.000000e+00 : f32
      %132 = vector.broadcast %cst_38 : f32 to vector<8x96xf32>
      %133 = arith.addf %132, %131 : vector<8x96xf32>
      %134 = arith.divf %132, %133 : vector<8x96xf32>
      %135 = vector.extract_strided_slice %124 {offsets = [0, 96], sizes = [8, 32], strides = [1, 1]} : vector<8x128xf32> to vector<8x32xf32>
      %136 = math.tanh %135 : vector<8x32xf32>
      %137 = vector.extract_strided_slice %128 {offsets = [0, 0], sizes = [8, 96], strides = [1, 1]} : vector<8x128xf32> to vector<8x96xf32>
      %138 = arith.negf %137 : vector<8x96xf32>
      %139 = math.exp %138 : vector<8x96xf32>
      %cst_39 = arith.constant 1.000000e+00 : f32
      %140 = vector.broadcast %cst_39 : f32 to vector<8x96xf32>
      %141 = arith.addf %140, %139 : vector<8x96xf32>
      %142 = arith.divf %140, %141 : vector<8x96xf32>
      %143 = vector.extract_strided_slice %128 {offsets = [0, 96], sizes = [8, 32], strides = [1, 1]} : vector<8x128xf32> to vector<8x32xf32>
      %144 = math.tanh %143 : vector<8x32xf32>
      %145 = vector.extract_strided_slice %134 {offsets = [0, 32], sizes = [8, 32], strides = [1, 1]} : vector<8x96xf32> to vector<8x32xf32>
      %146 = arith.mulf %145, %98 : vector<8x32xf32>
      %147 = vector.extract_strided_slice %134 {offsets = [0, 0], sizes = [8, 32], strides = [1, 1]} : vector<8x96xf32> to vector<8x32xf32>
      %148 = arith.mulf %147, %136 : vector<8x32xf32>
      %149 = arith.addf %146, %148 : vector<8x32xf32>
      %150 = vector.extract_strided_slice %142 {offsets = [0, 32], sizes = [8, 32], strides = [1, 1]} : vector<8x96xf32> to vector<8x32xf32>
      %151 = arith.mulf %150, %103 : vector<8x32xf32>
      %152 = vector.extract_strided_slice %142 {offsets = [0, 0], sizes = [8, 32], strides = [1, 1]} : vector<8x96xf32> to vector<8x32xf32>
      %153 = arith.mulf %152, %144 : vector<8x32xf32>
      %154 = arith.addf %151, %153 : vector<8x32xf32>
      %155 = vector.extract_strided_slice %134 {offsets = [0, 64], sizes = [8, 32], strides = [1, 1]} : vector<8x96xf32> to vector<8x32xf32>
      %156 = math.tanh %149 : vector<8x32xf32>
      %157 = arith.mulf %155, %156 : vector<8x32xf32>
      %158 = vector.extract_strided_slice %142 {offsets = [0, 64], sizes = [8, 32], strides = [1, 1]} : vector<8x96xf32> to vector<8x32xf32>
      %159 = math.tanh %154 : vector<8x32xf32>
      %160 = arith.mulf %158, %159 : vector<8x32xf32>
      %161 = arith.index_cast %117 : i32 to index
      %c0_40 = arith.constant 0 : index
      %162 = vector.load %arg14[%161, %c0_40] : memref<64x32xf32, #tpu.memory_space<vmem>>, vector<8x32xf32>
      tpu.vector_store %arg14[%161, %c0_40], %157 {strides = array<i32>} : memref<64x32xf32, #tpu.memory_space<vmem>>, vector<8x32xf32>,
      %163 = arith.index_cast %119 : i32 to index
      %c0_41 = arith.constant 0 : index
      %164 = vector.load %arg15[%163, %c0_41] : memref<64x32xf32, #tpu.memory_space<vmem>>, vector<8x32xf32>
      tpu.vector_store %arg15[%163, %c0_41], %160 {strides = array<i32>} : memref<64x32xf32, #tpu.memory_space<vmem>>, vector<8x32xf32>,
      %165 = tpu.concatenate %157, %160 in 1 : vector<8x32xf32>, vector<8x32xf32> -> vector<8x64xf32>
      %c3_i32 = arith.constant 3 : i32
      %c7_i32_42 = arith.constant 7 : i32
      %166 = arith.subi %c7_i32_42, %c3_i32 : i32
      %c8_i32_43 = arith.constant 8 : i32
      %167 = arith.muli %c3_i32, %c8_i32_43 : i32
      %168 = tpu.assume_multiple %167, 8 : i32
      %c8_i32_44 = arith.constant 8 : i32
      %169 = arith.muli %166, %c8_i32_44 : i32
      %170 = tpu.assume_multiple %169, 8 : i32
      %cst_45 = arith.constant dense<0.000000e+00> : vector<8x256xf32>
      %171 = tpu.matmul %165, %11, %cst_45 {dimension_numbers = #tpu.dot_dimension_numbers<[1], [0], [0], [1], [0, 0, 1, 1], [], []>} : vector<8x64xf32>, vector<64x256xf32>, vector<8x256xf32> -> vector<8x256xf32>
      %172 = vector.extract_strided_slice %171 {offsets = [0, 0], sizes = [8, 128], strides = [1, 1]} : vector<8x256xf32> to vector<8x128xf32>
      %173 = arith.index_cast %168 : i32 to index
      %c0_46 = arith.constant 0 : index
      %174 = vector.load %alloca[%173, %c0_46] : memref<64x128xf32, #tpu.memory_space<vmem>>, vector<8x128xf32>
      %175 = arith.addf %172, %174 : vector<8x128xf32>
      %176 = vector.extract_strided_slice %171 {offsets = [0, 128], sizes = [8, 128], strides = [1, 1]} : vector<8x256xf32> to vector<8x128xf32>
      %177 = arith.index_cast %170 : i32 to index
      %c0_47 = arith.constant 0 : index
      %178 = vector.load %alloca_0[%177, %c0_47] : memref<64x128xf32, #tpu.memory_space<vmem>>, vector<8x128xf32>
      %179 = arith.addf %176, %178 : vector<8x128xf32>
      %180 = vector.extract_strided_slice %175 {offsets = [0, 0], sizes = [8, 96], strides = [1, 1]} : vector<8x128xf32> to vector<8x96xf32>
      %181 = arith.negf %180 : vector<8x96xf32>
      %182 = math.exp %181 : vector<8x96xf32>
      %cst_48 = arith.constant 1.000000e+00 : f32
      %183 = vector.broadcast %cst_48 : f32 to vector<8x96xf32>
      %184 = arith.addf %183, %182 : vector<8x96xf32>
      %185 = arith.divf %183, %184 : vector<8x96xf32>
      %186 = vector.extract_strided_slice %175 {offsets = [0, 96], sizes = [8, 32], strides = [1, 1]} : vector<8x128xf32> to vector<8x32xf32>
      %187 = math.tanh %186 : vector<8x32xf32>
      %188 = vector.extract_strided_slice %179 {offsets = [0, 0], sizes = [8, 96], strides = [1, 1]} : vector<8x128xf32> to vector<8x96xf32>
      %189 = arith.negf %188 : vector<8x96xf32>
      %190 = math.exp %189 : vector<8x96xf32>
      %cst_49 = arith.constant 1.000000e+00 : f32
      %191 = vector.broadcast %cst_49 : f32 to vector<8x96xf32>
      %192 = arith.addf %191, %190 : vector<8x96xf32>
      %193 = arith.divf %191, %192 : vector<8x96xf32>
      %194 = vector.extract_strided_slice %179 {offsets = [0, 96], sizes = [8, 32], strides = [1, 1]} : vector<8x128xf32> to vector<8x32xf32>
      %195 = math.tanh %194 : vector<8x32xf32>
      %196 = vector.extract_strided_slice %185 {offsets = [0, 32], sizes = [8, 32], strides = [1, 1]} : vector<8x96xf32> to vector<8x32xf32>
      %197 = arith.mulf %196, %149 : vector<8x32xf32>
      %198 = vector.extract_strided_slice %185 {offsets = [0, 0], sizes = [8, 32], strides = [1, 1]} : vector<8x96xf32> to vector<8x32xf32>
      %199 = arith.mulf %198, %187 : vector<8x32xf32>
      %200 = arith.addf %197, %199 : vector<8x32xf32>
      %201 = vector.extract_strided_slice %193 {offsets = [0, 32], sizes = [8, 32], strides = [1, 1]} : vector<8x96xf32> to vector<8x32xf32>
      %202 = arith.mulf %201, %154 : vector<8x32xf32>
      %203 = vector.extract_strided_slice %193 {offsets = [0, 0], sizes = [8, 32], strides = [1, 1]} : vector<8x96xf32> to vector<8x32xf32>
      %204 = arith.mulf %203, %195 : vector<8x32xf32>
      %205 = arith.addf %202, %204 : vector<8x32xf32>
      %206 = vector.extract_strided_slice %185 {offsets = [0, 64], sizes = [8, 32], strides = [1, 1]} : vector<8x96xf32> to vector<8x32xf32>
      %207 = math.tanh %200 : vector<8x32xf32>
      %208 = arith.mulf %206, %207 : vector<8x32xf32>
      %209 = vector.extract_strided_slice %193 {offsets = [0, 64], sizes = [8, 32], strides = [1, 1]} : vector<8x96xf32> to vector<8x32xf32>
      %210 = math.tanh %205 : vector<8x32xf32>
      %211 = arith.mulf %209, %210 : vector<8x32xf32>
      %212 = arith.index_cast %168 : i32 to index
      %c0_50 = arith.constant 0 : index
      %213 = vector.load %arg14[%212, %c0_50] : memref<64x32xf32, #tpu.memory_space<vmem>>, vector<8x32xf32>
      tpu.vector_store %arg14[%212, %c0_50], %208 {strides = array<i32>} : memref<64x32xf32, #tpu.memory_space<vmem>>, vector<8x32xf32>,
      %214 = arith.index_cast %170 : i32 to index
      %c0_51 = arith.constant 0 : index
      %215 = vector.load %arg15[%214, %c0_51] : memref<64x32xf32, #tpu.memory_space<vmem>>, vector<8x32xf32>
      tpu.vector_store %arg15[%214, %c0_51], %211 {strides = array<i32>} : memref<64x32xf32, #tpu.memory_space<vmem>>, vector<8x32xf32>,
      %216 = tpu.concatenate %208, %211 in 1 : vector<8x32xf32>, vector<8x32xf32> -> vector<8x64xf32>
      %c4_i32 = arith.constant 4 : i32
      %c7_i32_52 = arith.constant 7 : i32
      %217 = arith.subi %c7_i32_52, %c4_i32 : i32
      %c8_i32_53 = arith.constant 8 : i32
      %218 = arith.muli %c4_i32, %c8_i32_53 : i32
      %219 = tpu.assume_multiple %218, 8 : i32
      %c8_i32_54 = arith.constant 8 : i32
      %220 = arith.muli %217, %c8_i32_54 : i32
      %221 = tpu.assume_multiple %220, 8 : i32
      %cst_55 = arith.constant dense<0.000000e+00> : vector<8x256xf32>
      %222 = tpu.matmul %216, %11, %cst_55 {dimension_numbers = #tpu.dot_dimension_numbers<[1], [0], [0], [1], [0, 0, 1, 1], [], []>} : vector<8x64xf32>, vector<64x256xf32>, vector<8x256xf32> -> vector<8x256xf32>
      %223 = vector.extract_strided_slice %222 {offsets = [0, 0], sizes = [8, 128], strides = [1, 1]} : vector<8x256xf32> to vector<8x128xf32>
      %224 = arith.index_cast %219 : i32 to index
      %c0_56 = arith.constant 0 : index
      %225 = vector.load %alloca[%224, %c0_56] : memref<64x128xf32, #tpu.memory_space<vmem>>, vector<8x128xf32>
      %226 = arith.addf %223, %225 : vector<8x128xf32>
      %227 = vector.extract_strided_slice %222 {offsets = [0, 128], sizes = [8, 128], strides = [1, 1]} : vector<8x256xf32> to vector<8x128xf32>
      %228 = arith.index_cast %221 : i32 to index
      %c0_57 = arith.constant 0 : index
      %229 = vector.load %alloca_0[%228, %c0_57] : memref<64x128xf32, #tpu.memory_space<vmem>>, vector<8x128xf32>
      %230 = arith.addf %227, %229 : vector<8x128xf32>
      %231 = vector.extract_strided_slice %226 {offsets = [0, 0], sizes = [8, 96], strides = [1, 1]} : vector<8x128xf32> to vector<8x96xf32>
      %232 = arith.negf %231 : vector<8x96xf32>
      %233 = math.exp %232 : vector<8x96xf32>
      %cst_58 = arith.constant 1.000000e+00 : f32
      %234 = vector.broadcast %cst_58 : f32 to vector<8x96xf32>
      %235 = arith.addf %234, %233 : vector<8x96xf32>
      %236 = arith.divf %234, %235 : vector<8x96xf32>
      %237 = vector.extract_strided_slice %226 {offsets = [0, 96], sizes = [8, 32], strides = [1, 1]} : vector<8x128xf32> to vector<8x32xf32>
      %238 = math.tanh %237 : vector<8x32xf32>
      %239 = vector.extract_strided_slice %230 {offsets = [0, 0], sizes = [8, 96], strides = [1, 1]} : vector<8x128xf32> to vector<8x96xf32>
      %240 = arith.negf %239 : vector<8x96xf32>
      %241 = math.exp %240 : vector<8x96xf32>
      %cst_59 = arith.constant 1.000000e+00 : f32
      %242 = vector.broadcast %cst_59 : f32 to vector<8x96xf32>
      %243 = arith.addf %242, %241 : vector<8x96xf32>
      %244 = arith.divf %242, %243 : vector<8x96xf32>
      %245 = vector.extract_strided_slice %230 {offsets = [0, 96], sizes = [8, 32], strides = [1, 1]} : vector<8x128xf32> to vector<8x32xf32>
      %246 = math.tanh %245 : vector<8x32xf32>
      %247 = vector.extract_strided_slice %236 {offsets = [0, 32], sizes = [8, 32], strides = [1, 1]} : vector<8x96xf32> to vector<8x32xf32>
      %248 = arith.mulf %247, %200 : vector<8x32xf32>
      %249 = vector.extract_strided_slice %236 {offsets = [0, 0], sizes = [8, 32], strides = [1, 1]} : vector<8x96xf32> to vector<8x32xf32>
      %250 = arith.mulf %249, %238 : vector<8x32xf32>
      %251 = arith.addf %248, %250 : vector<8x32xf32>
      %252 = vector.extract_strided_slice %244 {offsets = [0, 32], sizes = [8, 32], strides = [1, 1]} : vector<8x96xf32> to vector<8x32xf32>
      %253 = arith.mulf %252, %205 : vector<8x32xf32>
      %254 = vector.extract_strided_slice %244 {offsets = [0, 0], sizes = [8, 32], strides = [1, 1]} : vector<8x96xf32> to vector<8x32xf32>
      %255 = arith.mulf %254, %246 : vector<8x32xf32>
      %256 = arith.addf %253, %255 : vector<8x32xf32>
      %257 = vector.extract_strided_slice %236 {offsets = [0, 64], sizes = [8, 32], strides = [1, 1]} : vector<8x96xf32> to vector<8x32xf32>
      %258 = math.tanh %251 : vector<8x32xf32>
      %259 = arith.mulf %257, %258 : vector<8x32xf32>
      %260 = vector.extract_strided_slice %244 {offsets = [0, 64], sizes = [8, 32], strides = [1, 1]} : vector<8x96xf32> to vector<8x32xf32>
      %261 = math.tanh %256 : vector<8x32xf32>
      %262 = arith.mulf %260, %261 : vector<8x32xf32>
      %263 = arith.index_cast %219 : i32 to index
      %c0_60 = arith.constant 0 : index
      %264 = vector.load %arg14[%263, %c0_60] : memref<64x32xf32, #tpu.memory_space<vmem>>, vector<8x32xf32>
      tpu.vector_store %arg14[%263, %c0_60], %259 {strides = array<i32>} : memref<64x32xf32, #tpu.memory_space<vmem>>, vector<8x32xf32>,
      %265 = arith.index_cast %221 : i32 to index
      %c0_61 = arith.constant 0 : index
      %266 = vector.load %arg15[%265, %c0_61] : memref<64x32xf32, #tpu.memory_space<vmem>>, vector<8x32xf32>
      tpu.vector_store %arg15[%265, %c0_61], %262 {strides = array<i32>} : memref<64x32xf32, #tpu.memory_space<vmem>>, vector<8x32xf32>,
      %267 = tpu.concatenate %259, %262 in 1 : vector<8x32xf32>, vector<8x32xf32> -> vector<8x64xf32>
      %c5_i32 = arith.constant 5 : i32
      %c7_i32_62 = arith.constant 7 : i32
      %268 = arith.subi %c7_i32_62, %c5_i32 : i32
      %c8_i32_63 = arith.constant 8 : i32
      %269 = arith.muli %c5_i32, %c8_i32_63 : i32
      %270 = tpu.assume_multiple %269, 8 : i32
      %c8_i32_64 = arith.constant 8 : i32
      %271 = arith.muli %268, %c8_i32_64 : i32
      %272 = tpu.assume_multiple %271, 8 : i32
      %cst_65 = arith.constant dense<0.000000e+00> : vector<8x256xf32>
      %273 = tpu.matmul %267, %11, %cst_65 {dimension_numbers = #tpu.dot_dimension_numbers<[1], [0], [0], [1], [0, 0, 1, 1], [], []>} : vector<8x64xf32>, vector<64x256xf32>, vector<8x256xf32> -> vector<8x256xf32>
      %274 = vector.extract_strided_slice %273 {offsets = [0, 0], sizes = [8, 128], strides = [1, 1]} : vector<8x256xf32> to vector<8x128xf32>
      %275 = arith.index_cast %270 : i32 to index
      %c0_66 = arith.constant 0 : index
      %276 = vector.load %alloca[%275, %c0_66] : memref<64x128xf32, #tpu.memory_space<vmem>>, vector<8x128xf32>
      %277 = arith.addf %274, %276 : vector<8x128xf32>
      %278 = vector.extract_strided_slice %273 {offsets = [0, 128], sizes = [8, 128], strides = [1, 1]} : vector<8x256xf32> to vector<8x128xf32>
      %279 = arith.index_cast %272 : i32 to index
      %c0_67 = arith.constant 0 : index
      %280 = vector.load %alloca_0[%279, %c0_67] : memref<64x128xf32, #tpu.memory_space<vmem>>, vector<8x128xf32>
      %281 = arith.addf %278, %280 : vector<8x128xf32>
      %282 = vector.extract_strided_slice %277 {offsets = [0, 0], sizes = [8, 96], strides = [1, 1]} : vector<8x128xf32> to vector<8x96xf32>
      %283 = arith.negf %282 : vector<8x96xf32>
      %284 = math.exp %283 : vector<8x96xf32>
      %cst_68 = arith.constant 1.000000e+00 : f32
      %285 = vector.broadcast %cst_68 : f32 to vector<8x96xf32>
      %286 = arith.addf %285, %284 : vector<8x96xf32>
      %287 = arith.divf %285, %286 : vector<8x96xf32>
      %288 = vector.extract_strided_slice %277 {offsets = [0, 96], sizes = [8, 32], strides = [1, 1]} : vector<8x128xf32> to vector<8x32xf32>
      %289 = math.tanh %288 : vector<8x32xf32>
      %290 = vector.extract_strided_slice %281 {offsets = [0, 0], sizes = [8, 96], strides = [1, 1]} : vector<8x128xf32> to vector<8x96xf32>
      %291 = arith.negf %290 : vector<8x96xf32>
      %292 = math.exp %291 : vector<8x96xf32>
      %cst_69 = arith.constant 1.000000e+00 : f32
      %293 = vector.broadcast %cst_69 : f32 to vector<8x96xf32>
      %294 = arith.addf %293, %292 : vector<8x96xf32>
      %295 = arith.divf %293, %294 : vector<8x96xf32>
      %296 = vector.extract_strided_slice %281 {offsets = [0, 96], sizes = [8, 32], strides = [1, 1]} : vector<8x128xf32> to vector<8x32xf32>
      %297 = math.tanh %296 : vector<8x32xf32>
      %298 = vector.extract_strided_slice %287 {offsets = [0, 32], sizes = [8, 32], strides = [1, 1]} : vector<8x96xf32> to vector<8x32xf32>
      %299 = arith.mulf %298, %251 : vector<8x32xf32>
      %300 = vector.extract_strided_slice %287 {offsets = [0, 0], sizes = [8, 32], strides = [1, 1]} : vector<8x96xf32> to vector<8x32xf32>
      %301 = arith.mulf %300, %289 : vector<8x32xf32>
      %302 = arith.addf %299, %301 : vector<8x32xf32>
      %303 = vector.extract_strided_slice %295 {offsets = [0, 32], sizes = [8, 32], strides = [1, 1]} : vector<8x96xf32> to vector<8x32xf32>
      %304 = arith.mulf %303, %256 : vector<8x32xf32>
      %305 = vector.extract_strided_slice %295 {offsets = [0, 0], sizes = [8, 32], strides = [1, 1]} : vector<8x96xf32> to vector<8x32xf32>
      %306 = arith.mulf %305, %297 : vector<8x32xf32>
      %307 = arith.addf %304, %306 : vector<8x32xf32>
      %308 = vector.extract_strided_slice %287 {offsets = [0, 64], sizes = [8, 32], strides = [1, 1]} : vector<8x96xf32> to vector<8x32xf32>
      %309 = math.tanh %302 : vector<8x32xf32>
      %310 = arith.mulf %308, %309 : vector<8x32xf32>
      %311 = vector.extract_strided_slice %295 {offsets = [0, 64], sizes = [8, 32], strides = [1, 1]} : vector<8x96xf32> to vector<8x32xf32>
      %312 = math.tanh %307 : vector<8x32xf32>
      %313 = arith.mulf %311, %312 : vector<8x32xf32>
      %314 = arith.index_cast %270 : i32 to index
      %c0_70 = arith.constant 0 : index
      %315 = vector.load %arg14[%314, %c0_70] : memref<64x32xf32, #tpu.memory_space<vmem>>, vector<8x32xf32>
      tpu.vector_store %arg14[%314, %c0_70], %310 {strides = array<i32>} : memref<64x32xf32, #tpu.memory_space<vmem>>, vector<8x32xf32>,
      %316 = arith.index_cast %272 : i32 to index
      %c0_71 = arith.constant 0 : index
      %317 = vector.load %arg15[%316, %c0_71] : memref<64x32xf32, #tpu.memory_space<vmem>>, vector<8x32xf32>
      tpu.vector_store %arg15[%316, %c0_71], %313 {strides = array<i32>} : memref<64x32xf32, #tpu.memory_space<vmem>>, vector<8x32xf32>,
      %318 = tpu.concatenate %310, %313 in 1 : vector<8x32xf32>, vector<8x32xf32> -> vector<8x64xf32>
      %c6_i32 = arith.constant 6 : i32
      %c7_i32_72 = arith.constant 7 : i32
      %319 = arith.subi %c7_i32_72, %c6_i32 : i32
      %c8_i32_73 = arith.constant 8 : i32
      %320 = arith.muli %c6_i32, %c8_i32_73 : i32
      %321 = tpu.assume_multiple %320, 8 : i32
      %c8_i32_74 = arith.constant 8 : i32
      %322 = arith.muli %319, %c8_i32_74 : i32
      %323 = tpu.assume_multiple %322, 8 : i32
      %cst_75 = arith.constant dense<0.000000e+00> : vector<8x256xf32>
      %324 = tpu.matmul %318, %11, %cst_75 {dimension_numbers = #tpu.dot_dimension_numbers<[1], [0], [0], [1], [0, 0, 1, 1], [], []>} : vector<8x64xf32>, vector<64x256xf32>, vector<8x256xf32> -> vector<8x256xf32>
      %325 = vector.extract_strided_slice %324 {offsets = [0, 0], sizes = [8, 128], strides = [1, 1]} : vector<8x256xf32> to vector<8x128xf32>
      %326 = arith.index_cast %321 : i32 to index
      %c0_76 = arith.constant 0 : index
      %327 = vector.load %alloca[%326, %c0_76] : memref<64x128xf32, #tpu.memory_space<vmem>>, vector<8x128xf32>
      %328 = arith.addf %325, %327 : vector<8x128xf32>
      %329 = vector.extract_strided_slice %324 {offsets = [0, 128], sizes = [8, 128], strides = [1, 1]} : vector<8x256xf32> to vector<8x128xf32>
      %330 = arith.index_cast %323 : i32 to index
      %c0_77 = arith.constant 0 : index
      %331 = vector.load %alloca_0[%330, %c0_77] : memref<64x128xf32, #tpu.memory_space<vmem>>, vector<8x128xf32>
      %332 = arith.addf %329, %331 : vector<8x128xf32>
      %333 = vector.extract_strided_slice %328 {offsets = [0, 0], sizes = [8, 96], strides = [1, 1]} : vector<8x128xf32> to vector<8x96xf32>
      %334 = arith.negf %333 : vector<8x96xf32>
      %335 = math.exp %334 : vector<8x96xf32>
      %cst_78 = arith.constant 1.000000e+00 : f32
      %336 = vector.broadcast %cst_78 : f32 to vector<8x96xf32>
      %337 = arith.addf %336, %335 : vector<8x96xf32>
      %338 = arith.divf %336, %337 : vector<8x96xf32>
      %339 = vector.extract_strided_slice %328 {offsets = [0, 96], sizes = [8, 32], strides = [1, 1]} : vector<8x128xf32> to vector<8x32xf32>
      %340 = math.tanh %339 : vector<8x32xf32>
      %341 = vector.extract_strided_slice %332 {offsets = [0, 0], sizes = [8, 96], strides = [1, 1]} : vector<8x128xf32> to vector<8x96xf32>
      %342 = arith.negf %341 : vector<8x96xf32>
      %343 = math.exp %342 : vector<8x96xf32>
      %cst_79 = arith.constant 1.000000e+00 : f32
      %344 = vector.broadcast %cst_79 : f32 to vector<8x96xf32>
      %345 = arith.addf %344, %343 : vector<8x96xf32>
      %346 = arith.divf %344, %345 : vector<8x96xf32>
      %347 = vector.extract_strided_slice %332 {offsets = [0, 96], sizes = [8, 32], strides = [1, 1]} : vector<8x128xf32> to vector<8x32xf32>
      %348 = math.tanh %347 : vector<8x32xf32>
      %349 = vector.extract_strided_slice %338 {offsets = [0, 32], sizes = [8, 32], strides = [1, 1]} : vector<8x96xf32> to vector<8x32xf32>
      %350 = arith.mulf %349, %302 : vector<8x32xf32>
      %351 = vector.extract_strided_slice %338 {offsets = [0, 0], sizes = [8, 32], strides = [1, 1]} : vector<8x96xf32> to vector<8x32xf32>
      %352 = arith.mulf %351, %340 : vector<8x32xf32>
      %353 = arith.addf %350, %352 : vector<8x32xf32>
      %354 = vector.extract_strided_slice %346 {offsets = [0, 32], sizes = [8, 32], strides = [1, 1]} : vector<8x96xf32> to vector<8x32xf32>
      %355 = arith.mulf %354, %307 : vector<8x32xf32>
      %356 = vector.extract_strided_slice %346 {offsets = [0, 0], sizes = [8, 32], strides = [1, 1]} : vector<8x96xf32> to vector<8x32xf32>
      %357 = arith.mulf %356, %348 : vector<8x32xf32>
      %358 = arith.addf %355, %357 : vector<8x32xf32>
      %359 = vector.extract_strided_slice %338 {offsets = [0, 64], sizes = [8, 32], strides = [1, 1]} : vector<8x96xf32> to vector<8x32xf32>
      %360 = math.tanh %353 : vector<8x32xf32>
      %361 = arith.mulf %359, %360 : vector<8x32xf32>
      %362 = vector.extract_strided_slice %346 {offsets = [0, 64], sizes = [8, 32], strides = [1, 1]} : vector<8x96xf32> to vector<8x32xf32>
      %363 = math.tanh %358 : vector<8x32xf32>
      %364 = arith.mulf %362, %363 : vector<8x32xf32>
      %365 = arith.index_cast %321 : i32 to index
      %c0_80 = arith.constant 0 : index
      %366 = vector.load %arg14[%365, %c0_80] : memref<64x32xf32, #tpu.memory_space<vmem>>, vector<8x32xf32>
      tpu.vector_store %arg14[%365, %c0_80], %361 {strides = array<i32>} : memref<64x32xf32, #tpu.memory_space<vmem>>, vector<8x32xf32>,
      %367 = arith.index_cast %323 : i32 to index
      %c0_81 = arith.constant 0 : index
      %368 = vector.load %arg15[%367, %c0_81] : memref<64x32xf32, #tpu.memory_space<vmem>>, vector<8x32xf32>
      tpu.vector_store %arg15[%367, %c0_81], %364 {strides = array<i32>} : memref<64x32xf32, #tpu.memory_space<vmem>>, vector<8x32xf32>,
      %369 = tpu.concatenate %361, %364 in 1 : vector<8x32xf32>, vector<8x32xf32> -> vector<8x64xf32>
      %c7_i32_82 = arith.constant 7 : i32
      %c7_i32_83 = arith.constant 7 : i32
      %370 = arith.subi %c7_i32_83, %c7_i32_82 : i32
      %c8_i32_84 = arith.constant 8 : i32
      %371 = arith.muli %c7_i32_82, %c8_i32_84 : i32
      %372 = tpu.assume_multiple %371, 8 : i32
      %c8_i32_85 = arith.constant 8 : i32
      %373 = arith.muli %370, %c8_i32_85 : i32
      %374 = tpu.assume_multiple %373, 8 : i32
      %cst_86 = arith.constant dense<0.000000e+00> : vector<8x256xf32>
      %375 = tpu.matmul %369, %11, %cst_86 {dimension_numbers = #tpu.dot_dimension_numbers<[1], [0], [0], [1], [0, 0, 1, 1], [], []>} : vector<8x64xf32>, vector<64x256xf32>, vector<8x256xf32> -> vector<8x256xf32>
      %376 = vector.extract_strided_slice %375 {offsets = [0, 0], sizes = [8, 128], strides = [1, 1]} : vector<8x256xf32> to vector<8x128xf32>
      %377 = arith.index_cast %372 : i32 to index
      %c0_87 = arith.constant 0 : index
      %378 = vector.load %alloca[%377, %c0_87] : memref<64x128xf32, #tpu.memory_space<vmem>>, vector<8x128xf32>
      %379 = arith.addf %376, %378 : vector<8x128xf32>
      %380 = vector.extract_strided_slice %375 {offsets = [0, 128], sizes = [8, 128], strides = [1, 1]} : vector<8x256xf32> to vector<8x128xf32>
      %381 = arith.index_cast %374 : i32 to index
      %c0_88 = arith.constant 0 : index
      %382 = vector.load %alloca_0[%381, %c0_88] : memref<64x128xf32, #tpu.memory_space<vmem>>, vector<8x128xf32>
      %383 = arith.addf %380, %382 : vector<8x128xf32>
      %384 = vector.extract_strided_slice %379 {offsets = [0, 0], sizes = [8, 96], strides = [1, 1]} : vector<8x128xf32> to vector<8x96xf32>
      %385 = arith.negf %384 : vector<8x96xf32>
      %386 = math.exp %385 : vector<8x96xf32>
      %cst_89 = arith.constant 1.000000e+00 : f32
      %387 = vector.broadcast %cst_89 : f32 to vector<8x96xf32>
      %388 = arith.addf %387, %386 : vector<8x96xf32>
      %389 = arith.divf %387, %388 : vector<8x96xf32>
      %390 = vector.extract_strided_slice %379 {offsets = [0, 96], sizes = [8, 32], strides = [1, 1]} : vector<8x128xf32> to vector<8x32xf32>
      %391 = math.tanh %390 : vector<8x32xf32>
      %392 = vector.extract_strided_slice %383 {offsets = [0, 0], sizes = [8, 96], strides = [1, 1]} : vector<8x128xf32> to vector<8x96xf32>
      %393 = arith.negf %392 : vector<8x96xf32>
      %394 = math.exp %393 : vector<8x96xf32>
      %cst_90 = arith.constant 1.000000e+00 : f32
      %395 = vector.broadcast %cst_90 : f32 to vector<8x96xf32>
      %396 = arith.addf %395, %394 : vector<8x96xf32>
      %397 = arith.divf %395, %396 : vector<8x96xf32>
      %398 = vector.extract_strided_slice %383 {offsets = [0, 96], sizes = [8, 32], strides = [1, 1]} : vector<8x128xf32> to vector<8x32xf32>
      %399 = math.tanh %398 : vector<8x32xf32>
      %400 = vector.extract_strided_slice %389 {offsets = [0, 32], sizes = [8, 32], strides = [1, 1]} : vector<8x96xf32> to vector<8x32xf32>
      %401 = arith.mulf %400, %353 : vector<8x32xf32>
      %402 = vector.extract_strided_slice %389 {offsets = [0, 0], sizes = [8, 32], strides = [1, 1]} : vector<8x96xf32> to vector<8x32xf32>
      %403 = arith.mulf %402, %391 : vector<8x32xf32>
      %404 = arith.addf %401, %403 : vector<8x32xf32>
      %405 = vector.extract_strided_slice %397 {offsets = [0, 32], sizes = [8, 32], strides = [1, 1]} : vector<8x96xf32> to vector<8x32xf32>
      %406 = arith.mulf %405, %358 : vector<8x32xf32>
      %407 = vector.extract_strided_slice %397 {offsets = [0, 0], sizes = [8, 32], strides = [1, 1]} : vector<8x96xf32> to vector<8x32xf32>
      %408 = arith.mulf %407, %399 : vector<8x32xf32>
      %409 = arith.addf %406, %408 : vector<8x32xf32>
      %410 = vector.extract_strided_slice %389 {offsets = [0, 64], sizes = [8, 32], strides = [1, 1]} : vector<8x96xf32> to vector<8x32xf32>
      %411 = math.tanh %404 : vector<8x32xf32>
      %412 = arith.mulf %410, %411 : vector<8x32xf32>
      %413 = vector.extract_strided_slice %397 {offsets = [0, 64], sizes = [8, 32], strides = [1, 1]} : vector<8x96xf32> to vector<8x32xf32>
      %414 = math.tanh %409 : vector<8x32xf32>
      %415 = arith.mulf %413, %414 : vector<8x32xf32>
      %416 = arith.index_cast %372 : i32 to index
      %c0_91 = arith.constant 0 : index
      %417 = vector.load %arg14[%416, %c0_91] : memref<64x32xf32, #tpu.memory_space<vmem>>, vector<8x32xf32>
      tpu.vector_store %arg14[%416, %c0_91], %412 {strides = array<i32>} : memref<64x32xf32, #tpu.memory_space<vmem>>, vector<8x32xf32>,
      %418 = arith.index_cast %374 : i32 to index
      %c0_92 = arith.constant 0 : index
      %419 = vector.load %arg15[%418, %c0_92] : memref<64x32xf32, #tpu.memory_space<vmem>>, vector<8x32xf32>
      tpu.vector_store %arg15[%418, %c0_92], %415 {strides = array<i32>} : memref<64x32xf32, #tpu.memory_space<vmem>>, vector<8x32xf32>,
      %420 = tpu.concatenate %412, %415 in 1 : vector<8x32xf32>, vector<8x32xf32> -> vector<8x64xf32>
      %c8_i32_93 = arith.constant 8 : i32
      tpu.yield
    }) : () -> ()
    "tpu.region"() ({
      %alloca = memref.alloca() : memref<64x128xf32, #tpu.memory_space<vmem>>
      %c0 = arith.constant 0 : index
      %c0_0 = arith.constant 0 : index
      %1 = vector.load %arg14[%c0, %c0_0] : memref<64x32xf32, #tpu.memory_space<vmem>>, vector<64x32xf32>
      %c0_1 = arith.constant 0 : index
      %c0_2 = arith.constant 0 : index
      %2 = vector.load %arg15[%c0_1, %c0_2] : memref<64x32xf32, #tpu.memory_space<vmem>>, vector<64x32xf32>
      %c0_3 = arith.constant 0 : index
      %c0_4 = arith.constant 0 : index
      %3 = vector.load %arg4[%c0_3, %c0_4] : memref<64x128xf32, #tpu.memory_space<vmem>>, vector<64x128xf32>
      %4 = vector.extract_strided_slice %3 {offsets = [0, 0], sizes = [32, 128], strides = [1, 1]} : vector<64x128xf32> to vector<32x128xf32>
      %cst_5 = arith.constant dense<0.000000e+00> : vector<64x128xf32>
      %5 = tpu.matmul %1, %4, %cst_5 {dimension_numbers = #tpu.dot_dimension_numbers<[1], [0], [0], [1], [0, 0, 1, 1], [], []>} : vector<64x32xf32>, vector<32x128xf32>, vector<64x128xf32> -> vector<64x128xf32>
      %6 = vector.extract_strided_slice %3 {offsets = [32, 0], sizes = [32, 128], strides = [1, 1]} : vector<64x128xf32> to vector<32x128xf32>
      %cst_6 = arith.constant dense<0.000000e+00> : vector<64x128xf32>
      %7 = tpu.matmul %2, %6, %cst_6 {dimension_numbers = #tpu.dot_dimension_numbers<[1], [0], [0], [1], [0, 0, 1, 1], [], []>} : vector<64x32xf32>, vector<32x128xf32>, vector<64x128xf32> -> vector<64x128xf32>
      %8 = arith.addf %5, %7 : vector<64x128xf32>
      %c0_7 = arith.constant 0 : index
      %c0_8 = arith.constant 0 : index
      %9 = vector.load %arg5[%c0_7, %c0_8] : memref<1x128xf32, #tpu.memory_space<vmem>>, vector<1x128xf32>
      %10 = vector.broadcast %9 : vector<1x128xf32> to vector<64x128xf32>
      %11 = arith.addf %8, %10 : vector<64x128xf32>
      %c0_9 = arith.constant 0 : index
      %c0_10 = arith.constant 0 : index
      %12 = vector.load %alloca[%c0_9, %c0_10] : memref<64x128xf32, #tpu.memory_space<vmem>>, vector<64x128xf32>
      tpu.vector_store %alloca[%c0_9, %c0_10], %11 {strides = array<i32>} : memref<64x128xf32, #tpu.memory_space<vmem>>, vector<64x128xf32>,
      %c0_11 = arith.constant 0 : index
      %c0_12 = arith.constant 0 : index
      %13 = vector.load %arg6[%c0_11, %c0_12] : memref<32x128xf32, #tpu.memory_space<vmem>>, vector<32x128xf32>
      %c0_i32 = arith.constant 0 : i32
      %c8_i32 = arith.constant 8 : i32
      %14 = arith.muli %c0_i32, %c8_i32 : i32
      %15 = tpu.assume_multiple %14, 8 : i32
      %16 = arith.index_cast %15 : i32 to index
      %c0_13 = arith.constant 0 : index
      %17 = vector.load %alloca[%16, %c0_13] : memref<64x128xf32, #tpu.memory_space<vmem>>, vector<8x128xf32>
      %cst_14 = arith.constant dense<0.000000e+00> : vector<8x128xf32>
      %18 = tpu.matmul %0, %13, %cst_14 {dimension_numbers = #tpu.dot_dimension_numbers<[1], [0], [0], [1], [0, 0, 1, 1], [], []>} : vector<8x32xf32>, vector<32x128xf32>, vector<8x128xf32> -> vector<8x128xf32>
      %19 = arith.addf %17, %18 : vector<8x128xf32>
      %20 = vector.extract_strided_slice %19 {offsets = [0, 0], sizes = [8, 96], strides = [1, 1]} : vector<8x128xf32> to vector<8x96xf32>
      %21 = arith.negf %20 : vector<8x96xf32>
      %22 = math.exp %21 : vector<8x96xf32>
      %cst_15 = arith.constant 1.000000e+00 : f32
      %23 = vector.broadcast %cst_15 : f32 to vector<8x96xf32>
      %24 = arith.addf %23, %22 : vector<8x96xf32>
      %25 = arith.divf %23, %24 : vector<8x96xf32>
      %26 = vector.extract_strided_slice %19 {offsets = [0, 96], sizes = [8, 32], strides = [1, 1]} : vector<8x128xf32> to vector<8x32xf32>
      %27 = math.tanh %26 : vector<8x32xf32>
      %28 = vector.extract_strided_slice %25 {offsets = [0, 32], sizes = [8, 32], strides = [1, 1]} : vector<8x96xf32> to vector<8x32xf32>
      %29 = arith.mulf %28, %0 : vector<8x32xf32>
      %30 = vector.extract_strided_slice %25 {offsets = [0, 0], sizes = [8, 32], strides = [1, 1]} : vector<8x96xf32> to vector<8x32xf32>
      %31 = arith.mulf %30, %27 : vector<8x32xf32>
      %32 = arith.addf %29, %31 : vector<8x32xf32>
      %33 = vector.extract_strided_slice %25 {offsets = [0, 64], sizes = [8, 32], strides = [1, 1]} : vector<8x96xf32> to vector<8x32xf32>
      %34 = math.tanh %32 : vector<8x32xf32>
      %35 = arith.mulf %33, %34 : vector<8x32xf32>
      %c1_i32 = arith.constant 1 : i32
      %c8_i32_16 = arith.constant 8 : i32
      %36 = arith.muli %c1_i32, %c8_i32_16 : i32
      %37 = tpu.assume_multiple %36, 8 : i32
      %38 = arith.index_cast %37 : i32 to index
      %c0_17 = arith.constant 0 : index
      %39 = vector.load %alloca[%38, %c0_17] : memref<64x128xf32, #tpu.memory_space<vmem>>, vector<8x128xf32>
      %cst_18 = arith.constant dense<0.000000e+00> : vector<8x128xf32>
      %40 = tpu.matmul %35, %13, %cst_18 {dimension_numbers = #tpu.dot_dimension_numbers<[1], [0], [0], [1], [0, 0, 1, 1], [], []>} : vector<8x32xf32>, vector<32x128xf32>, vector<8x128xf32> -> vector<8x128xf32>
      %41 = arith.addf %39, %40 : vector<8x128xf32>
      %42 = vector.extract_strided_slice %41 {offsets = [0, 0], sizes = [8, 96], strides = [1, 1]} : vector<8x128xf32> to vector<8x96xf32>
      %43 = arith.negf %42 : vector<8x96xf32>
      %44 = math.exp %43 : vector<8x96xf32>
      %cst_19 = arith.constant 1.000000e+00 : f32
      %45 = vector.broadcast %cst_19 : f32 to vector<8x96xf32>
      %46 = arith.addf %45, %44 : vector<8x96xf32>
      %47 = arith.divf %45, %46 : vector<8x96xf32>
      %48 = vector.extract_strided_slice %41 {offsets = [0, 96], sizes = [8, 32], strides = [1, 1]} : vector<8x128xf32> to vector<8x32xf32>
      %49 = math.tanh %48 : vector<8x32xf32>
      %50 = vector.extract_strided_slice %47 {offsets = [0, 32], sizes = [8, 32], strides = [1, 1]} : vector<8x96xf32> to vector<8x32xf32>
      %51 = arith.mulf %50, %32 : vector<8x32xf32>
      %52 = vector.extract_strided_slice %47 {offsets = [0, 0], sizes = [8, 32], strides = [1, 1]} : vector<8x96xf32> to vector<8x32xf32>
      %53 = arith.mulf %52, %49 : vector<8x32xf32>
      %54 = arith.addf %51, %53 : vector<8x32xf32>
      %55 = vector.extract_strided_slice %47 {offsets = [0, 64], sizes = [8, 32], strides = [1, 1]} : vector<8x96xf32> to vector<8x32xf32>
      %56 = math.tanh %54 : vector<8x32xf32>
      %57 = arith.mulf %55, %56 : vector<8x32xf32>
      %c2_i32 = arith.constant 2 : i32
      %c8_i32_20 = arith.constant 8 : i32
      %58 = arith.muli %c2_i32, %c8_i32_20 : i32
      %59 = tpu.assume_multiple %58, 8 : i32
      %60 = arith.index_cast %59 : i32 to index
      %c0_21 = arith.constant 0 : index
      %61 = vector.load %alloca[%60, %c0_21] : memref<64x128xf32, #tpu.memory_space<vmem>>, vector<8x128xf32>
      %cst_22 = arith.constant dense<0.000000e+00> : vector<8x128xf32>
      %62 = tpu.matmul %57, %13, %cst_22 {dimension_numbers = #tpu.dot_dimension_numbers<[1], [0], [0], [1], [0, 0, 1, 1], [], []>} : vector<8x32xf32>, vector<32x128xf32>, vector<8x128xf32> -> vector<8x128xf32>
      %63 = arith.addf %61, %62 : vector<8x128xf32>
      %64 = vector.extract_strided_slice %63 {offsets = [0, 0], sizes = [8, 96], strides = [1, 1]} : vector<8x128xf32> to vector<8x96xf32>
      %65 = arith.negf %64 : vector<8x96xf32>
      %66 = math.exp %65 : vector<8x96xf32>
      %cst_23 = arith.constant 1.000000e+00 : f32
      %67 = vector.broadcast %cst_23 : f32 to vector<8x96xf32>
      %68 = arith.addf %67, %66 : vector<8x96xf32>
      %69 = arith.divf %67, %68 : vector<8x96xf32>
      %70 = vector.extract_strided_slice %63 {offsets = [0, 96], sizes = [8, 32], strides = [1, 1]} : vector<8x128xf32> to vector<8x32xf32>
      %71 = math.tanh %70 : vector<8x32xf32>
      %72 = vector.extract_strided_slice %69 {offsets = [0, 32], sizes = [8, 32], strides = [1, 1]} : vector<8x96xf32> to vector<8x32xf32>
      %73 = arith.mulf %72, %54 : vector<8x32xf32>
      %74 = vector.extract_strided_slice %69 {offsets = [0, 0], sizes = [8, 32], strides = [1, 1]} : vector<8x96xf32> to vector<8x32xf32>
      %75 = arith.mulf %74, %71 : vector<8x32xf32>
      %76 = arith.addf %73, %75 : vector<8x32xf32>
      %77 = vector.extract_strided_slice %69 {offsets = [0, 64], sizes = [8, 32], strides = [1, 1]} : vector<8x96xf32> to vector<8x32xf32>
      %78 = math.tanh %76 : vector<8x32xf32>
      %79 = arith.mulf %77, %78 : vector<8x32xf32>
      %c3_i32 = arith.constant 3 : i32
      %c8_i32_24 = arith.constant 8 : i32
      %80 = arith.muli %c3_i32, %c8_i32_24 : i32
      %81 = tpu.assume_multiple %80, 8 : i32
      %82 = arith.index_cast %81 : i32 to index
      %c0_25 = arith.constant 0 : index
      %83 = vector.load %alloca[%82, %c0_25] : memref<64x128xf32, #tpu.memory_space<vmem>>, vector<8x128xf32>
      %cst_26 = arith.constant dense<0.000000e+00> : vector<8x128xf32>
      %84 = tpu.matmul %79, %13, %cst_26 {dimension_numbers = #tpu.dot_dimension_numbers<[1], [0], [0], [1], [0, 0, 1, 1], [], []>} : vector<8x32xf32>, vector<32x128xf32>, vector<8x128xf32> -> vector<8x128xf32>
      %85 = arith.addf %83, %84 : vector<8x128xf32>
      %86 = vector.extract_strided_slice %85 {offsets = [0, 0], sizes = [8, 96], strides = [1, 1]} : vector<8x128xf32> to vector<8x96xf32>
      %87 = arith.negf %86 : vector<8x96xf32>
      %88 = math.exp %87 : vector<8x96xf32>
      %cst_27 = arith.constant 1.000000e+00 : f32
      %89 = vector.broadcast %cst_27 : f32 to vector<8x96xf32>
      %90 = arith.addf %89, %88 : vector<8x96xf32>
      %91 = arith.divf %89, %90 : vector<8x96xf32>
      %92 = vector.extract_strided_slice %85 {offsets = [0, 96], sizes = [8, 32], strides = [1, 1]} : vector<8x128xf32> to vector<8x32xf32>
      %93 = math.tanh %92 : vector<8x32xf32>
      %94 = vector.extract_strided_slice %91 {offsets = [0, 32], sizes = [8, 32], strides = [1, 1]} : vector<8x96xf32> to vector<8x32xf32>
      %95 = arith.mulf %94, %76 : vector<8x32xf32>
      %96 = vector.extract_strided_slice %91 {offsets = [0, 0], sizes = [8, 32], strides = [1, 1]} : vector<8x96xf32> to vector<8x32xf32>
      %97 = arith.mulf %96, %93 : vector<8x32xf32>
      %98 = arith.addf %95, %97 : vector<8x32xf32>
      %99 = vector.extract_strided_slice %91 {offsets = [0, 64], sizes = [8, 32], strides = [1, 1]} : vector<8x96xf32> to vector<8x32xf32>
      %100 = math.tanh %98 : vector<8x32xf32>
      %101 = arith.mulf %99, %100 : vector<8x32xf32>
      %c4_i32 = arith.constant 4 : i32
      %c8_i32_28 = arith.constant 8 : i32
      %102 = arith.muli %c4_i32, %c8_i32_28 : i32
      %103 = tpu.assume_multiple %102, 8 : i32
      %104 = arith.index_cast %103 : i32 to index
      %c0_29 = arith.constant 0 : index
      %105 = vector.load %alloca[%104, %c0_29] : memref<64x128xf32, #tpu.memory_space<vmem>>, vector<8x128xf32>
      %cst_30 = arith.constant dense<0.000000e+00> : vector<8x128xf32>
      %106 = tpu.matmul %101, %13, %cst_30 {dimension_numbers = #tpu.dot_dimension_numbers<[1], [0], [0], [1], [0, 0, 1, 1], [], []>} : vector<8x32xf32>, vector<32x128xf32>, vector<8x128xf32> -> vector<8x128xf32>
      %107 = arith.addf %105, %106 : vector<8x128xf32>
      %108 = vector.extract_strided_slice %107 {offsets = [0, 0], sizes = [8, 96], strides = [1, 1]} : vector<8x128xf32> to vector<8x96xf32>
      %109 = arith.negf %108 : vector<8x96xf32>
      %110 = math.exp %109 : vector<8x96xf32>
      %cst_31 = arith.constant 1.000000e+00 : f32
      %111 = vector.broadcast %cst_31 : f32 to vector<8x96xf32>
      %112 = arith.addf %111, %110 : vector<8x96xf32>
      %113 = arith.divf %111, %112 : vector<8x96xf32>
      %114 = vector.extract_strided_slice %107 {offsets = [0, 96], sizes = [8, 32], strides = [1, 1]} : vector<8x128xf32> to vector<8x32xf32>
      %115 = math.tanh %114 : vector<8x32xf32>
      %116 = vector.extract_strided_slice %113 {offsets = [0, 32], sizes = [8, 32], strides = [1, 1]} : vector<8x96xf32> to vector<8x32xf32>
      %117 = arith.mulf %116, %98 : vector<8x32xf32>
      %118 = vector.extract_strided_slice %113 {offsets = [0, 0], sizes = [8, 32], strides = [1, 1]} : vector<8x96xf32> to vector<8x32xf32>
      %119 = arith.mulf %118, %115 : vector<8x32xf32>
      %120 = arith.addf %117, %119 : vector<8x32xf32>
      %121 = vector.extract_strided_slice %113 {offsets = [0, 64], sizes = [8, 32], strides = [1, 1]} : vector<8x96xf32> to vector<8x32xf32>
      %122 = math.tanh %120 : vector<8x32xf32>
      %123 = arith.mulf %121, %122 : vector<8x32xf32>
      %c5_i32 = arith.constant 5 : i32
      %c8_i32_32 = arith.constant 8 : i32
      %124 = arith.muli %c5_i32, %c8_i32_32 : i32
      %125 = tpu.assume_multiple %124, 8 : i32
      %126 = arith.index_cast %125 : i32 to index
      %c0_33 = arith.constant 0 : index
      %127 = vector.load %alloca[%126, %c0_33] : memref<64x128xf32, #tpu.memory_space<vmem>>, vector<8x128xf32>
      %cst_34 = arith.constant dense<0.000000e+00> : vector<8x128xf32>
      %128 = tpu.matmul %123, %13, %cst_34 {dimension_numbers = #tpu.dot_dimension_numbers<[1], [0], [0], [1], [0, 0, 1, 1], [], []>} : vector<8x32xf32>, vector<32x128xf32>, vector<8x128xf32> -> vector<8x128xf32>
      %129 = arith.addf %127, %128 : vector<8x128xf32>
      %130 = vector.extract_strided_slice %129 {offsets = [0, 0], sizes = [8, 96], strides = [1, 1]} : vector<8x128xf32> to vector<8x96xf32>
      %131 = arith.negf %130 : vector<8x96xf32>
      %132 = math.exp %131 : vector<8x96xf32>
      %cst_35 = arith.constant 1.000000e+00 : f32
      %133 = vector.broadcast %cst_35 : f32 to vector<8x96xf32>
      %134 = arith.addf %133, %132 : vector<8x96xf32>
      %135 = arith.divf %133, %134 : vector<8x96xf32>
      %136 = vector.extract_strided_slice %129 {offsets = [0, 96], sizes = [8, 32], strides = [1, 1]} : vector<8x128xf32> to vector<8x32xf32>
      %137 = math.tanh %136 : vector<8x32xf32>
      %138 = vector.extract_strided_slice %135 {offsets = [0, 32], sizes = [8, 32], strides = [1, 1]} : vector<8x96xf32> to vector<8x32xf32>
      %139 = arith.mulf %138, %120 : vector<8x32xf32>
      %140 = vector.extract_strided_slice %135 {offsets = [0, 0], sizes = [8, 32], strides = [1, 1]} : vector<8x96xf32> to vector<8x32xf32>
      %141 = arith.mulf %140, %137 : vector<8x32xf32>
      %142 = arith.addf %139, %141 : vector<8x32xf32>
      %143 = vector.extract_strided_slice %135 {offsets = [0, 64], sizes = [8, 32], strides = [1, 1]} : vector<8x96xf32> to vector<8x32xf32>
      %144 = math.tanh %142 : vector<8x32xf32>
      %145 = arith.mulf %143, %144 : vector<8x32xf32>
      %c6_i32 = arith.constant 6 : i32
      %c8_i32_36 = arith.constant 8 : i32
      %146 = arith.muli %c6_i32, %c8_i32_36 : i32
      %147 = tpu.assume_multiple %146, 8 : i32
      %148 = arith.index_cast %147 : i32 to index
      %c0_37 = arith.constant 0 : index
      %149 = vector.load %alloca[%148, %c0_37] : memref<64x128xf32, #tpu.memory_space<vmem>>, vector<8x128xf32>
      %cst_38 = arith.constant dense<0.000000e+00> : vector<8x128xf32>
      %150 = tpu.matmul %145, %13, %cst_38 {dimension_numbers = #tpu.dot_dimension_numbers<[1], [0], [0], [1], [0, 0, 1, 1], [], []>} : vector<8x32xf32>, vector<32x128xf32>, vector<8x128xf32> -> vector<8x128xf32>
      %151 = arith.addf %149, %150 : vector<8x128xf32>
      %152 = vector.extract_strided_slice %151 {offsets = [0, 0], sizes = [8, 96], strides = [1, 1]} : vector<8x128xf32> to vector<8x96xf32>
      %153 = arith.negf %152 : vector<8x96xf32>
      %154 = math.exp %153 : vector<8x96xf32>
      %cst_39 = arith.constant 1.000000e+00 : f32
      %155 = vector.broadcast %cst_39 : f32 to vector<8x96xf32>
      %156 = arith.addf %155, %154 : vector<8x96xf32>
      %157 = arith.divf %155, %156 : vector<8x96xf32>
      %158 = vector.extract_strided_slice %151 {offsets = [0, 96], sizes = [8, 32], strides = [1, 1]} : vector<8x128xf32> to vector<8x32xf32>
      %159 = math.tanh %158 : vector<8x32xf32>
      %160 = vector.extract_strided_slice %157 {offsets = [0, 32], sizes = [8, 32], strides = [1, 1]} : vector<8x96xf32> to vector<8x32xf32>
      %161 = arith.mulf %160, %142 : vector<8x32xf32>
      %162 = vector.extract_strided_slice %157 {offsets = [0, 0], sizes = [8, 32], strides = [1, 1]} : vector<8x96xf32> to vector<8x32xf32>
      %163 = arith.mulf %162, %159 : vector<8x32xf32>
      %164 = arith.addf %161, %163 : vector<8x32xf32>
      %165 = vector.extract_strided_slice %157 {offsets = [0, 64], sizes = [8, 32], strides = [1, 1]} : vector<8x96xf32> to vector<8x32xf32>
      %166 = math.tanh %164 : vector<8x32xf32>
      %167 = arith.mulf %165, %166 : vector<8x32xf32>
      %c7_i32 = arith.constant 7 : i32
      %c8_i32_40 = arith.constant 8 : i32
      %168 = arith.muli %c7_i32, %c8_i32_40 : i32
      %169 = tpu.assume_multiple %168, 8 : i32
      %170 = arith.index_cast %169 : i32 to index
      %c0_41 = arith.constant 0 : index
      %171 = vector.load %alloca[%170, %c0_41] : memref<64x128xf32, #tpu.memory_space<vmem>>, vector<8x128xf32>
      %cst_42 = arith.constant dense<0.000000e+00> : vector<8x128xf32>
      %172 = tpu.matmul %167, %13, %cst_42 {dimension_numbers = #tpu.dot_dimension_numbers<[1], [0], [0], [1], [0, 0, 1, 1], [], []>} : vector<8x32xf32>, vector<32x128xf32>, vector<8x128xf32> -> vector<8x128xf32>
      %173 = arith.addf %171, %172 : vector<8x128xf32>
      %174 = vector.extract_strided_slice %173 {offsets = [0, 0], sizes = [8, 96], strides = [1, 1]} : vector<8x128xf32> to vector<8x96xf32>
      %175 = arith.negf %174 : vector<8x96xf32>
      %176 = math.exp %175 : vector<8x96xf32>
      %cst_43 = arith.constant 1.000000e+00 : f32
      %177 = vector.broadcast %cst_43 : f32 to vector<8x96xf32>
      %178 = arith.addf %177, %176 : vector<8x96xf32>
      %179 = arith.divf %177, %178 : vector<8x96xf32>
      %180 = vector.extract_strided_slice %173 {offsets = [0, 96], sizes = [8, 32], strides = [1, 1]} : vector<8x128xf32> to vector<8x32xf32>
      %181 = math.tanh %180 : vector<8x32xf32>
      %182 = vector.extract_strided_slice %179 {offsets = [0, 32], sizes = [8, 32], strides = [1, 1]} : vector<8x96xf32> to vector<8x32xf32>
      %183 = arith.mulf %182, %164 : vector<8x32xf32>
      %184 = vector.extract_strided_slice %179 {offsets = [0, 0], sizes = [8, 32], strides = [1, 1]} : vector<8x96xf32> to vector<8x32xf32>
      %185 = arith.mulf %184, %181 : vector<8x32xf32>
      %186 = arith.addf %183, %185 : vector<8x32xf32>
      %187 = vector.extract_strided_slice %179 {offsets = [0, 64], sizes = [8, 32], strides = [1, 1]} : vector<8x96xf32> to vector<8x32xf32>
      %188 = math.tanh %186 : vector<8x32xf32>
      %189 = arith.mulf %187, %188 : vector<8x32xf32>
      %c8_i32_44 = arith.constant 8 : i32
      %c0_45 = arith.constant 0 : index
      %c0_46 = arith.constant 0 : index
      %190 = vector.load %arg7[%c0_45, %c0_46] : memref<64x128xf32, #tpu.memory_space<vmem>>, vector<64x128xf32>
      %c56 = arith.constant 56 : index
      %c0_47 = arith.constant 0 : index
      %191 = vector.load %arg14[%c56, %c0_47] : memref<64x32xf32, #tpu.memory_space<vmem>>, vector<8x32xf32>
      %c56_48 = arith.constant 56 : index
      %c0_49 = arith.constant 0 : index
      %192 = vector.load %arg15[%c56_48, %c0_49] : memref<64x32xf32, #tpu.memory_space<vmem>>, vector<8x32xf32>
      %193 = vector.extract_strided_slice %190 {offsets = [0, 0], sizes = [32, 128], strides = [1, 1]} : vector<64x128xf32> to vector<32x128xf32>
      %cst_50 = arith.constant dense<0.000000e+00> : vector<8x128xf32>
      %194 = tpu.matmul %191, %193, %cst_50 {dimension_numbers = #tpu.dot_dimension_numbers<[1], [0], [0], [1], [0, 0, 1, 1], [], []>} : vector<8x32xf32>, vector<32x128xf32>, vector<8x128xf32> -> vector<8x128xf32>
      %195 = vector.extract_strided_slice %190 {offsets = [32, 0], sizes = [32, 128], strides = [1, 1]} : vector<64x128xf32> to vector<32x128xf32>
      %cst_51 = arith.constant dense<0.000000e+00> : vector<8x128xf32>
      %196 = tpu.matmul %192, %195, %cst_51 {dimension_numbers = #tpu.dot_dimension_numbers<[1], [0], [0], [1], [0, 0, 1, 1], [], []>} : vector<8x32xf32>, vector<32x128xf32>, vector<8x128xf32> -> vector<8x128xf32>
      %197 = arith.addf %194, %196 : vector<8x128xf32>
      %c0_52 = arith.constant 0 : index
      %c0_53 = arith.constant 0 : index
      %198 = vector.load %arg8[%c0_52, %c0_53] : memref<1x128xf32, #tpu.memory_space<vmem>>, vector<1x128xf32>
      %199 = vector.broadcast %198 : vector<1x128xf32> to vector<8x128xf32>
      %200 = arith.addf %197, %199 : vector<8x128xf32>
      %201 = vector.extract_strided_slice %200 {offsets = [0, 0], sizes = [8, 96], strides = [1, 1]} : vector<8x128xf32> to vector<8x96xf32>
      %202 = arith.negf %201 : vector<8x96xf32>
      %203 = math.exp %202 : vector<8x96xf32>
      %cst_54 = arith.constant 1.000000e+00 : f32
      %204 = vector.broadcast %cst_54 : f32 to vector<8x96xf32>
      %205 = arith.addf %204, %203 : vector<8x96xf32>
      %206 = arith.divf %204, %205 : vector<8x96xf32>
      %207 = vector.extract_strided_slice %200 {offsets = [0, 96], sizes = [8, 32], strides = [1, 1]} : vector<8x128xf32> to vector<8x32xf32>
      %208 = math.tanh %207 : vector<8x32xf32>
      %209 = vector.extract_strided_slice %206 {offsets = [0, 32], sizes = [8, 32], strides = [1, 1]} : vector<8x96xf32> to vector<8x32xf32>
      %210 = arith.mulf %209, %0 : vector<8x32xf32>
      %211 = vector.extract_strided_slice %206 {offsets = [0, 0], sizes = [8, 32], strides = [1, 1]} : vector<8x96xf32> to vector<8x32xf32>
      %212 = arith.mulf %211, %208 : vector<8x32xf32>
      %213 = arith.addf %210, %212 : vector<8x32xf32>
      %214 = vector.extract_strided_slice %206 {offsets = [0, 64], sizes = [8, 32], strides = [1, 1]} : vector<8x96xf32> to vector<8x32xf32>
      %215 = math.tanh %213 : vector<8x32xf32>
      %216 = arith.mulf %214, %215 : vector<8x32xf32>
      %c0_55 = arith.constant 0 : index
      %c0_56 = arith.constant 0 : index
      %217 = vector.load %arg9[%c0_55, %c0_56] : memref<64x32xf32, #tpu.memory_space<vmem>>, vector<64x32xf32>
      %218 = vector.extract_strided_slice %217 {offsets = [0, 0], sizes = [32, 32], strides = [1, 1]} : vector<64x32xf32> to vector<32x32xf32>
      %cst_57 = arith.constant dense<0.000000e+00> : vector<8x32xf32>
      %219 = tpu.matmul %189, %218, %cst_57 {dimension_numbers = #tpu.dot_dimension_numbers<[1], [0], [0], [1], [0, 0, 1, 1], [], []>} : vector<8x32xf32>, vector<32x32xf32>, vector<8x32xf32> -> vector<8x32xf32>
      %220 = vector.extract_strided_slice %217 {offsets = [32, 0], sizes = [32, 32], strides = [1, 1]} : vector<64x32xf32> to vector<32x32xf32>
      %cst_58 = arith.constant dense<0.000000e+00> : vector<8x32xf32>
      %221 = tpu.matmul %216, %220, %cst_58 {dimension_numbers = #tpu.dot_dimension_numbers<[1], [0], [0], [1], [0, 0, 1, 1], [], []>} : vector<8x32xf32>, vector<32x32xf32>, vector<8x32xf32> -> vector<8x32xf32>
      %222 = arith.addf %219, %221 : vector<8x32xf32>
      %c0_59 = arith.constant 0 : index
      %c0_60 = arith.constant 0 : index
      %223 = vector.load %arg10[%c0_59, %c0_60] : memref<1x32xf32, #tpu.memory_space<vmem>>, vector<1x32xf32>
      %224 = vector.broadcast %223 : vector<1x32xf32> to vector<8x32xf32>
      %225 = arith.addf %222, %224 : vector<8x32xf32>
      %cst_61 = arith.constant 0.000000e+00 : f32
      %226 = vector.broadcast %cst_61 : f32 to vector<8x32xf32>
      %227 = arith.maximumf %225, %226 : vector<8x32xf32>
      %c0_62 = arith.constant 0 : index
      %c0_63 = arith.constant 0 : index
      %228 = vector.load %arg11[%c0_62, %c0_63] : memref<32x4xf32, #tpu.memory_space<vmem>>, vector<32x4xf32>
      %cst_64 = arith.constant dense<0.000000e+00> : vector<8x4xf32>
      %229 = tpu.matmul %227, %228, %cst_64 {dimension_numbers = #tpu.dot_dimension_numbers<[1], [0], [0], [1], [0, 0, 1, 1], [], []>} : vector<8x32xf32>, vector<32x4xf32>, vector<8x4xf32> -> vector<8x4xf32>
      %c0_65 = arith.constant 0 : index
      %c0_66 = arith.constant 0 : index
      %230 = vector.load %arg12[%c0_65, %c0_66] : memref<1x4xf32, #tpu.memory_space<vmem>>, vector<1x4xf32>
      %231 = vector.broadcast %230 : vector<1x4xf32> to vector<8x4xf32>
      %232 = arith.addf %229, %231 : vector<8x4xf32>
      %c0_67 = arith.constant 0 : index
      %c0_68 = arith.constant 0 : index
      %233 = vector.load %arg13[%c0_67, %c0_68] : memref<8x4xf32, #tpu.memory_space<vmem>>, vector<8x4xf32>
      tpu.vector_store %arg13[%c0_67, %c0_68], %232 {strides = array<i32>} : memref<8x4xf32, #tpu.memory_space<vmem>>, vector<8x4xf32>,
      tpu.yield
    }) : () -> ()
    return
  }
}

</mosaic_0001>

<bundles_post_ra>
// kernel: tpu_custom_call.1
= control target key start
LH: loop header
LB: loop body
LE: loop exit
PB: predicated region body
PF: predicated region fallthrough
CT: control target
= control target key end

     0   :  { %18 = vsyncpa [#allocation5], 0  ;;  %s3381_s0 = inlined_call_operand.vmem [shape: f32[64,16], index: 0, kind: input, shape index: {}]   ;;  %s3382_s1 = inlined_call_operand.vmem [shape: f32[16,256], index: 1, kind: input, shape index: {}]   ;;  %s3383_s2 = inlined_call_operand.vmem [shape: f32[1,256], index: 2, kind: input, shape index: {}]   ;;  %s3384_s3 = inlined_call_operand.vmem [shape: f32[64,256], index: 3, kind: input, shape index: {}]   ;;  %s3385_s4 = inlined_call_operand.hbm [shape: f32[64,128], index: 4, kind: input, shape index: {}]   ;;  %s3386_s5 = inlined_call_operand.vmem [shape: f32[1,128], index: 5, kind: input, shape index: {}]   ;;  %s3387_s6 = inlined_call_operand.hbm [shape: f32[32,128], index: 6, kind: input, shape index: {}]   ;;  %s3388_s7 = inlined_call_operand.hbm [shape: f32[64,128], index: 7, kind: input, shape index: {}]   ;;  %s3389_s8 = inlined_call_operand.vmem [shape: f32[1,128], index: 8, kind: input, shape index: {}]   ;;  %s3390_s9 = inlined_call_operand.vmem [shape: f32[64,32], index: 9, kind: input, shape index: {}]   ;;  %s3391_s10 = inlined_call_operand.vmem [shape: f32[1,32], index: 10, kind: input, shape index: {}]   ;;  %s3392_s11 = inlined_call_operand.vmem [shape: f32[32,4], index: 11, kind: input, shape index: {}]   ;;  %s3393_s12 = inlined_call_operand.vmem [shape: f32[1,4], index: 12, kind: input, shape index: {}]   ;;  %s3394_s13 = inlined_call_operand.vmem [shape: f32[8,4], index: 13, kind: output, shape index: {}]  }
   0x1   :  { %19 = vsyncpa [#allocation7], 0  ;;  %s47_s27 = sshll.u32 %s3387_s6, 4  ;;  %s2626_s28 = smov [#allocation6]   ;;  %s48_s27 = int_to_ptr.hbm [resolvable:$true] %s47_s27 }
   0x2   :  { %s49_s29 = sshll.u32 %s2626_s28, 4  ;;  %s32_s15 = sshll.u32 %s3385_s4, 4  ;;  %s50_s29 = int_to_ptr.vmem [resolvable:$true] %s49_s29  ;;  %s33_s15 = int_to_ptr.hbm [resolvable:$true] %s32_s15 }
   0x3   :  { %s2627_s16 = smov 128   ;;  %s2628_s17 = smov 8  }
   0x4   :  { %55 = dma.hbm_to_vmem [thread:$0]  %s48_s27, 512, %s50_s29, [#allocation7], %s2627_s16, %s2627_s16, %s2628_s17  }
   0x5   :  { %s2629_s18 = smov [#allocation4]   ;;  %s60_s22 = sshll.u32 %s3388_s7, 4  ;;  %s61_s22 = int_to_ptr.hbm [resolvable:$true] %s60_s22 }
   0x6   :  { %s34_s19 = sshll.u32 %s2629_s18, 4  ;;  %s2630_s6 = smov [#allocation8]   ;;  %s35_s19 = int_to_ptr.vmem [resolvable:$true] %s34_s19 }
   0x7   :  { %40 = dma.hbm_to_vmem [thread:$0]  %s33_s15, 1024, %s35_s19, [#allocation5], %s2627_s16, %s2627_s16, %s2628_s17  }
   0x8   :  { %s62_s23 = sshll.u32 %s2630_s6, 4  ;;  %s63_s23 = int_to_ptr.vmem [resolvable:$true] %s62_s23 }
   0x9   :  { %68 = dma.hbm_to_vmem [thread:$0]  %s61_s22, 1024, %s63_s23, [#allocation7], %s2627_s16, %s2627_s16, %s2628_s17  }
   0xa   :  { %2622 = dma.done.wait [#allocation5], 1024  }
   0xb   :  { %2623 = vsyncadd [#allocation5], 4294966272 }
   0xc   :  { %2624 = dma.done.wait [#allocation7], 1536  }
   0xd   :  { %2625 = vsyncadd [#allocation7], 4294965760  ;;  %v102_v0 = vld [vmem:[%s3382_s1 + $0x18] sm:$0xff]  ;;  %v2723_v1 = vld [vmem:[%s3384_s3 + $0x70] sm:$0xff]  ;;  %vm109_vm0 = vcmask 130048   ;;  %v2631_v19 = vmov 0.0  }
   0xe   :  { %v100_v2 = vld [vmem:[%s3382_s1 + $0x8] sm:$0xff]  ;;  %189 = vmatpush.msra.mxu1 %v102_v0  ;;  %260 = vmatpush.msra.mxu2 %v2723_v1  ;;  %v2732_v3 = vld [vmem:[%s3384_s3 + $0x60] sm:$0xff]  ;;  %v2740_v5 = vld [vmem:[%s3384_s3 + $0x50] sm:$0xff]  ;;  %s2634_s20 = smov 96   ;;  %vm375_vm9 = vcmask 261120   ;;  %vm248_vm10 = vcmask 523264  }
   0xf   :  { %v91_v4 = vld [vmem:[%s3381_s0] sm:$0xff]  ;;  %v101_v7 = vld [vmem:[%s3382_s1 + $0x10] sm:$0xff]  ;;  %v2759_v9 = vld [vmem:[%s3384_s3 + $0x78] sm:$0xff]  ;;  %s2636_s6 = smov 32  }
  0x10   :  { %190 = vmatpush.msra.mxu1 %v100_v2  ;;  %261 = vmatpush.msra.mxu2 %v2732_v3  ;;  %v2747_v6 = vld [vmem:[%s3384_s3 + $0x40] sm:$0xff]  ;;  %v2764_v10 = vld [vmem:[%s3384_s3 + $0x30] sm:$0xff]  ;;  %v2770_v11 = vld [vmem:[%s3384_s3 + $0x68] sm:$0xff] }
  0x11   :  { %2259 = vmatmul.msk.f32.vlgmr.msra.gmra.mxu1 %vm109_vm0, %v91_v4  ;;  %v99_v8 = vld [vmem:[%s3382_s1] sm:$0xff]  ;;  %148 = vmatpush.msra.mxu0 %v101_v7  ;;  %v92_v13 = vld [vmem:[%s3381_s0 + $0x8] sm:$0xff]  ;;  %v2789_v14 = vld [vmem:[%s3384_s3 + $0x10] sm:$0xff] }
  0x12   :  { %262 = vmatpush.msra.mxu2 %v2740_v5  ;;  %280 = vmatpush.msra.mxu3 %v2759_v9  ;;  %v2777_v12 = vld [vmem:[%s3384_s3 + $0x20] sm:$0xff]  ;;  %v2802_v16 = vld [vmem:[%s3384_s3 + $0x58] sm:$0xff]  ;;  %v2807_v17 = vld [vmem:[%s3384_s3 + $0x48] sm:$0xff] }
  0x13   :  { %835 = vmatpush.msrb.mxu1 %v2759_v9  ;;  %149 = vmatpush.msra.mxu0 %v99_v8  ;;  %v2797_v15 = vld [vmem:[%s3384_s3] sm:$0xff]  ;;  %v2815_v18 = vld [vmem:[%s3384_s3 + $0x38] sm:$0xff]  ;;  %v2824_v20 = vld [vmem:[%s3384_s3 + $0x28] sm:$0xff] }
  0x14   :  { %263 = vmatpush.msra.mxu2 %v2747_v6  ;;  %2251 = vmatmul.msk.f32.vlgmr.msra.gmra.mxu0 %vm109_vm0, %v91_v4  ;;  %v93_v21 = vld [vmem:[%s3381_s0 + $0x10] sm:$0xff]  ;;  %v2840_v22 = vld [vmem:[%s3384_s3 + $0x18] sm:$0xff]  ;;  %v2845_v23 = vld [vmem:[%s3384_s3 + $0x8] sm:$0xff] }
  0x15   :  { %281 = vmatpush.msra.mxu3 %v2770_v11  ;;  %836 = vmatpush.msrb.mxu1 %v2770_v11  ;;  %v94_v24 = vld [vmem:[%s3381_s0 + $0x18] sm:$0xff]  ;;  %v95_v25 = vld [vmem:[%s3381_s0 + $0x20] sm:$0xff]  ;;  %v96_v26 = vld [vmem:[%s3381_s0 + $0x28] sm:$0xff] }
  0x16   :  { %264 = vmatpush.msra.mxu2 %v2764_v10  ;;  %815 = vmatpush.msrb.mxu0 %v2723_v1  ;;  %v97_v27 = vld [vmem:[%s3381_s0 + $0x30] sm:$0xff]  ;;  %v98_v28 = vld [vmem:[%s3381_s0 + $0x38] sm:$0xff]  ;;  %v103_v29 = vld [vmem:[%s3383_s2] sm:$0x3]  ;;  %s2632_s0 = smov 32   ;;  %s2633_s2 = smov 64  }
  0x17   :  { %282 = vmatpush.msra.mxu3 %v2802_v16  ;;  %837 = vmatpush.msrb.mxu1 %v2802_v16  ;;  %v106_v30 = vperm.slane %v103_v29, 1  ;;  %v2936_v35 = vperm.slane %v103_v29, 0 }
  0x18   :  { %265 = vmatpush.msra.mxu2 %v2777_v12  ;;  %816 = vmatpush.msrb.mxu0 %v2732_v3 }
  0x19   :  { %2260 = vmatmul.msk.f32.gmra.mxu1 %vm109_vm0, %v92_v13  ;;  %283 = vmatpush.msra.mxu3 %v2807_v17 }
  0x1a   :  { %266 = vmatpush.msra.mxu2 %v2789_v14  ;;  %817 = vmatpush.msrb.mxu0 %v2740_v5 }
  0x1b   :  { %284 = vmatpush.msra.mxu3 %v2815_v18  ;;  %838 = vmatpush.msrb.mxu1 %v2807_v17 }
  0x1c   :  { %267 = vmatpush.msra.mxu2 %v2797_v15  ;;  %2252 = vmatmul.msk.f32.gmra.mxu0 %vm109_vm0, %v92_v13 }
  0x1d   :  { %268 = vmatmul.f32.vlgmr.msra.gmra.mxu2 %v2631_v19  ;;  %818 = vmatpush.msrb.mxu0 %v2747_v6 }
  0x1e   :  { %398 = vmatpush.msrb.mxu2 %v2723_v1  ;;  %285 = vmatpush.msra.mxu3 %v2824_v20 }
  0x1f   :  { %819 = vmatpush.msrb.mxu0 %v2764_v10  ;;  %839 = vmatpush.msrb.mxu1 %v2815_v18 }
  0x20   :  { %399 = vmatpush.msrb.mxu2 %v2732_v3  ;;  %286 = vmatpush.msra.mxu3 %v2840_v22 }
  0x21   :  { %2261 = vmatmul.msk.f32.gmra.mxu1 %vm109_vm0, %v93_v21  ;;  %820 = vmatpush.msrb.mxu0 %v2777_v12 }
  0x22   :  { %400 = vmatpush.msrb.mxu2 %v2740_v5  ;;  %287 = vmatpush.msra.mxu3 %v2845_v23 }
  0x23   :  { %288 = vmatmul.f32.vlgmr.msra.gmra.mxu3 %v2631_v19  ;;  %840 = vmatpush.msrb.mxu1 %v2824_v20 }
  0x24   :  { %401 = vmatpush.msrb.mxu2 %v2747_v6  ;;  %2253 = vmatmul.msk.f32.gmra.mxu0 %vm109_vm0, %v93_v21 }
  0x25   :  { %418 = vmatpush.msrb.mxu3 %v2759_v9  ;;  %821 = vmatpush.msrb.mxu0 %v2789_v14 }
  0x26   :  { %402 = vmatpush.msrb.mxu2 %v2764_v10  ;;  %841 = vmatpush.msrb.mxu1 %v2840_v22 }
  0x27   :  { %419 = vmatpush.msrb.mxu3 %v2770_v11  ;;  %822 = vmatpush.msrb.mxu0 %v2797_v15 }
  0x28   :  { %403 = vmatpush.msrb.mxu2 %v2777_v12  ;;  %842 = vmatpush.msrb.mxu1 %v2845_v23 }
  0x29   :  { %2262 = vmatmul.msk.f32.gmra.mxu1 %vm109_vm0, %v94_v24  ;;  %420 = vmatpush.msrb.mxu3 %v2802_v16 }
  0x2a   :  { %404 = vmatpush.msrb.mxu2 %v2789_v14  ;;  %1093 = vmatpush.msra.mxu0 %v2723_v1 }
  0x2b   :  { %421 = vmatpush.msrb.mxu3 %v2807_v17  ;;  %1113 = vmatpush.msra.mxu1 %v2759_v9 }
  0x2c   :  { %405 = vmatpush.msrb.mxu2 %v2797_v15  ;;  %2254 = vmatmul.msk.f32.gmra.mxu0 %vm109_vm0, %v94_v24 }
  0x2d   :  { %422 = vmatpush.msrb.mxu3 %v2815_v18  ;;  %1094 = vmatpush.msra.mxu0 %v2732_v3 }
  0x2e   :  { %537 = vmatpush.msra.mxu2 %v2723_v1  ;;  %1114 = vmatpush.msra.mxu1 %v2770_v11 }
  0x2f   :  { %423 = vmatpush.msrb.mxu3 %v2824_v20  ;;  %1095 = vmatpush.msra.mxu0 %v2740_v5 }
  0x30   :  { %538 = vmatpush.msra.mxu2 %v2732_v3  ;;  %1115 = vmatpush.msra.mxu1 %v2802_v16 }
  0x31   :  { %2263 = vmatmul.msk.f32.gmra.mxu1 %vm109_vm0, %v95_v25  ;;  %424 = vmatpush.msrb.mxu3 %v2840_v22 }
  0x32   :  { %539 = vmatpush.msra.mxu2 %v2740_v5  ;;  %1116 = vmatpush.msra.mxu1 %v2807_v17 }
  0x33   :  { %425 = vmatpush.msrb.mxu3 %v2845_v23  ;;  %1096 = vmatpush.msra.mxu0 %v2747_v6 }
  0x34   :  { %540 = vmatpush.msra.mxu2 %v2747_v6  ;;  %2255 = vmatmul.msk.f32.gmra.mxu0 %vm109_vm0, %v95_v25 }
  0x35   :  { %557 = vmatpush.msra.mxu3 %v2759_v9  ;;  %1117 = vmatpush.msra.mxu1 %v2815_v18 }
  0x36   :  { %541 = vmatpush.msra.mxu2 %v2764_v10  ;;  %1097 = vmatpush.msra.mxu0 %v2764_v10 }
  0x37   :  { %558 = vmatpush.msra.mxu3 %v2770_v11  ;;  %1118 = vmatpush.msra.mxu1 %v2824_v20 }
  0x38   :  { %542 = vmatpush.msra.mxu2 %v2777_v12  ;;  %1098 = vmatpush.msra.mxu0 %v2777_v12 }
  0x39   :  { %2264 = vmatmul.msk.f32.gmra.mxu1 %vm109_vm0, %v96_v26  ;;  %559 = vmatpush.msra.mxu3 %v2802_v16 }
  0x3a   :  { %543 = vmatpush.msra.mxu2 %v2789_v14  ;;  %1119 = vmatpush.msra.mxu1 %v2840_v22 }
  0x3b   :  { %560 = vmatpush.msra.mxu3 %v2807_v17  ;;  %1099 = vmatpush.msra.mxu0 %v2789_v14 }
  0x3c   :  { %544 = vmatpush.msra.mxu2 %v2797_v15  ;;  %2256 = vmatmul.msk.f32.gmra.mxu0 %vm109_vm0, %v96_v26 }
  0x3d   :  { %561 = vmatpush.msra.mxu3 %v2815_v18  ;;  %1120 = vmatpush.msra.mxu1 %v2845_v23 }
  0x3e   :  { %1100 = vmatpush.msra.mxu0 %v2797_v15 }
  0x3f   :  { %562 = vmatpush.msra.mxu3 %v2824_v20 }
  0x41   :  { %2265 = vmatmul.msk.f32.gmra.mxu1 %vm109_vm0, %v97_v27  ;;  %563 = vmatpush.msra.mxu3 %v2840_v22 }
  0x43   :  { %564 = vmatpush.msra.mxu3 %v2845_v23 }
  0x44   :  { %2257 = vmatmul.msk.f32.gmra.mxu0 %vm109_vm0, %v97_v27 }
  0x49   :  { %2266 = vmatmul.msk.f32.gmra.mxu1 %vm109_vm0, %v98_v28 }
  0x4c   :  { %2258 = vmatmul.msk.f32.gmra.mxu0 %vm109_vm0, %v98_v28 }
  0x8e   :  { %v192_v31 = vpop.f32.mrf.mxu1 }
  0x8f   :  { %v2932_v32 = vadd.f32 %v192_v31, %v106_v30 }
  0x91   :  { %v151_v36 = vpop.f32.mrf.mxu0 }
  0x92   :  { %v152_v37 = vadd.f32 %v151_v36, %v2936_v35 }
  0x96   :  { %v195_v33 = vpop.f32.mrf.mxu1 }
  0x97   :  { %v2934_v34 = vadd.f32 %v195_v33, %v106_v30 }
  0x9e   :  { %v198_v38 = vpop.f32.mrf.mxu1 }
  0x9f   :  { %v2939_v39 = vadd.f32 %v198_v38, %v106_v30 }
  0xa0   :  { %v269_v40 = vpop.f32.mrf.mxu2 }
  0xa1   :  { %v293_v41 = vadd.f32 %v269_v40, %v152_v37 }
  0xa3   :  { %2346 = vtanh.f32 %v293_v41  ;;  %v2267_v56 = vmul.f32 -1.442695, %v293_v41 }
  0xa6   :  { %v201_v42 = vpop.f32.mrf.mxu1  ;;  %v289_v52 = vpop.f32.mrf.mxu3 }
  0xa7   :  { %v2941_v43 = vadd.f32 %v201_v42, %v106_v30 }
  0xa9   :  { %v2347_v44 = vpop.eup %2346 }
  0xaa   :  { %339 = vrot.lane.b32.xlu0 %v2347_v44, %s2632_s0 }
  0xae   :  { %v204_v45 = vpop.f32.mrf.mxu1 }
  0xaf   :  { %v2944_v46 = vadd.f32 %v204_v45, %v106_v30 }
  0xb6   :  { %v207_v47 = vpop.f32.mrf.mxu1 }
  0xb7   :  { %v2946_v48 = vadd.f32 %v207_v47, %v106_v30 }
  0xbe   :  { %v210_v49 = vpop.f32.mrf.mxu1 }
  0xbf   :  { %v2948_v50 = vadd.f32 %v210_v49, %v106_v30 }
  0xc6   :  { %v213_v51 = vpop.f32.mrf.mxu1 }
  0xc7   :  { %v214_v53 = vadd.f32 %v213_v51, %v106_v30 }
  0xc9   :  { %v296_v54 = vadd.f32 %v289_v52, %v214_v53 }
  0xcb   :  { %2348 = vtanh.f32 %v296_v54  ;;  %v2268_v4 = vmul.f32 -1.442695, %v296_v54 }
  0xcc   :  { %2350 = vpow2.f32 %v2267_v56 }
  0xd1   :  { %v2349_v55 = vpop.eup %2348 }
  0xd2   :  { %350 = vrot.lane.b32.xlu0 %v2349_v55, %s2632_s0  ;;  %v2351_v57 = vpop.eup %2350 }
  0xd3   :  { %v300_v58 = vadd.f32 1.0, %v2351_v57 }
  0xd5   :  { %2352 = vrcp.f32 %v300_v58  ;;  %vm306_vm1 = vweird.f32 %v300_v58  ;;  %v312_v63 = vand.u32 2147483648, %v300_v58  ;;  %v310_v2 = vand.u32 2147483647, %v300_v58 }
  0xd6   :  { %2354 = vpow2.f32 %v2268_v4 }
  0xd7   :  { %v313_v7 = vor.u32 1.1754944e-38, %v312_v63  ;;  %vm311_vm4 = vcmp.eq.f32.partialorder %v310_v2, 8.507059e+37 }
  0xdb   :  { %v2353_v59 = vpop.eup %2352 }
  0xdc   :  { %v302_v60 = vmul.f32 %v2353_v59, %v300_v58  ;;  %vm307_vm2 = vweird.f32 %v2353_v59  ;;  %v2355_v24 = vpop.eup %2354 }
  0xdd   :  { %vm308_vm3 = vmor %vm306_vm1, %vm307_vm2  ;;  %v320_v25 = vadd.f32 1.0, %v2355_v24 }
  0xde   :  { %v303_v61 = vsub.f32 1.0, %v302_v60 }
  0xdf   :  { %2356 = vrcp.f32 %v320_v25  ;;  %v332_v31 = vand.u32 2147483648, %v320_v25  ;;  %vm326_vm6 = vweird.f32 %v320_v25  ;;  %v330_v33 = vand.u32 2147483647, %v320_v25 }
  0xe0   :  { %v304_v62 = vmul.f32 %v2353_v59, %v303_v61  ;;  %v154_v61 = vpop.f32.mrf.mxu0 }
  0xe1   :  { %v333_v37 = vor.u32 1.1754944e-38, %v332_v31  ;;  %vm331_vm8 = vcmp.eq.f32.partialorder %v330_v33, 8.507059e+37 }
  0xe2   :  { %v305_v0 = vadd.f32 %v2353_v59, %v304_v62  ;;  %v155_v62 = vadd.f32 %v154_v61, %v2936_v35 }
  0xe4   :  { %v309_v8 = vsel %vm308_vm3, %v2353_v59, %v305_v0 }
  0xe5   :  { %v314_v19 = vsel %vm311_vm4, %v313_v7, %v309_v8  ;;  %v2357_v26 = vpop.eup %2356 }
  0xe6   :  { %v322_v27 = vmul.f32 %v2357_v26, %v320_v25  ;;  %vm327_vm5 = vweird.f32 %v2357_v26  ;;  %v337_v42 = vmul.f32 0.0, %v314_v19 }
  0xe7   :  { %vm328_vm7 = vmor %vm326_vm6, %vm327_vm5 }
  0xe8   :  { %v323_v28 = vsub.f32 1.0, %v322_v27 }
  0xea   :  { %v324_v29 = vmul.f32 %v2357_v26, %v323_v28 }
  0xec   :  { %v325_v30 = vadd.f32 %v2357_v26, %v324_v29 }
  0xee   :  { %v329_v36 = vsel %vm328_vm7, %v2357_v26, %v325_v30 }
  0xef   :  { %v334_v38 = vsel %vm331_vm8, %v333_v37, %v329_v36 }
  0xf0   :  { %v348_v49 = vmul.f32 0.0, %v334_v38 }
 0x11c   :  { %v340_v13 = vpop.permute.xlu0 %339 }
 0x11d   :  { %v342_v21 = vmul.f32 %v340_v13, %v314_v19 }
 0x11f   :  { %344 = vrot.lane.b32.xlu1 %v342_v21, %s2632_s0 }
 0x144   :  { %v351_v40 = vpop.permute.xlu0 %350 }
 0x145   :  { %v353_v41 = vmul.f32 %v351_v40, %v334_v38 }
 0x147   :  { %355 = vrot.lane.b32.xlu1 %v353_v41, %s2632_s0 }
 0x191   :  { %v345_v44 = vpop.permute.xlu1 %344 }
 0x192   :  { %v2953_v45 = vadd.f32 %v345_v44, %v337_v42 }
 0x194   :  { %2358 = vtanh.f32 %v2953_v45 }
 0x19a   :  { %v2359_v47 = vpop.eup %2358 }
 0x19b   :  { %361 = vrot.lane.b32.xlu2 %v2359_v47, %s2632_s0 }
 0x1b9   :  { %v356_v51 = vpop.permute.xlu1 %355 }
 0x1ba   :  { %v2957_v52 = vadd.f32 %v356_v51, %v348_v49 }
 0x1bc   :  { %2360 = vtanh.f32 %v2957_v52 }
 0x1c2   :  { %v2361_v53 = vpop.eup %2360 }
 0x1c3   :  { %367 = vrot.lane.b32.xlu2 %v2361_v53, %s2632_s0 }
 0x1f5   :  { %v362_v54 = vpop.permute.xlu2 %361 }
 0x1f6   :  { %v364_v55 = vmul.f32 %v362_v54, %v314_v19 }
 0x1f8   :  { %372 = vrot.lane.b32.xlu0 %v364_v55, %s2633_s2 }
 0x21d   :  { %v368_v56 = vpop.permute.xlu2 %367 }
 0x21e   :  { %v2962_v57 = vmul.f32 %v368_v56, %v334_v38 }
 0x220   :  { %383 = vrot.lane.b32.xlu1 %v2962_v57, %s2634_s20 }
 0x26a   :  { %v373_v58 = vpop.permute.xlu0 %372 }
 0x26b   :  { %376 = vst.msk [vmem:[#allocation2] sm:$0xff] %vm375_vm9, %v373_v58 }
 0x292   :  { %v384_v59 = vpop.permute.xlu1 %383 }
 0x293   :  { %v386_v60 = vsel %vm375_vm9, %v373_v58, %v384_v59 }
 0x294   :  { %2269 = vmatmul.msk.f32.vlgmr.msrb.gmra.mxu2 %vm248_vm10, %v386_v60  ;;  %2270 = vmatmul.msk.f32.vlgmr.msrb.gmra.mxu3 %vm248_vm10, %v386_v60 }
 0x295   :  { %676 = vmatpush.msrb.mxu2 %v2723_v1  ;;  %696 = vmatpush.msrb.mxu3 %v2759_v9 }
 0x297   :  { %677 = vmatpush.msrb.mxu2 %v2732_v3  ;;  %697 = vmatpush.msrb.mxu3 %v2770_v11 }
 0x299   :  { %678 = vmatpush.msrb.mxu2 %v2740_v5  ;;  %698 = vmatpush.msrb.mxu3 %v2802_v16 }
 0x29b   :  { %679 = vmatpush.msrb.mxu2 %v2747_v6  ;;  %699 = vmatpush.msrb.mxu3 %v2807_v17 }
 0x29d   :  { %680 = vmatpush.msrb.mxu2 %v2764_v10  ;;  %700 = vmatpush.msrb.mxu3 %v2815_v18 }
 0x29f   :  { %681 = vmatpush.msrb.mxu2 %v2777_v12  ;;  %701 = vmatpush.msrb.mxu3 %v2824_v20 }
 0x2a1   :  { %682 = vmatpush.msrb.mxu2 %v2789_v14  ;;  %702 = vmatpush.msrb.mxu3 %v2840_v22 }
 0x2a3   :  { %683 = vmatpush.msrb.mxu2 %v2797_v15  ;;  %703 = vmatpush.msrb.mxu3 %v2845_v23 }
 0x317   :  { %v407_v63 = vpop.f32.mrf.mxu2  ;;  %v427_v0 = vpop.f32.mrf.mxu3 }
 0x318   :  { %v432_v2 = vadd.f32 %v407_v63, %v155_v62  ;;  %v435_v4 = vadd.f32 %v427_v0, %v2948_v50 }
 0x31a   :  { %2362 = vtanh.f32 %v432_v2  ;;  %v2271_v13 = vmul.f32 -1.442695, %v432_v2  ;;  %v2272_v25 = vmul.f32 -1.442695, %v435_v4 }
 0x31b   :  { %2364 = vtanh.f32 %v435_v4 }
 0x31c   :  { %2366 = vpow2.f32 %v2271_v13 }
 0x320   :  { %v2363_v7 = vpop.eup %2362 }
 0x321   :  { %v2365_v8 = vpop.eup %2364  ;;  %478 = vrot.lane.b32.xlu2 %v2363_v7, %s2632_s0 }
 0x322   :  { %489 = vrot.lane.b32.xlu0 %v2365_v8, %s2632_s0  ;;  %v2367_v19 = vpop.eup %2366 }
 0x323   :  { %v439_v21 = vadd.f32 1.0, %v2367_v19 }
 0x325   :  { %2368 = vrcp.f32 %v439_v21  ;;  %v451_v31 = vand.u32 2147483648, %v439_v21  ;;  %vm445_vm12 = vweird.f32 %v439_v21  ;;  %v449_v33 = vand.u32 2147483647, %v439_v21 }
 0x326   :  { %2370 = vpow2.f32 %v2272_v25 }
 0x327   :  { %v452_v37 = vor.u32 1.1754944e-38, %v451_v31  ;;  %vm450_vm14 = vcmp.eq.f32.partialorder %v449_v33, 8.507059e+37 }
 0x32b   :  { %v2369_v24 = vpop.eup %2368 }
 0x32c   :  { %v441_v26 = vmul.f32 %v2369_v24, %v439_v21  ;;  %v2371_v50 = vpop.eup %2370  ;;  %vm446_vm11 = vweird.f32 %v2369_v24 }
 0x32d   :  { %v459_v29 = vadd.f32 1.0, %v2371_v50  ;;  %vm447_vm13 = vmor %vm445_vm12, %vm446_vm11 }
 0x32e   :  { %v442_v27 = vsub.f32 1.0, %v441_v26  ;;  %v157_v26 = vpop.f32.mrf.mxu0 }
 0x32f   :  { %2372 = vrcp.f32 %v459_v29  ;;  %v471_v53 = vand.u32 2147483648, %v459_v29  ;;  %vm465_vm0 = vweird.f32 %v459_v29  ;;  %v469_v54 = vand.u32 2147483647, %v459_v29 }
 0x330   :  { %v443_v28 = vmul.f32 %v2369_v24, %v442_v27  ;;  %v158_v27 = vadd.f32 %v157_v26, %v2936_v35 }
 0x331   :  { %v472_v56 = vor.u32 1.1754944e-38, %v471_v53  ;;  %vm470_vm2 = vcmp.eq.f32.partialorder %v469_v54, 8.507059e+37 }
 0x332   :  { %v444_v30 = vadd.f32 %v2369_v24, %v443_v28 }
 0x334   :  { %v448_v36 = vsel %vm447_vm13, %v2369_v24, %v444_v30 }
 0x335   :  { %v453_v40 = vsel %vm450_vm14, %v452_v37, %v448_v36  ;;  %v2373_v42 = vpop.eup %2372 }
 0x336   :  { %v461_v44 = vmul.f32 %v2373_v42, %v459_v29  ;;  %vm466_vm15 = vweird.f32 %v2373_v42  ;;  %v476_v61 = vmul.f32 %v453_v40, %v2953_v45 }
 0x337   :  { %vm467_vm1 = vmor %vm465_vm0, %vm466_vm15 }
 0x338   :  { %v462_v47 = vsub.f32 1.0, %v461_v44 }
 0x33a   :  { %v463_v49 = vmul.f32 %v2373_v42, %v462_v47 }
 0x33c   :  { %v464_v51 = vadd.f32 %v2373_v42, %v463_v49 }
 0x33e   :  { %v468_v55 = vsel %vm467_vm1, %v2373_v42, %v464_v51 }
 0x33f   :  { %v473_v59 = vsel %vm470_vm2, %v472_v56, %v468_v55 }
 0x340   :  { %v487_v62 = vmul.f32 %v473_v59, %v2957_v52 }
 0x37b   :  { %v479_v38 = vpop.permute.xlu2 %478 }
 0x37c   :  { %v481_v41 = vmul.f32 %v479_v38, %v453_v40 }
 0x37e   :  { %483 = vrot.lane.b32.xlu1 %v481_v41, %s2632_s0 }
 0x394   :  { %v490_v58 = vpop.permute.xlu0 %489 }
 0x395   :  { %v492_v60 = vmul.f32 %v490_v58, %v473_v59 }
 0x397   :  { %494 = vrot.lane.b32.xlu2 %v492_v60, %s2632_s0 }
 0x3f0   :  { %v484_v63 = vpop.permute.xlu1 %483 }
 0x3f1   :  { %v495_v0 = vpop.permute.xlu2 %494  ;;  %v2994_v2 = vadd.f32 %v484_v63, %v476_v61 }
 0x3f2   :  { %v2996_v4 = vadd.f32 %v495_v0, %v487_v62 }
 0x3f3   :  { %2374 = vtanh.f32 %v2994_v2 }
 0x3f4   :  { %2376 = vtanh.f32 %v2996_v4 }
 0x3f9   :  { %v2375_v7 = vpop.eup %2374 }
 0x3fa   :  { %v2377_v8 = vpop.eup %2376  ;;  %500 = vrot.lane.b32.xlu0 %v2375_v7, %s2632_s0 }
 0x3fb   :  { %506 = vrot.lane.b32.xlu1 %v2377_v8, %s2632_s0 }
 0x46c   :  { %v501_v13 = vpop.permute.xlu0 %500 }
 0x46d   :  { %v507_v45 = vpop.permute.xlu1 %506  ;;  %v503_v19 = vmul.f32 %v501_v13, %v453_v40 }
 0x46e   :  { %v3002_v52 = vmul.f32 %v507_v45, %v473_v59 }
 0x46f   :  { %511 = vrot.lane.b32.xlu2 %v503_v19, %s2633_s2 }
 0x470   :  { %522 = vrot.lane.b32.xlu0 %v3002_v52, %s2634_s20 }
 0x4c9   :  { %v512_v21 = vpop.permute.xlu2 %511 }
 0x4ca   :  { %515 = vst.msk [vmem:[#allocation2 + $0x8] sm:$0xff] %vm375_vm9, %v512_v21 }
 0x4e2   :  { %v523_v24 = vpop.permute.xlu0 %522 }
 0x4e3   :  { %v525_v25 = vsel %vm375_vm9, %v512_v21, %v523_v24 }
 0x4e4   :  { %2273 = vmatmul.msk.f32.vlgmr.msra.gmra.mxu2 %vm248_vm10, %v525_v25  ;;  %2274 = vmatmul.msk.f32.vlgmr.msra.gmra.mxu3 %vm248_vm10, %v525_v25 }
 0x4e5   :  { %954 = vmatpush.msra.mxu2 %v2723_v1  ;;  %974 = vmatpush.msra.mxu3 %v2759_v9 }
 0x4e7   :  { %955 = vmatpush.msra.mxu2 %v2732_v3  ;;  %975 = vmatpush.msra.mxu3 %v2770_v11 }
 0x4e9   :  { %956 = vmatpush.msra.mxu2 %v2740_v5  ;;  %976 = vmatpush.msra.mxu3 %v2802_v16 }
 0x4eb   :  { %957 = vmatpush.msra.mxu2 %v2747_v6  ;;  %977 = vmatpush.msra.mxu3 %v2807_v17 }
 0x4ed   :  { %958 = vmatpush.msra.mxu2 %v2764_v10  ;;  %978 = vmatpush.msra.mxu3 %v2815_v18 }
 0x4ef   :  { %959 = vmatpush.msra.mxu2 %v2777_v12  ;;  %979 = vmatpush.msra.mxu3 %v2824_v20 }
 0x4f1   :  { %960 = vmatpush.msra.mxu2 %v2789_v14  ;;  %980 = vmatpush.msra.mxu3 %v2840_v22 }
 0x4f3   :  { %961 = vmatpush.msra.mxu2 %v2797_v15  ;;  %981 = vmatpush.msra.mxu3 %v2845_v23 }
 0x567   :  { %v546_v28 = vpop.f32.mrf.mxu2  ;;  %v566_v50 = vpop.f32.mrf.mxu3 }
 0x568   :  { %v571_v29 = vadd.f32 %v546_v28, %v158_v27  ;;  %v574_v30 = vadd.f32 %v566_v50, %v2946_v48 }
 0x56a   :  { %2378 = vtanh.f32 %v571_v29  ;;  %v2276_v36 = vmul.f32 -1.442695, %v574_v30  ;;  %v2275_v41 = vmul.f32 -1.442695, %v571_v29 }
 0x56b   :  { %2380 = vtanh.f32 %v574_v30 }
 0x56c   :  { %2382 = vpow2.f32 %v2276_v36 }
 0x570   :  { %v2379_v31 = vpop.eup %2378 }
 0x571   :  { %v2381_v33 = vpop.eup %2380  ;;  %617 = vrot.lane.b32.xlu1 %v2379_v31, %s2632_s0 }
 0x572   :  { %628 = vrot.lane.b32.xlu2 %v2381_v33, %s2632_s0  ;;  %v2383_v37 = vpop.eup %2382 }
 0x573   :  { %v598_v38 = vadd.f32 1.0, %v2383_v37 }
 0x575   :  { %2384 = vrcp.f32 %v598_v38  ;;  %v610_v53 = vand.u32 2147483648, %v598_v38  ;;  %vm604_vm4 = vweird.f32 %v598_v38  ;;  %v608_v54 = vand.u32 2147483647, %v598_v38 }
 0x576   :  { %2386 = vpow2.f32 %v2275_v41 }
 0x577   :  { %v611_v56 = vor.u32 1.1754944e-38, %v610_v53  ;;  %vm609_vm6 = vcmp.eq.f32.partialorder %v608_v54, 8.507059e+37 }
 0x57b   :  { %v2385_v40 = vpop.eup %2384 }
 0x57c   :  { %v600_v42 = vmul.f32 %v2385_v40, %v598_v38  ;;  %v2387_v47 = vpop.eup %2386  ;;  %vm605_vm3 = vweird.f32 %v2385_v40 }
 0x57d   :  { %v578_v49 = vadd.f32 1.0, %v2387_v47  ;;  %vm606_vm5 = vmor %vm604_vm4, %vm605_vm3 }
 0x57e   :  { %v601_v44 = vsub.f32 1.0, %v600_v42 }
 0x57f   :  { %2388 = vrcp.f32 %v578_v49  ;;  %v590_v8 = vand.u32 2147483648, %v578_v49  ;;  %vm584_vm8 = vweird.f32 %v578_v49  ;;  %v588_v13 = vand.u32 2147483647, %v578_v49 }
 0x580   :  { %v602_v48 = vmul.f32 %v2385_v40, %v601_v44 }
 0x581   :  { %v591_v19 = vor.u32 1.1754944e-38, %v590_v8  ;;  %vm589_vm12 = vcmp.eq.f32.partialorder %v588_v13, 8.507059e+37 }
 0x582   :  { %v603_v51 = vadd.f32 %v2385_v40, %v602_v48 }
 0x584   :  { %v607_v55 = vsel %vm606_vm5, %v2385_v40, %v603_v51 }
 0x585   :  { %v612_v59 = vsel %vm609_vm6, %v611_v56, %v607_v55  ;;  %v2389_v60 = vpop.eup %2388 }
 0x586   :  { %v580_v62 = vmul.f32 %v2389_v60, %v578_v49  ;;  %vm585_vm7 = vweird.f32 %v2389_v60  ;;  %v626_v26 = vmul.f32 %v612_v59, %v2996_v4 }
 0x587   :  { %vm586_vm11 = vmor %vm584_vm8, %vm585_vm7 }
 0x588   :  { %v581_v63 = vsub.f32 1.0, %v580_v62 }
 0x58a   :  { %v582_v0 = vmul.f32 %v2389_v60, %v581_v63 }
 0x58c   :  { %v583_v7 = vadd.f32 %v2389_v60, %v582_v0 }
 0x58e   :  { %v587_v45 = vsel %vm586_vm11, %v2389_v60, %v583_v7 }
 0x58f   :  { %v592_v24 = vsel %vm589_vm12, %v591_v19, %v587_v45 }
 0x590   :  { %v615_v29 = vmul.f32 %v592_v24, %v2994_v2 }
 0x5cc   :  { %v629_v58 = vpop.permute.xlu2 %628 }
 0x5cd   :  { %v631_v61 = vmul.f32 %v629_v58, %v612_v59 }
 0x5cf   :  { %633 = vrot.lane.b32.xlu1 %v631_v61, %s2632_s0 }
 0x5e3   :  { %v618_v21 = vpop.permute.xlu1 %617 }
 0x5e4   :  { %v620_v25 = vmul.f32 %v618_v21, %v592_v24 }
 0x5e6   :  { %622 = vrot.lane.b32.xlu0 %v620_v25, %s2632_s0 }
 0x641   :  { %v634_v27 = vpop.permute.xlu1 %633 }
 0x642   :  { %v3034_v28 = vadd.f32 %v634_v27, %v626_v26 }
 0x644   :  { %2390 = vtanh.f32 %v3034_v28 }
 0x64a   :  { %v2391_v50 = vpop.eup %2390 }
 0x64b   :  { %645 = vrot.lane.b32.xlu0 %v2391_v50, %s2632_s0 }
 0x658   :  { %v623_v30 = vpop.permute.xlu0 %622 }
 0x659   :  { %v3039_v31 = vadd.f32 %v623_v30, %v615_v29 }
 0x65b   :  { %2392 = vtanh.f32 %v3039_v31 }
 0x661   :  { %v2393_v33 = vpop.eup %2392 }
 0x662   :  { %639 = vrot.lane.b32.xlu2 %v2393_v33, %s2632_s0 }
 0x6bc   :  { %v640_v36 = vpop.permute.xlu2 %639 }
 0x6bd   :  { %v646_v4 = vpop.permute.xlu0 %645  ;;  %v642_v37 = vmul.f32 %v640_v36, %v592_v24 }
 0x6be   :  { %v3043_v38 = vmul.f32 %v646_v4, %v612_v59 }
 0x6bf   :  { %650 = vrot.lane.b32.xlu1 %v642_v37, %s2633_s2 }
 0x6c0   :  { %661 = vrot.lane.b32.xlu2 %v3043_v38, %s2634_s20 }
 0x71a   :  { %v662_v40 = vpop.permute.xlu2 %661 }
 0x731   :  { %v651_v2 = vpop.permute.xlu1 %650 }
 0x732   :  { %654 = vst.msk [vmem:[#allocation2 + $0x10] sm:$0xff] %vm375_vm9, %v651_v2  ;;  %v664_v41 = vsel %vm375_vm9, %v651_v2, %v662_v40 }
 0x733   :  { %2277 = vmatmul.msk.f32.vlgmr.msrb.gmra.mxu2 %vm248_vm10, %v664_v41  ;;  %2278 = vmatmul.msk.f32.vlgmr.msrb.gmra.mxu3 %vm248_vm10, %v664_v41 }
 0x734   :  { %1232 = vmatpush.msrb.mxu2 %v2723_v1  ;;  %1252 = vmatpush.msrb.mxu3 %v2759_v9  ;;  %v160_v1 = vpop.f32.mrf.mxu0 }
 0x736   :  { %1233 = vmatpush.msrb.mxu2 %v2732_v3  ;;  %1253 = vmatpush.msrb.mxu3 %v2770_v11  ;;  %v161_v3 = vadd.f32 %v160_v1, %v2936_v35 }
 0x738   :  { %1234 = vmatpush.msrb.mxu2 %v2740_v5  ;;  %1254 = vmatpush.msrb.mxu3 %v2802_v16 }
 0x73a   :  { %1235 = vmatpush.msrb.mxu2 %v2747_v6  ;;  %1255 = vmatpush.msrb.mxu3 %v2807_v17 }
 0x73c   :  { %1236 = vmatpush.msrb.mxu2 %v2764_v10  ;;  %1256 = vmatpush.msrb.mxu3 %v2815_v18  ;;  %v163_v40 = vpop.f32.mrf.mxu0 }
 0x73e   :  { %1237 = vmatpush.msrb.mxu2 %v2777_v12  ;;  %1257 = vmatpush.msrb.mxu3 %v2824_v20 }
 0x740   :  { %1238 = vmatpush.msrb.mxu2 %v2789_v14  ;;  %1258 = vmatpush.msrb.mxu3 %v2840_v22 }
 0x742   :  { %1239 = vmatpush.msrb.mxu2 %v2797_v15  ;;  %1259 = vmatpush.msrb.mxu3 %v2845_v23 }
 0x744   :  { %v3093_v2 = vpop.f32.mrf.mxu0 }
 0x74c   :  { %v3095_v41 = vpop.f32.mrf.mxu0 }
 0x754   :  { %v3097_v1 = vpop.f32.mrf.mxu0 }
 0x7b6   :  { %v685_v5 = vpop.f32.mrf.mxu2  ;;  %v705_v6 = vpop.f32.mrf.mxu3 }
 0x7b7   :  { %v710_v9 = vadd.f32 %v685_v5, %v161_v3  ;;  %v713_v10 = vadd.f32 %v705_v6, %v2944_v46  ;;  %v164_v3 = vadd.f32 %v163_v40, %v2936_v35  ;;  %v167_v40 = vadd.f32 %v3093_v2, %v2936_v35 }
 0x7b9   :  { %2394 = vtanh.f32 %v710_v9  ;;  %v2279_v14 = vmul.f32 -1.442695, %v710_v9  ;;  %v2280_v15 = vmul.f32 -1.442695, %v713_v10 }
 0x7ba   :  { %2396 = vtanh.f32 %v713_v10 }
 0x7bb   :  { %2398 = vpow2.f32 %v2279_v14 }
 0x7bc   :  { %2400 = vpow2.f32 %v2280_v15 }
 0x7bf   :  { %v2395_v11 = vpop.eup %2394 }
 0x7c0   :  { %v2397_v12 = vpop.eup %2396  ;;  %756 = vrot.lane.b32.xlu0 %v2395_v11, %s2632_s0 }
 0x7c1   :  { %767 = vrot.lane.b32.xlu1 %v2397_v12, %s2632_s0  ;;  %v2399_v16 = vpop.eup %2398 }
 0x7c2   :  { %v2401_v17 = vpop.eup %2400  ;;  %v717_v18 = vadd.f32 1.0, %v2399_v16 }
 0x7c3   :  { %v737_v20 = vadd.f32 1.0, %v2401_v17 }
 0x7c4   :  { %2402 = vrcp.f32 %v717_v18  ;;  %v729_v54 = vand.u32 2147483648, %v717_v18  ;;  %vm723_vm15 = vweird.f32 %v717_v18  ;;  %v727_v56 = vand.u32 2147483647, %v717_v18 }
 0x7c5   :  { %2404 = vrcp.f32 %v737_v20  ;;  %v749_v55 = vand.u32 2147483648, %v737_v20  ;;  %vm743_vm0 = vweird.f32 %v737_v20  ;;  %v747_v58 = vand.u32 2147483647, %v737_v20 }
 0x7c6   :  { %v730_v61 = vor.u32 1.1754944e-38, %v729_v54  ;;  %vm728_vm3 = vcmp.eq.f32.partialorder %v727_v56, 8.507059e+37 }
 0x7c7   :  { %v750_v62 = vor.u32 1.1754944e-38, %v749_v55  ;;  %vm748_vm4 = vcmp.eq.f32.partialorder %v747_v58, 8.507059e+37 }
 0x7ca   :  { %v2403_v22 = vpop.eup %2402 }
 0x7cb   :  { %v2405_v23 = vpop.eup %2404  ;;  %v719_v46 = vmul.f32 %v2403_v22, %v717_v18  ;;  %vm724_vm13 = vweird.f32 %v2403_v22 }
 0x7cc   :  { %v739_v42 = vmul.f32 %v2405_v23, %v737_v20  ;;  %vm744_vm14 = vweird.f32 %v2405_v23  ;;  %vm725_vm1 = vmor %vm723_vm15, %vm724_vm13 }
 0x7cd   :  { %v720_v44 = vsub.f32 1.0, %v719_v46  ;;  %vm745_vm2 = vmor %vm743_vm0, %vm744_vm14 }
 0x7ce   :  { %v740_v47 = vsub.f32 1.0, %v739_v42 }
 0x7cf   :  { %v721_v48 = vmul.f32 %v2403_v22, %v720_v44 }
 0x7d0   :  { %v741_v49 = vmul.f32 %v2405_v23, %v740_v47 }
 0x7d1   :  { %v722_v51 = vadd.f32 %v2403_v22, %v721_v48 }
 0x7d2   :  { %v742_v53 = vadd.f32 %v2405_v23, %v741_v49 }
 0x7d3   :  { %v726_v59 = vsel %vm725_vm1, %v2403_v22, %v722_v51 }
 0x7d4   :  { %v746_v60 = vsel %vm745_vm2, %v2405_v23, %v742_v53  ;;  %v731_v0 = vsel %vm728_vm3, %v730_v61, %v726_v59 }
 0x7d5   :  { %v751_v8 = vsel %vm748_vm4, %v750_v62, %v746_v60  ;;  %v754_v19 = vmul.f32 %v731_v0, %v3039_v31 }
 0x7d6   :  { %v765_v26 = vmul.f32 %v751_v8, %v3034_v28 }
 0x832   :  { %v757_v63 = vpop.permute.xlu0 %756 }
 0x833   :  { %v768_v7 = vpop.permute.xlu1 %767  ;;  %v759_v13 = vmul.f32 %v757_v63, %v731_v0 }
 0x834   :  { %v770_v45 = vmul.f32 %v768_v7, %v751_v8 }
 0x835   :  { %761 = vrot.lane.b32.xlu2 %v759_v13, %s2632_s0 }
 0x836   :  { %772 = vrot.lane.b32.xlu0 %v770_v45, %s2632_s0 }
 0x88f   :  { %v762_v21 = vpop.permute.xlu2 %761 }
 0x890   :  { %v3075_v24 = vadd.f32 %v762_v21, %v754_v19 }
 0x892   :  { %2406 = vtanh.f32 %v3075_v24 }
 0x898   :  { %v2407_v25 = vpop.eup %2406 }
 0x899   :  { %778 = vrot.lane.b32.xlu1 %v2407_v25, %s2632_s0 }
 0x8a8   :  { %v773_v27 = vpop.permute.xlu0 %772 }
 0x8a9   :  { %v3080_v50 = vadd.f32 %v773_v27, %v765_v26 }
 0x8ab   :  { %2408 = vtanh.f32 %v3080_v50 }
 0x8b1   :  { %v2409_v29 = vpop.eup %2408 }
 0x8b2   :  { %784 = vrot.lane.b32.xlu2 %v2409_v29, %s2632_s0 }
 0x90b   :  { %v779_v30 = vpop.permute.xlu1 %778 }
 0x90c   :  { %v785_v31 = vpop.permute.xlu2 %784  ;;  %v781_v33 = vmul.f32 %v779_v30, %v731_v0 }
 0x90d   :  { %v3084_v36 = vmul.f32 %v785_v31, %v751_v8 }
 0x90e   :  { %789 = vrot.lane.b32.xlu0 %v781_v33, %s2633_s2 }
 0x90f   :  { %800 = vrot.lane.b32.xlu1 %v3084_v36, %s2634_s20 }
 0x980   :  { %v790_v4 = vpop.permute.xlu0 %789 }
 0x981   :  { %793 = vst.msk [vmem:[#allocation2 + $0x18] sm:$0xff] %vm375_vm9, %v790_v4  ;;  %v801_v28 = vpop.permute.xlu1 %800 }
 0x982   :  { %v803_v37 = vsel %vm375_vm9, %v790_v4, %v801_v28 }
 0x983   :  { %2281 = vmatmul.msk.f32.vlgmr.msrb.gmra.mxu0 %vm248_vm10, %v803_v37  ;;  %2282 = vmatmul.msk.f32.vlgmr.msrb.gmra.mxu1 %vm248_vm10, %v803_v37 }
 0xa00   :  { %v824_v5 = vpop.f32.mrf.mxu0  ;;  %v844_v6 = vpop.f32.mrf.mxu1 }
 0xa01   :  { %v849_v9 = vadd.f32 %v824_v5, %v164_v3  ;;  %v852_v10 = vadd.f32 %v844_v6, %v2941_v43 }
 0xa03   :  { %2410 = vtanh.f32 %v849_v9  ;;  %v2283_v14 = vmul.f32 -1.442695, %v849_v9  ;;  %v2284_v18 = vmul.f32 -1.442695, %v852_v10 }
 0xa04   :  { %2412 = vtanh.f32 %v852_v10 }
 0xa05   :  { %2414 = vpow2.f32 %v2283_v14 }
 0xa09   :  { %v2411_v11 = vpop.eup %2410 }
 0xa0a   :  { %v2413_v12 = vpop.eup %2412  ;;  %895 = vrot.lane.b32.xlu2 %v2411_v11, %s2632_s0 }
 0xa0b   :  { %906 = vrot.lane.b32.xlu0 %v2413_v12, %s2632_s0  ;;  %v2415_v15 = vpop.eup %2414 }
 0xa0c   :  { %v856_v16 = vadd.f32 1.0, %v2415_v15 }
 0xa0e   :  { %2416 = vrcp.f32 %v856_v16  ;;  %v868_v44 = vand.u32 2147483648, %v856_v16  ;;  %vm862_vm6 = vweird.f32 %v856_v16  ;;  %v866_v47 = vand.u32 2147483647, %v856_v16 }
 0xa0f   :  { %2418 = vpow2.f32 %v2284_v18 }
 0xa10   :  { %v869_v49 = vor.u32 1.1754944e-38, %v868_v44  ;;  %vm867_vm8 = vcmp.eq.f32.partialorder %v866_v47, 8.507059e+37 }
 0xa14   :  { %v2417_v17 = vpop.eup %2416 }
 0xa15   :  { %v858_v20 = vmul.f32 %v2417_v17, %v856_v16  ;;  %v2419_v43 = vpop.eup %2418  ;;  %vm863_vm5 = vweird.f32 %v2417_v17 }
 0xa16   :  { %v876_v46 = vadd.f32 1.0, %v2419_v43  ;;  %vm864_vm7 = vmor %vm862_vm6, %vm863_vm5 }
 0xa17   :  { %v859_v22 = vsub.f32 1.0, %v858_v20 }
 0xa18   :  { %2420 = vrcp.f32 %v876_v46  ;;  %v888_v61 = vand.u32 2147483648, %v876_v46  ;;  %vm882_vm12 = vweird.f32 %v876_v46  ;;  %v886_v62 = vand.u32 2147483647, %v876_v46 }
 0xa19   :  { %v860_v23 = vmul.f32 %v2417_v17, %v859_v22 }
 0xa1a   :  { %v889_v0 = vor.u32 1.1754944e-38, %v888_v61  ;;  %vm887_vm14 = vcmp.eq.f32.partialorder %v886_v62, 8.507059e+37 }
 0xa1b   :  { %v861_v42 = vadd.f32 %v2417_v17, %v860_v23 }
 0xa1d   :  { %v865_v48 = vsel %vm864_vm7, %v2417_v17, %v861_v42 }
 0xa1e   :  { %v870_v53 = vsel %vm867_vm8, %v869_v49, %v865_v48  ;;  %v2421_v55 = vpop.eup %2420 }
 0xa1f   :  { %v878_v56 = vmul.f32 %v2421_v55, %v876_v46  ;;  %vm883_vm11 = vweird.f32 %v2421_v55  ;;  %v893_v45 = vmul.f32 %v870_v53, %v3075_v24 }
 0xa20   :  { %vm884_vm13 = vmor %vm882_vm12, %vm883_vm11 }
 0xa21   :  { %v879_v58 = vsub.f32 1.0, %v878_v56 }
 0xa23   :  { %v880_v59 = vmul.f32 %v2421_v55, %v879_v58 }
 0xa25   :  { %v881_v60 = vadd.f32 %v2421_v55, %v880_v59 }
 0xa27   :  { %v885_v63 = vsel %vm884_vm13, %v2421_v55, %v881_v60 }
 0xa28   :  { %v890_v8 = vsel %vm887_vm14, %v889_v0, %v885_v63 }
 0xa29   :  { %v904_v19 = vmul.f32 %v890_v8, %v3080_v50 }
 0xa64   :  { %v896_v51 = vpop.permute.xlu2 %895 }
 0xa65   :  { %v898_v54 = vmul.f32 %v896_v51, %v870_v53 }
 0xa67   :  { %900 = vrot.lane.b32.xlu1 %v898_v54, %s2632_s0 }
 0xa7d   :  { %v907_v7 = vpop.permute.xlu0 %906 }
 0xa7e   :  { %v909_v13 = vmul.f32 %v907_v7, %v890_v8 }
 0xa80   :  { %911 = vrot.lane.b32.xlu2 %v909_v13, %s2632_s0 }
 0xad9   :  { %v901_v21 = vpop.permute.xlu1 %900 }
 0xada   :  { %v912_v25 = vpop.permute.xlu2 %911  ;;  %v3107_v26 = vadd.f32 %v901_v21, %v893_v45 }
 0xadb   :  { %v3109_v27 = vadd.f32 %v912_v25, %v904_v19 }
 0xadc   :  { %2422 = vtanh.f32 %v3107_v26 }
 0xadd   :  { %2424 = vtanh.f32 %v3109_v27 }
 0xae2   :  { %v2423_v29 = vpop.eup %2422 }
 0xae3   :  { %v2425_v30 = vpop.eup %2424  ;;  %917 = vrot.lane.b32.xlu0 %v2423_v29, %s2632_s0 }
 0xae4   :  { %923 = vrot.lane.b32.xlu1 %v2425_v30, %s2632_s0 }
 0xb55   :  { %v918_v31 = vpop.permute.xlu0 %917 }
 0xb56   :  { %v924_v24 = vpop.permute.xlu1 %923  ;;  %v920_v33 = vmul.f32 %v918_v31, %v870_v53 }
 0xb57   :  { %v3115_v50 = vmul.f32 %v924_v24, %v890_v8 }
 0xb58   :  { %928 = vrot.lane.b32.xlu2 %v920_v33, %s2633_s2 }
 0xb59   :  { %939 = vrot.lane.b32.xlu0 %v3115_v50, %s2634_s20 }
 0xbb2   :  { %v929_v4 = vpop.permute.xlu2 %928 }
 0xbb3   :  { %932 = vst.msk [vmem:[#allocation2 + $0x20] sm:$0xff] %vm375_vm9, %v929_v4 }
 0xbcb   :  { %v940_v28 = vpop.permute.xlu0 %939 }
 0xbcc   :  { %v942_v37 = vsel %vm375_vm9, %v929_v4, %v940_v28  ;;  %v170_v28 = vadd.f32 %v3095_v41, %v2936_v35 }
 0xbcd   :  { %2285 = vmatmul.msk.f32.vlgmr.msra.gmra.mxu2 %vm248_vm10, %v942_v37  ;;  %2286 = vmatmul.msk.f32.vlgmr.msra.gmra.mxu3 %vm248_vm10, %v942_v37 }
 0xc50   :  { %v963_v3 = vpop.f32.mrf.mxu2  ;;  %v983_v5 = vpop.f32.mrf.mxu3 }
 0xc51   :  { %v988_v6 = vadd.f32 %v963_v3, %v167_v40  ;;  %v991_v9 = vadd.f32 %v983_v5, %v2939_v39 }
 0xc53   :  { %2426 = vtanh.f32 %v988_v6  ;;  %v2288_v12 = vmul.f32 -1.442695, %v991_v9  ;;  %v2287_v2 = vmul.f32 -1.442695, %v988_v6 }
 0xc54   :  { %2428 = vtanh.f32 %v991_v9 }
 0xc55   :  { %2430 = vpow2.f32 %v2288_v12 }
 0xc59   :  { %v2427_v10 = vpop.eup %2426 }
 0xc5a   :  { %v2429_v11 = vpop.eup %2428  ;;  %1034 = vrot.lane.b32.xlu1 %v2427_v10, %s2632_s0 }
 0xc5b   :  { %1045 = vrot.lane.b32.xlu2 %v2429_v11, %s2632_s0  ;;  %v2431_v14 = vpop.eup %2430 }
 0xc5c   :  { %v1015_v15 = vadd.f32 1.0, %v2431_v14 }
 0xc5e   :  { %2432 = vrcp.f32 %v1015_v15  ;;  %v1027_v43 = vand.u32 2147483648, %v1015_v15  ;;  %vm1021_vm0 = vweird.f32 %v1015_v15  ;;  %v1025_v46 = vand.u32 2147483647, %v1015_v15 }
 0xc5f   :  { %2434 = vpow2.f32 %v2287_v2 }
 0xc60   :  { %v1028_v44 = vor.u32 1.1754944e-38, %v1027_v43  ;;  %vm1026_vm2 = vcmp.eq.f32.partialorder %v1025_v46, 8.507059e+37 }
 0xc64   :  { %v2433_v16 = vpop.eup %2432 }
 0xc65   :  { %v1017_v17 = vmul.f32 %v2433_v16, %v1015_v15  ;;  %v2435_v20 = vpop.eup %2434  ;;  %vm1022_vm15 = vweird.f32 %v2433_v16 }
 0xc66   :  { %v995_v22 = vadd.f32 1.0, %v2435_v20  ;;  %vm1023_vm1 = vmor %vm1021_vm0, %vm1022_vm15 }
 0xc67   :  { %v1018_v18 = vsub.f32 1.0, %v1017_v17 }
 0xc68   :  { %2436 = vrcp.f32 %v995_v22  ;;  %v1007_v58 = vand.u32 2147483648, %v995_v22  ;;  %vm1001_vm4 = vweird.f32 %v995_v22  ;;  %v1005_v59 = vand.u32 2147483647, %v995_v22 }
 0xc69   :  { %v1019_v39 = vmul.f32 %v2433_v16, %v1018_v18 }
 0xc6a   :  { %v1008_v61 = vor.u32 1.1754944e-38, %v1007_v58  ;;  %vm1006_vm6 = vcmp.eq.f32.partialorder %v1005_v59, 8.507059e+37 }
 0xc6b   :  { %v1020_v23 = vadd.f32 %v2433_v16, %v1019_v39 }
 0xc6d   :  { %v1024_v42 = vsel %vm1023_vm1, %v2433_v16, %v1020_v23 }
 0xc6e   :  { %v1029_v48 = vsel %vm1026_vm2, %v1028_v44, %v1024_v42  ;;  %v2437_v49 = vpop.eup %2436 }
 0xc6f   :  { %v997_v53 = vmul.f32 %v2437_v49, %v995_v22  ;;  %vm1002_vm3 = vweird.f32 %v2437_v49  ;;  %v1043_v7 = vmul.f32 %v1029_v48, %v3109_v27 }
 0xc70   :  { %vm1003_vm5 = vmor %vm1001_vm4, %vm1002_vm3 }
 0xc71   :  { %v998_v54 = vsub.f32 1.0, %v997_v53 }
 0xc73   :  { %v999_v55 = vmul.f32 %v2437_v49, %v998_v54 }
 0xc75   :  { %v1000_v56 = vadd.f32 %v2437_v49, %v999_v55 }
 0xc77   :  { %v1004_v60 = vsel %vm1003_vm5, %v2437_v49, %v1000_v56 }
 0xc78   :  { %v1009_v63 = vsel %vm1006_vm6, %v1008_v61, %v1004_v60 }
 0xc79   :  { %v1032_v19 = vmul.f32 %v1009_v63, %v3107_v26 }
 0xcb5   :  { %v1046_v47 = vpop.permute.xlu2 %1045 }
 0xcb6   :  { %v1048_v51 = vmul.f32 %v1046_v47, %v1029_v48 }
 0xcb8   :  { %1050 = vrot.lane.b32.xlu1 %v1048_v51, %s2632_s0 }
 0xccc   :  { %v1035_v62 = vpop.permute.xlu1 %1034 }
 0xccd   :  { %v1037_v0 = vmul.f32 %v1035_v62, %v1009_v63 }
 0xccf   :  { %1039 = vrot.lane.b32.xlu0 %v1037_v0, %s2632_s0 }
 0xd2a   :  { %v1051_v8 = vpop.permute.xlu1 %1050 }
 0xd2b   :  { %v3132_v13 = vadd.f32 %v1051_v8, %v1043_v7 }
 0xd2d   :  { %2438 = vtanh.f32 %v3132_v13 }
 0xd33   :  { %v2439_v45 = vpop.eup %2438 }
 0xd34   :  { %1062 = vrot.lane.b32.xlu0 %v2439_v45, %s2632_s0 }
 0xd41   :  { %v1040_v21 = vpop.permute.xlu0 %1039 }
 0xd42   :  { %v3137_v25 = vadd.f32 %v1040_v21, %v1032_v19 }
 0xd44   :  { %2440 = vtanh.f32 %v3137_v25 }
 0xd4a   :  { %v2441_v29 = vpop.eup %2440 }
 0xd4b   :  { %1056 = vrot.lane.b32.xlu2 %v2441_v29, %s2632_s0 }
 0xda5   :  { %v1057_v30 = vpop.permute.xlu2 %1056 }
 0xda6   :  { %v1063_v27 = vpop.permute.xlu0 %1062  ;;  %v1059_v31 = vmul.f32 %v1057_v30, %v1009_v63 }
 0xda7   :  { %v3141_v24 = vmul.f32 %v1063_v27, %v1029_v48 }
 0xda8   :  { %1067 = vrot.lane.b32.xlu1 %v1059_v31, %s2633_s2 }
 0xda9   :  { %1078 = vrot.lane.b32.xlu2 %v3141_v24, %s2634_s20 }
 0xe03   :  { %v1079_v33 = vpop.permute.xlu2 %1078 }
 0xe1a   :  { %v1068_v26 = vpop.permute.xlu1 %1067 }
 0xe1b   :  { %1071 = vst.msk [vmem:[#allocation2 + $0x28] sm:$0xff] %vm375_vm9, %v1068_v26  ;;  %v1081_v4 = vsel %vm375_vm9, %v1068_v26, %v1079_v33  ;;  %v173_v33 = vadd.f32 %v3097_v1, %v2936_v35 }
 0xe1c   :  { %2289 = vmatmul.msk.f32.vlgmr.msra.gmra.mxu0 %vm248_vm10, %v1081_v4  ;;  %2290 = vmatmul.msk.f32.vlgmr.msra.gmra.mxu1 %vm248_vm10, %v1081_v4 }
 0xe99   :  { %v1102_v37 = vpop.f32.mrf.mxu0  ;;  %v1122_v40 = vpop.f32.mrf.mxu1 }
 0xe9a   :  { %v1127_v3 = vadd.f32 %v1102_v37, %v170_v28  ;;  %v1130_v5 = vadd.f32 %v1122_v40, %v2934_v34 }
 0xe9c   :  { %2442 = vtanh.f32 %v1127_v3  ;;  %v2291_v10 = vmul.f32 -1.442695, %v1127_v3  ;;  %v2292_v11 = vmul.f32 -1.442695, %v1130_v5 }
 0xe9d   :  { %2444 = vtanh.f32 %v1130_v5 }
 0xe9e   :  { %2446 = vpow2.f32 %v2291_v10 }
 0xe9f   :  { %2448 = vpow2.f32 %v2292_v11 }
 0xea2   :  { %v2443_v6 = vpop.eup %2442 }
 0xea3   :  { %v2445_v9 = vpop.eup %2444  ;;  %1173 = vrot.lane.b32.xlu0 %v2443_v6, %s2632_s0 }
 0xea4   :  { %1184 = vrot.lane.b32.xlu1 %v2445_v9, %s2632_s0  ;;  %v2447_v12 = vpop.eup %2446 }
 0xea5   :  { %v2449_v14 = vpop.eup %2448  ;;  %v1134_v41 = vadd.f32 1.0, %v2447_v12 }
 0xea6   :  { %v1154_v15 = vadd.f32 1.0, %v2449_v14 }
 0xea7   :  { %2450 = vrcp.f32 %v1134_v41  ;;  %v1146_v46 = vand.u32 2147483648, %v1134_v41  ;;  %vm1140_vm11 = vweird.f32 %v1134_v41  ;;  %v1144_v44 = vand.u32 2147483647, %v1134_v41 }
 0xea8   :  { %2452 = vrcp.f32 %v1154_v15  ;;  %v1166_v42 = vand.u32 2147483648, %v1154_v15  ;;  %vm1160_vm12 = vweird.f32 %v1154_v15  ;;  %v1164_v47 = vand.u32 2147483647, %v1154_v15 }
 0xea9   :  { %v1147_v51 = vor.u32 1.1754944e-38, %v1146_v46  ;;  %vm1145_vm15 = vcmp.eq.f32.partialorder %v1144_v44, 8.507059e+37 }
 0xeaa   :  { %v1167_v53 = vor.u32 1.1754944e-38, %v1166_v42  ;;  %vm1165_vm0 = vcmp.eq.f32.partialorder %v1164_v47, 8.507059e+37 }
 0xead   :  { %v2451_v16 = vpop.eup %2450 }
 0xeae   :  { %v2453_v34 = vpop.eup %2452  ;;  %v1136_v2 = vmul.f32 %v2451_v16, %v1134_v41  ;;  %vm1141_vm7 = vweird.f32 %v2451_v16 }
 0xeaf   :  { %v1156_v17 = vmul.f32 %v2453_v34, %v1154_v15  ;;  %vm1161_vm8 = vweird.f32 %v2453_v34  ;;  %vm1142_vm13 = vmor %vm1140_vm11, %vm1141_vm7 }
 0xeb0   :  { %v1137_v18 = vsub.f32 1.0, %v1136_v2  ;;  %vm1162_vm14 = vmor %vm1160_vm12, %vm1161_vm8 }
 0xeb1   :  { %v1157_v20 = vsub.f32 1.0, %v1156_v17 }
 0xeb2   :  { %v1138_v39 = vmul.f32 %v2451_v16, %v1137_v18 }
 0xeb3   :  { %v1158_v22 = vmul.f32 %v2453_v34, %v1157_v20 }
 0xeb4   :  { %v1139_v23 = vadd.f32 %v2451_v16, %v1138_v39 }
 0xeb5   :  { %v1159_v43 = vadd.f32 %v2453_v34, %v1158_v22 }
 0xeb6   :  { %v1143_v48 = vsel %vm1142_vm13, %v2451_v16, %v1139_v23 }
 0xeb7   :  { %v1163_v49 = vsel %vm1162_vm14, %v2453_v34, %v1159_v43  ;;  %v1148_v55 = vsel %vm1145_vm15, %v1147_v51, %v1143_v48 }
 0xeb8   :  { %v1168_v58 = vsel %vm1165_vm0, %v1167_v53, %v1163_v49  ;;  %v1171_v61 = vmul.f32 %v1148_v55, %v3137_v25 }
 0xeb9   :  { %v1182_v7 = vmul.f32 %v1168_v58, %v3132_v13 }
 0xf15   :  { %v1174_v54 = vpop.permute.xlu0 %1173 }
 0xf16   :  { %v1185_v56 = vpop.permute.xlu1 %1184  ;;  %v1176_v59 = vmul.f32 %v1174_v54, %v1148_v55 }
 0xf17   :  { %v1187_v60 = vmul.f32 %v1185_v56, %v1168_v58 }
 0xf18   :  { %1178 = vrot.lane.b32.xlu2 %v1176_v59, %s2632_s0 }
 0xf19   :  { %1189 = vrot.lane.b32.xlu0 %v1187_v60, %s2632_s0 }
 0xf72   :  { %v1179_v62 = vpop.permute.xlu2 %1178 }
 0xf73   :  { %v3158_v63 = vadd.f32 %v1179_v62, %v1171_v61 }
 0xf75   :  { %2454 = vtanh.f32 %v3158_v63 }
 0xf7b   :  { %v2455_v0 = vpop.eup %2454 }
 0xf7c   :  { %1195 = vrot.lane.b32.xlu1 %v2455_v0, %s2632_s0 }
 0xf8b   :  { %v1190_v8 = vpop.permute.xlu0 %1189 }
 0xf8c   :  { %v3163_v45 = vadd.f32 %v1190_v8, %v1182_v7 }
 0xf8e   :  { %2456 = vtanh.f32 %v3163_v45 }
 0xf94   :  { %v2457_v19 = vpop.eup %2456 }
 0xf95   :  { %1201 = vrot.lane.b32.xlu2 %v2457_v19, %s2632_s0 }
 0xfee   :  { %v1196_v21 = vpop.permute.xlu1 %1195 }
 0xfef   :  { %v1202_v25 = vpop.permute.xlu2 %1201  ;;  %v1198_v29 = vmul.f32 %v1196_v21, %v1148_v55 }
 0xff0   :  { %v3167_v30 = vmul.f32 %v1202_v25, %v1168_v58  ;;  %v3212_v25 = vld [vmem:[#allocation6 + $0x18] sm:$0xff] }
 0xff1   :  { %1206 = vrot.lane.b32.xlu0 %v1198_v29, %s2633_s2  ;;  %v1377_v29 = vld [vmem:[#allocation4 + $0x38] sm:$0xff]  ;;  %1549 = vmatpush.msra.mxu2 %v3212_v25 }
 0xff2   :  { %1217 = vrot.lane.b32.xlu1 %v3167_v30, %s2634_s20  ;;  %1415 = vmatpush.msrb.mxu0 %v1377_v29 }
 0xff3   :  { %1614 = vmatpush.msra.mxu3 %v3212_v25 }
0x1063   :  { %v1207_v27 = vpop.permute.xlu0 %1206 }
0x1064   :  { %1210 = vst.msk [vmem:[#allocation2 + $0x30] sm:$0xff] %vm375_vm9, %v1207_v27  ;;  %v1218_v13 = vpop.permute.xlu1 %1217 }
0x1065   :  { %v1220_v31 = vsel %vm375_vm9, %v1207_v27, %v1218_v13  ;;  %v3215_v27 = vld [vmem:[#allocation6 + $0x10] sm:$0xff] }
0x1066   :  { %2293 = vmatmul.msk.f32.vlgmr.msrb.gmra.mxu2 %vm248_vm10, %v1220_v31  ;;  %2294 = vmatmul.msk.f32.vlgmr.msrb.gmra.mxu3 %vm248_vm10, %v1220_v31  ;;  %v1376_v13 = vld [vmem:[#allocation4 + $0x30] sm:$0xff] }
0x1067   :  { %v1372_v31 = vld [vmem:[#allocation4 + $0x10] sm:$0xff]  ;;  %1550 = vmatpush.msra.mxu2 %v3215_v27  ;;  %1416 = vmatpush.msrb.mxu0 %v1376_v13 }
0x1068   :  { %1615 = vmatpush.msra.mxu3 %v3215_v27 }
0x10e9   :  { %v1241_v26 = vpop.f32.mrf.mxu2  ;;  %v1261_v4 = vpop.f32.mrf.mxu3 }
0x10ea   :  { %v1266_v28 = vadd.f32 %v1241_v26, %v173_v33  ;;  %v1268_v37 = vadd.f32 %v1261_v4, %v2932_v32  ;;  %v3217_v33 = vld [vmem:[#allocation6 + $0x8] sm:$0xff] }
0x10eb   :  { %v1375_v26 = vld [vmem:[#allocation4 + $0x28] sm:$0xff]  ;;  %1551 = vmatpush.msra.mxu2 %v3217_v33  ;;  %1616 = vmatpush.msra.mxu3 %v3217_v33 }
0x10ec   :  { %2458 = vtanh.f32 %v1266_v28  ;;  %v2295_v5 = vmul.f32 -1.442695, %v1266_v28  ;;  %v2296_v35 = vmul.f32 -1.442695, %v1268_v37  ;;  %v1371_v4 = vld [vmem:[#allocation4 + $0x8] sm:$0xff]  ;;  %v3221_v28 = vld [vmem:[#allocation6] sm:$0xff]  ;;  %1417 = vmatpush.msrb.mxu0 %v1375_v26 }
0x10ed   :  { %2460 = vtanh.f32 %v1268_v37  ;;  %v1374_v37 = vld [vmem:[#allocation4 + $0x20] sm:$0xff]  ;;  %1552 = vmatpush.msra.mxu2 %v3221_v28  ;;  %1617 = vmatpush.msra.mxu3 %v3221_v28 }
0x10ee   :  { %2462 = vpow2.f32 %v2295_v5  ;;  %v1354_v5 = vld [vmem:[#allocation2] sm:$0xff]  ;;  %1418 = vmatpush.msrb.mxu0 %v1374_v37 }
0x10ef   :  { %1679 = vmatpush.msrb.mxu2 %v3212_v25  ;;  %1744 = vmatpush.msrb.mxu3 %v3212_v25 }
0x10f1   :  { %1680 = vmatpush.msrb.mxu2 %v3215_v27  ;;  %1745 = vmatpush.msrb.mxu3 %v3215_v27 }
0x10f2   :  { %v2459_v40 = vpop.eup %2458 }
0x10f3   :  { %v2461_v3 = vpop.eup %2460  ;;  %1311 = vrot.lane.b32.xlu2 %v2459_v40, %s2632_s0  ;;  %v1370_v40 = vld [vmem:[#allocation4] sm:$0xff]  ;;  %1681 = vmatpush.msrb.mxu2 %v3217_v33 }
0x10f4   :  { %1322 = vrot.lane.b32.xlu0 %v2461_v3, %s2632_s0  ;;  %v2463_v6 = vpop.eup %2462  ;;  %1746 = vmatpush.msrb.mxu3 %v3217_v33 }
0x10f5   :  { %v1272_v9 = vadd.f32 1.0, %v2463_v6  ;;  %v2635_v6 = vmov 0.0   ;;  %1682 = vmatpush.msrb.mxu2 %v3221_v28 }
0x10f6   :  { %1553 = vmatmul.f32.vlgmr.msra.gmra.mxu2 %v2635_v6  ;;  %1747 = vmatpush.msrb.mxu3 %v3221_v28 }
0x10f7   :  { %2464 = vrcp.f32 %v1272_v9  ;;  %v1284_v15 = vand.u32 2147483648, %v1272_v9  ;;  %vm1278_vm1 = vweird.f32 %v1272_v9  ;;  %v1282_v16 = vand.u32 2147483647, %v1272_v9  ;;  %1809 = vmatpush.msra.mxu2 %v3212_v25 }
0x10f8   :  { %2466 = vpow2.f32 %v2296_v35 }
0x10f9   :  { %v1285_v2 = vor.u32 1.1754944e-38, %v1284_v15  ;;  %vm1283_vm3 = vcmp.eq.f32.partialorder %v1282_v16, 8.507059e+37  ;;  %1810 = vmatpush.msra.mxu2 %v3215_v27 }
0x10fb   :  { %1811 = vmatpush.msra.mxu2 %v3217_v33 }
0x10fd   :  { %v2465_v10 = vpop.eup %2464  ;;  %1812 = vmatpush.msra.mxu2 %v3221_v28 }
0x10fe   :  { %v1274_v1 = vmul.f32 %v2465_v10, %v1272_v9  ;;  %v2467_v32 = vpop.eup %2466  ;;  %vm1279_vm10 = vweird.f32 %v2465_v10  ;;  %v3245_v9 = vld [vmem:[%s3386_s5] ss:$0 sm:$0xff]  ;;  %s2637_s5 = smov 64  }
0x10ff   :  { %v1292_v14 = vadd.f32 1.0, %v2467_v32  ;;  %vm1280_vm2 = vmor %vm1278_vm1, %vm1279_vm10 }
0x1100   :  { %v1275_v11 = vsub.f32 1.0, %v1274_v1 }
0x1101   :  { %2468 = vrcp.f32 %v1292_v14  ;;  %v1304_v42 = vand.u32 2147483648, %v1292_v14  ;;  %vm1298_vm5 = vweird.f32 %v1292_v14  ;;  %v1302_v44 = vand.u32 2147483647, %v1292_v14 }
0x1102   :  { %v1276_v12 = vmul.f32 %v2465_v10, %v1275_v11 }
0x1103   :  { %v1305_v48 = vor.u32 1.1754944e-38, %v1304_v42  ;;  %vm1303_vm7 = vcmp.eq.f32.partialorder %v1302_v44, 8.507059e+37 }
0x1104   :  { %v1277_v41 = vadd.f32 %v2465_v10, %v1276_v12 }
0x1106   :  { %v1281_v34 = vsel %vm1280_vm2, %v2465_v10, %v1277_v41 }
0x1107   :  { %v1286_v18 = vsel %vm1283_vm3, %v1285_v2, %v1281_v34  ;;  %v2469_v39 = vpop.eup %2468 }
0x1108   :  { %v1294_v22 = vmul.f32 %v2469_v39, %v1292_v14  ;;  %vm1299_vm4 = vweird.f32 %v2469_v39  ;;  %v1309_v54 = vmul.f32 %v1286_v18, %v3158_v63 }
0x1109   :  { %vm1300_vm6 = vmor %vm1298_vm5, %vm1299_vm4 }
0x110a   :  { %v1295_v23 = vsub.f32 1.0, %v1294_v22 }
0x110c   :  { %v1296_v43 = vmul.f32 %v2469_v39, %v1295_v23 }
0x110e   :  { %v1297_v46 = vadd.f32 %v2469_v39, %v1296_v43 }
0x1110   :  { %v1301_v47 = vsel %vm1300_vm6, %v2469_v39, %v1297_v46 }
0x1111   :  { %v1306_v51 = vsel %vm1303_vm7, %v1305_v48, %v1301_v47 }
0x1112   :  { %v1320_v55 = vmul.f32 %v1306_v51, %v3163_v45 }
0x114d   :  { %v1312_v17 = vpop.permute.xlu2 %1311 }
0x114e   :  { %v1314_v20 = vmul.f32 %v1312_v17, %v1286_v18 }
0x1150   :  { %1316 = vrot.lane.b32.xlu1 %v1314_v20, %s2632_s0 }
0x1166   :  { %v1323_v49 = vpop.permute.xlu0 %1322 }
0x1167   :  { %v1325_v53 = vmul.f32 %v1323_v49, %v1306_v51 }
0x1169   :  { %1327 = vrot.lane.b32.xlu2 %v1325_v53, %s2632_s0 }
0x1171   :  { %378 = vrot.lane.b32.xlu2 %v2962_v57, %s2633_s2 }
0x1179   :  { %795 = vrot.lane.b32.xlu2 %v3084_v36, %s2633_s2  ;;  %v1554_v12 = vpop.f32.mrf.mxu2 }
0x1181   :  { %1212 = vrot.lane.b32.xlu2 %v3167_v30, %s2633_s2  ;;  %v1373_v30 = vld [vmem:[#allocation4 + $0x18] sm:$0xff] }
0x1182   :  { %1480 = vmatpush.msrb.mxu1 %v1373_v30 }
0x1184   :  { %1481 = vmatpush.msrb.mxu1 %v1372_v31 }
0x1186   :  { %1482 = vmatpush.msrb.mxu1 %v1371_v4 }
0x1188   :  { %1483 = vmatpush.msrb.mxu1 %v1370_v40 }
0x1189   :  { %2305 = vmatmul.msk.f32.vlgmr.msrb.gmra.mxu1 %vm375_vm9, %v1354_v5 }
0x11c2   :  { %v1317_v56 = vpop.permute.xlu1 %1316 }
0x11c3   :  { %v1328_v58 = vpop.permute.xlu2 %1327  ;;  %v1319_v59 = vadd.f32 %v1317_v56, %v1309_v54  ;;  %v1355_v56 = vld [vmem:[#allocation2 + $0x8] sm:$0xff] }
0x11c4   :  { %v1330_v60 = vadd.f32 %v1328_v58, %v1320_v55  ;;  %2306 = vmatmul.msk.f32.gmra.mxu1 %vm375_vm9, %v1355_v56 }
0x11c5   :  { %2470 = vtanh.f32 %v1319_v59 }
0x11c6   :  { %2472 = vtanh.f32 %v1330_v60 }
0x11cb   :  { %v2471_v61 = vpop.eup %2470  ;;  %v379_v62 = vpop.permute.xlu2 %378 }
0x11cc   :  { %v2473_v0 = vpop.eup %2472  ;;  %382 = vst.msk [vmem:[#allocation3 + $0x38] sm:$0xff] %vm375_vm9, %v379_v62  ;;  %1333 = vrot.lane.b32.xlu0 %v2471_v61, %s2632_s0 }
0x11cd   :  { %1339 = vrot.lane.b32.xlu1 %v2473_v0, %s2632_s0 }
0x11d3   :  { %v796_v57 = vpop.permute.xlu2 %795 }
0x11d4   :  { %799 = vst.msk [vmem:[#allocation3 + $0x20] sm:$0xff] %vm375_vm9, %v796_v57  ;;  %517 = vrot.lane.b32.xlu0 %v3002_v52, %s2633_s2 }
0x11d5   :  { %656 = vrot.lane.b32.xlu1 %v3043_v38, %s2633_s2 }
0x11db   :  { %v1213_v36 = vpop.permute.xlu2 %1212 }
0x11dc   :  { %1216 = vst.msk [vmem:[#allocation3 + $0x8] sm:$0xff] %vm375_vm9, %v1213_v36  ;;  %934 = vrot.lane.b32.xlu0 %v3115_v50, %s2633_s2 }
0x11dd   :  { %1073 = vrot.lane.b32.xlu1 %v3141_v24, %s2633_s2 }
0x11e3   :  { %v1363_v55 = vld [vmem:[#allocation3 + $0x8] sm:$0xff] }
0x1206   :  { %v1485_v35 = vpop.f32.mrf.mxu1 }
0x123e   :  { %v1334_v63 = vpop.permute.xlu0 %1333 }
0x123f   :  { %v1340_v7 = vpop.permute.xlu1 %1339  ;;  %v1336_v8 = vmul.f32 %v1334_v63, %v1286_v18 }
0x1240   :  { %v1342_v45 = vmul.f32 %v1340_v7, %v1306_v51 }
0x1241   :  { %1344 = vrot.lane.b32.xlu0 %v1336_v8, %s2633_s2  ;;  %v1488_v60 = vpop.f32.mrf.mxu1 }
0x1242   :  { %1350 = vrot.lane.b32.xlu1 %v1342_v45, %s2633_s2 }
0x1246   :  { %v518_v52 = vpop.permute.xlu0 %517 }
0x1247   :  { %v657_v19 = vpop.permute.xlu1 %656  ;;  %521 = vst.msk [vmem:[#allocation3 + $0x30] sm:$0xff] %vm375_vm9, %v518_v52 }
0x1248   :  { %660 = vst.msk [vmem:[#allocation3 + $0x28] sm:$0xff] %vm375_vm9, %v657_v19 }
0x124e   :  { %v935_v38 = vpop.permute.xlu0 %934 }
0x124f   :  { %v1074_v21 = vpop.permute.xlu1 %1073  ;;  %938 = vst.msk [vmem:[#allocation3 + $0x18] sm:$0xff] %vm375_vm9, %v935_v38 }
0x1250   :  { %1077 = vst.msk [vmem:[#allocation3 + $0x10] sm:$0xff] %vm375_vm9, %v1074_v21 }
0x12b3   :  { %v1345_v50 = vpop.permute.xlu0 %1344 }
0x12b4   :  { %v1351_v24 = vpop.permute.xlu1 %1350  ;;  %1348 = vst.msk [vmem:[#allocation2 + $0x38] sm:$0xff] %vm375_vm9, %v1345_v50 }
0x12b5   :  { %1353 = vst.msk [vmem:[#allocation3] sm:$0xff] %vm375_vm9, %v1351_v24 }
0x12bc   :  { %v1362_v3 = vld [vmem:[#allocation3] sm:$0xff] }
0x12bd   :  { %2297 = vmatmul.msk.f32.vlgmr.msrb.gmra.mxu0 %vm375_vm9, %v1362_v3 }
0x12c5   :  { %2298 = vmatmul.msk.f32.gmra.mxu0 %vm375_vm9, %v1363_v55 }
0x133a   :  { %v1420_v10 = vpop.f32.mrf.mxu0 }
0x133b   :  { %v1486_v1 = vadd.f32 %v1485_v35, %v1420_v10  ;;  %v1364_v10 = vld [vmem:[#allocation3 + $0x10] sm:$0xff] }
0x133c   :  { %v1356_v35 = vld [vmem:[#allocation2 + $0x10] sm:$0xff]  ;;  %2299 = vmatmul.msk.f32.gmra.mxu0 %vm375_vm9, %v1364_v10  ;;  %v1358_v10 = vld [vmem:[#allocation2 + $0x20] sm:$0xff] }
0x133d   :  { %v1513_v11 = vadd.f32 %v3245_v9, %v1486_v1  ;;  %2307 = vmatmul.msk.f32.gmra.mxu1 %vm375_vm9, %v1356_v35 }
0x133f   :  { %v1557_v32 = vadd.f32 %v1554_v12, %v1513_v11 }
0x1341   :  { %2478 = vtanh.f32 %v1557_v32  ;;  %v2313_v41 = vmul.f32 -1.442695, %v1557_v32 }
0x1342   :  { %v1423_v59 = vpop.f32.mrf.mxu0 }
0x1343   :  { %2480 = vpow2.f32 %v2313_v41  ;;  %v1489_v61 = vadd.f32 %v1488_v60, %v1423_v59  ;;  %v1365_v59 = vld [vmem:[#allocation3 + $0x18] sm:$0xff] }
0x1344   :  { %v1357_v60 = vld [vmem:[#allocation2 + $0x18] sm:$0xff]  ;;  %2300 = vmatmul.msk.f32.gmra.mxu0 %vm375_vm9, %v1365_v59  ;;  %v1359_v59 = vld [vmem:[#allocation2 + $0x28] sm:$0xff] }
0x1345   :  { %v1514_v62 = vadd.f32 %v3245_v9, %v1489_v61  ;;  %2308 = vmatmul.msk.f32.gmra.mxu1 %vm375_vm9, %v1357_v60 }
0x1347   :  { %v2479_v14 = vpop.eup %2478 }
0x1348   :  { %1580 = vrot.lane.b32.xlu0 %v2479_v14, %s2636_s6 }
0x1349   :  { %v2481_v15 = vpop.eup %2480 }
0x134a   :  { %v1561_v16 = vadd.f32 1.0, %v2481_v15 }
0x134c   :  { %2482 = vrcp.f32 %v1561_v16  ;;  %v1573_v39 = vand.u32 2147483648, %v1561_v16  ;;  %vm1567_vm11 = vweird.f32 %v1561_v16  ;;  %v1571_v22 = vand.u32 2147483647, %v1561_v16 }
0x134d   :  { %2309 = vmatmul.msk.f32.gmra.mxu1 %vm375_vm9, %v1358_v10 }
0x134e   :  { %v1574_v43 = vor.u32 1.1754944e-38, %v1573_v39  ;;  %vm1572_vm13 = vcmp.eq.f32.partialorder %v1571_v22, 8.507059e+37 }
0x1352   :  { %v2483_v34 = vpop.eup %2482 }
0x1353   :  { %v1563_v2 = vmul.f32 %v2483_v34, %v1561_v16  ;;  %vm1568_vm8 = vweird.f32 %v2483_v34 }
0x1354   :  { %vm1569_vm12 = vmor %vm1567_vm11, %vm1568_vm8 }
0x1355   :  { %v1564_v17 = vsub.f32 1.0, %v1563_v2  ;;  %2310 = vmatmul.msk.f32.gmra.mxu1 %vm375_vm9, %v1359_v59  ;;  %v1369_v59 = vld [vmem:[#allocation3 + $0x38] sm:$0xff] }
0x1357   :  { %v1565_v18 = vmul.f32 %v2483_v34, %v1564_v17 }
0x1359   :  { %v1566_v20 = vadd.f32 %v2483_v34, %v1565_v18 }
0x135b   :  { %v1570_v23 = vsel %vm1569_vm12, %v2483_v34, %v1566_v20 }
0x135c   :  { %v1575_v42 = vsel %vm1572_vm13, %v1574_v43, %v1570_v23 }
0x135d   :  { %v1578_v47 = vmul.f32 0.0, %v1575_v42 }
0x13b9   :  { %v1426_v11 = vpop.f32.mrf.mxu0 }
0x13ba   :  { %v1581_v46 = vpop.permute.xlu0 %1580  ;;  %v1491_v12 = vpop.f32.mrf.mxu1 }
0x13bb   :  { %v1583_v44 = vmul.f32 %v1581_v46, %v1575_v42  ;;  %v1492_v32 = vadd.f32 %v1491_v12, %v1426_v11 }
0x13bd   :  { %1585 = vrot.lane.b32.xlu0 %v1583_v44, %s2636_s6  ;;  %v1515_v14 = vadd.f32 %v3245_v9, %v1492_v32 }
0x142f   :  { %v1586_v48 = vpop.permute.xlu0 %1585 }
0x1430   :  { %v1588_v49 = vadd.f32 %v1586_v48, %v1578_v47 }
0x1432   :  { %2484 = vtanh.f32 %v1588_v49 }
0x1438   :  { %v2485_v51 = vpop.eup %2484 }
0x1439   :  { %1591 = vrot.lane.b32.xlu1 %v2485_v51, %s2636_s6 }
0x14ab   :  { %v1592_v53 = vpop.permute.xlu1 %1591 }
0x14ac   :  { %v1594_v54 = vmul.f32 %v1592_v53, %v1575_v42 }
0x14ae   :  { %1598 = vrot.lane.b32.xlu1 %v1594_v54, %s2637_s5 }
0x1520   :  { %v1599_v58 = vpop.permute.xlu1 %1598 }
0x1521   :  { %2314 = vmatmul.msk.f32.vlgmr.msra.gmra.mxu3 %vm375_vm9, %v1599_v58 }
0x1522   :  { %1874 = vmatpush.msra.mxu3 %v3212_v25 }
0x1524   :  { %1875 = vmatpush.msra.mxu3 %v3215_v27 }
0x1526   :  { %1876 = vmatpush.msra.mxu3 %v3217_v33 }
0x1528   :  { %1877 = vmatpush.msra.mxu3 %v3221_v28 }
0x15a4   :  { %v1619_v0 = vpop.f32.mrf.mxu3 }
0x15a5   :  { %v1622_v57 = vadd.f32 %v1619_v0, %v1514_v62  ;;  %v1429_v62 = vpop.f32.mrf.mxu0  ;;  %v1494_v0 = vpop.f32.mrf.mxu1 }
0x15a7   :  { %2486 = vtanh.f32 %v1622_v57  ;;  %v2315_v63 = vmul.f32 -1.442695, %v1622_v57  ;;  %v1495_v57 = vadd.f32 %v1494_v0, %v1429_v62 }
0x15a9   :  { %2488 = vpow2.f32 %v2315_v63 }
0x15ad   :  { %v2487_v36 = vpop.eup %2486  ;;  %v1497_v11 = vpop.f32.mrf.mxu1 }
0x15ae   :  { %1645 = vrot.lane.b32.xlu2 %v2487_v36, %s2636_s6  ;;  %v1516_v36 = vadd.f32 %v3245_v9, %v1495_v57 }
0x15af   :  { %v2489_v7 = vpop.eup %2488 }
0x15b0   :  { %v1626_v8 = vadd.f32 1.0, %v2489_v7 }
0x15b2   :  { %2490 = vrcp.f32 %v1626_v8  ;;  %v1638_v50 = vand.u32 2147483648, %v1626_v8  ;;  %vm1632_vm15 = vweird.f32 %v1626_v8  ;;  %v1636_v24 = vand.u32 2147483647, %v1626_v8 }
0x15b4   :  { %v1639_v30 = vor.u32 1.1754944e-38, %v1638_v50  ;;  %vm1637_vm10 = vcmp.eq.f32.partialorder %v1636_v24, 8.507059e+37 }
0x15b5   :  { %v1500_v62 = vpop.f32.mrf.mxu1 }
0x15b8   :  { %v2491_v45 = vpop.eup %2490 }
0x15b9   :  { %v1628_v52 = vmul.f32 %v2491_v45, %v1626_v8  ;;  %vm1633_vm14 = vweird.f32 %v2491_v45 }
0x15ba   :  { %vm1634_vm0 = vmor %vm1632_vm15, %vm1633_vm14 }
0x15bb   :  { %v1629_v19 = vsub.f32 1.0, %v1628_v52 }
0x15bd   :  { %v1630_v38 = vmul.f32 %v2491_v45, %v1629_v19 }
0x15bf   :  { %v1631_v21 = vadd.f32 %v2491_v45, %v1630_v38 }
0x15c1   :  { %v1635_v29 = vsel %vm1634_vm0, %v2491_v45, %v1631_v21 }
0x15c2   :  { %v1640_v31 = vsel %vm1637_vm10, %v1639_v30, %v1635_v29 }
0x15c3   :  { %v1643_v4 = vmul.f32 %v1640_v31, %v1588_v49 }
0x1608   :  { %v1646_v13 = vpop.permute.xlu2 %1645 }
0x1609   :  { %v1648_v26 = vmul.f32 %v1646_v13, %v1640_v31 }
0x160b   :  { %1650 = vrot.lane.b32.xlu2 %v1648_v26, %s2636_s6 }
0x1665   :  { %v1651_v37 = vpop.permute.xlu2 %1650 }
0x1666   :  { %v1653_v40 = vadd.f32 %v1651_v37, %v1643_v4 }
0x1668   :  { %2492 = vtanh.f32 %v1653_v40 }
0x166e   :  { %v2493_v3 = vpop.eup %2492 }
0x166f   :  { %1656 = vrot.lane.b32.xlu0 %v2493_v3, %s2636_s6 }
0x16e1   :  { %v1657_v5 = vpop.permute.xlu0 %1656 }
0x16e2   :  { %v1659_v6 = vmul.f32 %v1657_v5, %v1640_v31 }
0x16e4   :  { %1663 = vrot.lane.b32.xlu1 %v1659_v6, %s2637_s5  ;;  %v1366_v6 = vld [vmem:[#allocation3 + $0x20] sm:$0xff] }
0x16e5   :  { %2301 = vmatmul.msk.f32.gmra.mxu0 %vm375_vm9, %v1366_v6  ;;  %v1360_v6 = vld [vmem:[#allocation2 + $0x30] sm:$0xff] }
0x16e6   :  { %2311 = vmatmul.msk.f32.gmra.mxu1 %vm375_vm9, %v1360_v6 }
0x1756   :  { %v1664_v1 = vpop.permute.xlu1 %1663 }
0x1757   :  { %2316 = vmatmul.msk.f32.vlgmr.msrb.gmra.mxu2 %vm375_vm9, %v1664_v1 }
0x1758   :  { %1939 = vmatpush.msrb.mxu2 %v3212_v25 }
0x175a   :  { %1940 = vmatpush.msrb.mxu2 %v3215_v27 }
0x175c   :  { %1941 = vmatpush.msrb.mxu2 %v3217_v33 }
0x175e   :  { %1942 = vmatpush.msrb.mxu2 %v3221_v28 }
0x1762   :  { %v1432_v1 = vpop.f32.mrf.mxu0 }
0x1763   :  { %v1498_v12 = vadd.f32 %v1497_v11, %v1432_v1  ;;  %v1503_v1 = vpop.f32.mrf.mxu1 }
0x1765   :  { %v1517_v32 = vadd.f32 %v3245_v9, %v1498_v12 }
0x17da   :  { %v1684_v41 = vpop.f32.mrf.mxu2 }
0x17db   :  { %v1687_v15 = vadd.f32 %v1684_v41, %v1515_v14 }
0x17dd   :  { %2494 = vtanh.f32 %v1687_v15  ;;  %v2317_v34 = vmul.f32 -1.442695, %v1687_v15 }
0x17df   :  { %2496 = vpow2.f32 %v2317_v34 }
0x17e3   :  { %v2495_v16 = vpop.eup %2494 }
0x17e4   :  { %1710 = vrot.lane.b32.xlu2 %v2495_v16, %s2636_s6 }
0x17e5   :  { %v2497_v2 = vpop.eup %2496 }
0x17e6   :  { %v1691_v17 = vadd.f32 1.0, %v2497_v2 }
0x17e8   :  { %2498 = vrcp.f32 %v1691_v17  ;;  %v1703_v43 = vand.u32 2147483648, %v1691_v17  ;;  %vm1697_vm2 = vweird.f32 %v1691_v17  ;;  %v1701_v46 = vand.u32 2147483647, %v1691_v17 }
0x17ea   :  { %v1704_v44 = vor.u32 1.1754944e-38, %v1703_v43  ;;  %vm1702_vm4 = vcmp.eq.f32.partialorder %v1701_v46, 8.507059e+37 }
0x17ee   :  { %v2499_v18 = vpop.eup %2498 }
0x17ef   :  { %v1693_v20 = vmul.f32 %v2499_v18, %v1691_v17  ;;  %vm1698_vm1 = vweird.f32 %v2499_v18 }
0x17f0   :  { %vm1699_vm3 = vmor %vm1697_vm2, %vm1698_vm1 }
0x17f1   :  { %v1694_v39 = vsub.f32 1.0, %v1693_v20 }
0x17f3   :  { %v1695_v22 = vmul.f32 %v2499_v18, %v1694_v39 }
0x17f5   :  { %v1696_v23 = vadd.f32 %v2499_v18, %v1695_v22 }
0x17f7   :  { %v1700_v42 = vsel %vm1699_vm3, %v2499_v18, %v1696_v23 }
0x17f8   :  { %v1705_v48 = vsel %vm1702_vm4, %v1704_v44, %v1700_v42 }
0x17f9   :  { %v1708_v51 = vmul.f32 %v1705_v48, %v1653_v40 }
0x183e   :  { %v1711_v47 = vpop.permute.xlu2 %1710 }
0x183f   :  { %v1713_v49 = vmul.f32 %v1711_v47, %v1705_v48 }
0x1841   :  { %1715 = vrot.lane.b32.xlu0 %v1713_v49, %s2636_s6 }
0x18b3   :  { %v1716_v53 = vpop.permute.xlu0 %1715 }
0x18b4   :  { %v1718_v54 = vadd.f32 %v1716_v53, %v1708_v51 }
0x18b6   :  { %2500 = vtanh.f32 %v1718_v54 }
0x18bc   :  { %v2501_v55 = vpop.eup %2500 }
0x18bd   :  { %1721 = vrot.lane.b32.xlu1 %v2501_v55, %s2636_s6 }
0x192f   :  { %v1722_v56 = vpop.permute.xlu1 %1721 }
0x1930   :  { %v1724_v58 = vmul.f32 %v1722_v56, %v1705_v48 }
0x1932   :  { %1728 = vrot.lane.b32.xlu2 %v1724_v58, %s2637_s5  ;;  %v1367_v58 = vld [vmem:[#allocation3 + $0x28] sm:$0xff] }
0x1933   :  { %2302 = vmatmul.msk.f32.gmra.mxu0 %vm375_vm9, %v1367_v58  ;;  %v2053_v58 = vld [vmem:[#allocation8 + $0x18] sm:$0xff] }
0x198c   :  { %v1729_v61 = vpop.permute.xlu2 %1728 }
0x198d   :  { %2318 = vmatmul.msk.f32.vlgmr.msrb.gmra.mxu3 %vm375_vm9, %v1729_v61 }
0x198e   :  { %2004 = vmatpush.msrb.mxu3 %v3212_v25 }
0x1990   :  { %2005 = vmatpush.msrb.mxu3 %v3215_v27 }
0x1992   :  { %2006 = vmatpush.msrb.mxu3 %v3217_v33 }
0x1994   :  { %2007 = vmatpush.msrb.mxu3 %v3221_v28 }
0x19b0   :  { %v1435_v61 = vpop.f32.mrf.mxu0 }
0x19b1   :  { %v1501_v0 = vadd.f32 %v1500_v62, %v1435_v61  ;;  %v2056_v61 = vld [vmem:[#allocation8 + $0x30] sm:$0xff] }
0x19b2   :  { %v2052_v62 = vld [vmem:[#allocation8 + $0x10] sm:$0xff] }
0x19b3   :  { %v1518_v57 = vadd.f32 %v3245_v9, %v1501_v0  ;;  %v2055_v0 = vld [vmem:[#allocation8 + $0x28] sm:$0xff] }
0x1a10   :  { %v1749_v63 = vpop.f32.mrf.mxu3 }
0x1a11   :  { %v1752_v7 = vadd.f32 %v1749_v63, %v1516_v36 }
0x1a13   :  { %2502 = vtanh.f32 %v1752_v7  ;;  %v2319_v45 = vmul.f32 -1.442695, %v1752_v7 }
0x1a15   :  { %2504 = vpow2.f32 %v2319_v45 }
0x1a19   :  { %v2503_v8 = vpop.eup %2502 }
0x1a1a   :  { %1775 = vrot.lane.b32.xlu0 %v2503_v8, %s2636_s6 }
0x1a1b   :  { %v2505_v25 = vpop.eup %2504 }
0x1a1c   :  { %v1756_v52 = vadd.f32 1.0, %v2505_v25 }
0x1a1e   :  { %2506 = vrcp.f32 %v1756_v52  ;;  %v1768_v21 = vand.u32 2147483648, %v1756_v52  ;;  %vm1762_vm6 = vweird.f32 %v1756_v52  ;;  %v1766_v50 = vand.u32 2147483647, %v1756_v52 }
0x1a20   :  { %v1769_v29 = vor.u32 1.1754944e-38, %v1768_v21  ;;  %vm1767_vm8 = vcmp.eq.f32.partialorder %v1766_v50, 8.507059e+37 }
0x1a24   :  { %v2507_v27 = vpop.eup %2506 }
0x1a25   :  { %v1758_v33 = vmul.f32 %v2507_v27, %v1756_v52  ;;  %vm1763_vm5 = vweird.f32 %v2507_v27 }
0x1a26   :  { %vm1764_vm7 = vmor %vm1762_vm6, %vm1763_vm5 }
0x1a27   :  { %v1759_v19 = vsub.f32 1.0, %v1758_v33 }
0x1a29   :  { %v1760_v28 = vmul.f32 %v2507_v27, %v1759_v19 }
0x1a2b   :  { %v1761_v38 = vadd.f32 %v2507_v27, %v1760_v28 }
0x1a2d   :  { %v1765_v24 = vsel %vm1764_vm7, %v2507_v27, %v1761_v38 }
0x1a2e   :  { %v1770_v13 = vsel %vm1767_vm8, %v1769_v29, %v1765_v24 }
0x1a2f   :  { %v1773_v26 = vmul.f32 %v1770_v13, %v1718_v54 }
0x1a8c   :  { %v1776_v30 = vpop.permute.xlu0 %1775 }
0x1a8d   :  { %v1778_v31 = vmul.f32 %v1776_v30, %v1770_v13 }
0x1a8f   :  { %1780 = vrot.lane.b32.xlu1 %v1778_v31, %s2636_s6 }
0x1b01   :  { %v1781_v4 = vpop.permute.xlu1 %1780 }
0x1b02   :  { %v1783_v37 = vadd.f32 %v1781_v4, %v1773_v26 }
0x1b04   :  { %2508 = vtanh.f32 %v1783_v37 }
0x1b0a   :  { %v2509_v40 = vpop.eup %2508 }
0x1b0b   :  { %1786 = vrot.lane.b32.xlu2 %v2509_v40, %s2636_s6 }
0x1b65   :  { %v1787_v3 = vpop.permute.xlu2 %1786 }
0x1b66   :  { %v1789_v5 = vmul.f32 %v1787_v3, %v1770_v13 }
0x1b68   :  { %1793 = vrot.lane.b32.xlu0 %v1789_v5, %s2637_s5  ;;  %v1368_v5 = vld [vmem:[#allocation3 + $0x30] sm:$0xff] }
0x1b69   :  { %2303 = vmatmul.msk.f32.gmra.mxu0 %vm375_vm9, %v1368_v5 }
0x1b71   :  { %2304 = vmatmul.msk.f32.gmra.mxu0 %vm375_vm9, %v1369_v59 }
0x1bda   :  { %v1794_v35 = vpop.permute.xlu0 %1793 }
0x1bdb   :  { %2320 = vmatmul.msk.f32.vlgmr.msra.gmra.mxu2 %vm375_vm9, %v1794_v35 }
0x1be6   :  { %v1438_v35 = vpop.f32.mrf.mxu0 }
0x1be7   :  { %v1504_v11 = vadd.f32 %v1503_v1, %v1438_v35 }
0x1be9   :  { %v1519_v12 = vadd.f32 %v3245_v9, %v1504_v11 }
0x1c5e   :  { %v1814_v14 = vpop.f32.mrf.mxu2 }
0x1c5f   :  { %v1817_v41 = vadd.f32 %v1814_v14, %v1517_v32 }
0x1c61   :  { %2510 = vtanh.f32 %v1817_v41  ;;  %v2321_v16 = vmul.f32 -1.442695, %v1817_v41 }
0x1c63   :  { %2512 = vpow2.f32 %v2321_v16 }
0x1c67   :  { %v2511_v15 = vpop.eup %2510 }
0x1c68   :  { %1840 = vrot.lane.b32.xlu1 %v2511_v15, %s2636_s6 }
0x1c69   :  { %v2513_v34 = vpop.eup %2512 }
0x1c6a   :  { %v1821_v2 = vadd.f32 1.0, %v2513_v34 }
0x1c6c   :  { %2514 = vrcp.f32 %v1821_v2  ;;  %v1833_v23 = vand.u32 2147483648, %v1821_v2  ;;  %vm1827_vm12 = vweird.f32 %v1821_v2  ;;  %v1831_v43 = vand.u32 2147483647, %v1821_v2 }
0x1c6e   :  { %v1834_v42 = vor.u32 1.1754944e-38, %v1833_v23  ;;  %vm1832_vm14 = vcmp.eq.f32.partialorder %v1831_v43, 8.507059e+37 }
0x1c72   :  { %v2515_v17 = vpop.eup %2514 }
0x1c73   :  { %v1823_v18 = vmul.f32 %v2515_v17, %v1821_v2  ;;  %vm1828_vm11 = vweird.f32 %v2515_v17 }
0x1c74   :  { %vm1829_vm13 = vmor %vm1827_vm12, %vm1828_vm11 }
0x1c75   :  { %v1824_v20 = vsub.f32 1.0, %v1823_v18 }
0x1c77   :  { %v1825_v39 = vmul.f32 %v2515_v17, %v1824_v20 }
0x1c79   :  { %v1826_v22 = vadd.f32 %v2515_v17, %v1825_v39 }
0x1c7b   :  { %v1830_v46 = vsel %vm1829_vm13, %v2515_v17, %v1826_v22 }
0x1c7c   :  { %v1835_v47 = vsel %vm1832_vm14, %v1834_v42, %v1830_v46 }
0x1c7d   :  { %v1838_v49 = vmul.f32 %v1835_v47, %v1783_v37 }
0x1cda   :  { %v1841_v44 = vpop.permute.xlu1 %1840 }
0x1cdb   :  { %v1843_v48 = vmul.f32 %v1841_v44, %v1835_v47 }
0x1cdd   :  { %1845 = vrot.lane.b32.xlu2 %v1843_v48, %s2636_s6 }
0x1d37   :  { %v1846_v51 = vpop.permute.xlu2 %1845 }
0x1d38   :  { %v1848_v53 = vadd.f32 %v1846_v51, %v1838_v49 }
0x1d3a   :  { %2516 = vtanh.f32 %v1848_v53 }
0x1d40   :  { %v2517_v54 = vpop.eup %2516 }
0x1d41   :  { %1851 = vrot.lane.b32.xlu0 %v2517_v54, %s2636_s6 }
0x1db3   :  { %v1852_v55 = vpop.permute.xlu0 %1851 }
0x1db4   :  { %v1854_v56 = vmul.f32 %v1852_v55, %v1835_v47 }
0x1db6   :  { %1858 = vrot.lane.b32.xlu1 %v1854_v56, %s2637_s5  ;;  %v2057_v56 = vld [vmem:[#allocation8 + $0x38] sm:$0xff] }
0x1db7   :  { %2075 = vmatpush.msra.mxu2 %v2057_v56  ;;  %v2150_v56 = vld [vmem:[%s3390_s9 + $0x10] sm:$0xff] }
0x1db9   :  { %2076 = vmatpush.msra.mxu2 %v2056_v61 }
0x1dbb   :  { %2077 = vmatpush.msra.mxu2 %v2055_v0  ;;  %v2155_v0 = vld [vmem:[%s3390_s9 + $0x38] sm:$0xff] }
0x1e28   :  { %v1859_v60 = vpop.permute.xlu1 %1858 }
0x1e29   :  { %2322 = vmatmul.msk.f32.vlgmr.msra.gmra.mxu3 %vm375_vm9, %v1859_v60  ;;  %v1361_v60 = vld [vmem:[#allocation2 + $0x38] sm:$0xff] }
0x1e2a   :  { %2098 = vmatpush.msra.mxu3 %v2053_v58  ;;  %2312 = vmatmul.msk.f32.gmra.mxu1 %vm375_vm9, %v1361_v60  ;;  %v2149_v58 = vld [vmem:[%s3390_s9 + $0x8] sm:$0xff] }
0x1e2c   :  { %2099 = vmatpush.msra.mxu3 %v2052_v62 }
0x1eac   :  { %v1879_v36 = vpop.f32.mrf.mxu3 }
0x1ead   :  { %v1882_v63 = vadd.f32 %v1879_v36, %v1518_v57  ;;  %v2051_v57 = vld [vmem:[#allocation8 + $0x8] sm:$0xff]  ;;  %v2054_v36 = vld [vmem:[#allocation8 + $0x20] sm:$0xff] }
0x1eae   :  { %2100 = vmatpush.msra.mxu3 %v2051_v57  ;;  %2078 = vmatpush.msra.mxu2 %v2054_v36  ;;  %v2154_v57 = vld [vmem:[%s3390_s9 + $0x30] sm:$0xff]  ;;  %v2153_v36 = vld [vmem:[%s3390_s9 + $0x28] sm:$0xff] }
0x1eaf   :  { %2518 = vtanh.f32 %v1882_v63  ;;  %v2323_v8 = vmul.f32 -1.442695, %v1882_v63  ;;  %v2050_v63 = vld [vmem:[#allocation8] sm:$0xff] }
0x1eb0   :  { %2101 = vmatpush.msra.mxu3 %v2050_v63  ;;  %v2152_v63 = vld [vmem:[%s3390_s9 + $0x20] sm:$0xff] }
0x1eb1   :  { %2520 = vpow2.f32 %v2323_v8  ;;  %v1441_v8 = vpop.f32.mrf.mxu0 }
0x1eb5   :  { %v2519_v7 = vpop.eup %2518 }
0x1eb6   :  { %1905 = vrot.lane.b32.xlu2 %v2519_v7, %s2636_s6 }
0x1eb7   :  { %v2521_v45 = vpop.eup %2520 }
0x1eb8   :  { %v1886_v25 = vadd.f32 1.0, %v2521_v45  ;;  %v1506_v45 = vpop.f32.mrf.mxu1 }
0x1eba   :  { %2522 = vrcp.f32 %v1886_v25  ;;  %v1898_v38 = vand.u32 2147483648, %v1886_v25  ;;  %vm1892_vm0 = vweird.f32 %v1886_v25  ;;  %v1896_v21 = vand.u32 2147483647, %v1886_v25 }
0x1ebc   :  { %v1899_v24 = vor.u32 1.1754944e-38, %v1898_v38  ;;  %vm1897_vm1 = vcmp.eq.f32.partialorder %v1896_v21, 8.507059e+37 }
0x1ec0   :  { %v2523_v52 = vpop.eup %2522 }
0x1ec1   :  { %v1888_v27 = vmul.f32 %v2523_v52, %v1886_v25  ;;  %vm1893_vm15 = vweird.f32 %v2523_v52  ;;  %v1507_v25 = vadd.f32 %v1506_v45, %v1441_v8  ;;  %v2215_v45 = vld [vmem:[%s3392_s11 + $0x18] sm:$0xff] }
0x1ec2   :  { %vm1894_vm10 = vmor %vm1892_vm0, %vm1893_vm15  ;;  %vm2243_vm0 = vcmask 31744  }
0x1ec3   :  { %v1889_v33 = vsub.f32 1.0, %v1888_v27 }
0x1ec5   :  { %v1890_v19 = vmul.f32 %v2523_v52, %v1889_v33 }
0x1ec7   :  { %v1891_v28 = vadd.f32 %v2523_v52, %v1890_v19 }
0x1ec9   :  { %v1895_v50 = vsel %vm1894_vm10, %v2523_v52, %v1891_v28  ;;  %v1520_v52 = vadd.f32 %v3245_v9, %v1507_v25  ;;  %v2475_v28 = vld [vmem:[%s3389_s8] ss:$0 sm:$0xff]  ;;  %v2214_v25 = vld [vmem:[%s3392_s11 + $0x10] sm:$0xff] }
0x1eca   :  { %v1900_v30 = vsel %vm1897_vm1, %v1899_v24, %v1895_v50 }
0x1ecb   :  { %v1903_v31 = vmul.f32 %v1900_v30, %v1848_v53 }
0x1f10   :  { %v1906_v29 = vpop.permute.xlu2 %1905 }
0x1f11   :  { %v1908_v13 = vmul.f32 %v1906_v29, %v1900_v30 }
0x1f13   :  { %1910 = vrot.lane.b32.xlu0 %v1908_v13, %s2636_s6 }
0x1f85   :  { %v1911_v26 = vpop.permute.xlu0 %1910 }
0x1f86   :  { %v1913_v4 = vadd.f32 %v1911_v26, %v1903_v31 }
0x1f88   :  { %2524 = vtanh.f32 %v1913_v4 }
0x1f8e   :  { %v2525_v37 = vpop.eup %2524 }
0x1f8f   :  { %1916 = vrot.lane.b32.xlu1 %v2525_v37, %s2636_s6 }
0x2001   :  { %v1917_v40 = vpop.permute.xlu1 %1916 }
0x2002   :  { %v1919_v3 = vmul.f32 %v1917_v40, %v1900_v30 }
0x2004   :  { %1923 = vrot.lane.b32.xlu2 %v1919_v3, %s2637_s5 }
0x205e   :  { %v1924_v10 = vpop.permute.xlu2 %1923 }
0x205f   :  { %2324 = vmatmul.msk.f32.vlgmr.msrb.gmra.mxu2 %vm375_vm9, %v1924_v10 }
0x2060   :  { %2173 = vmatpush.msrb.mxu2 %v2155_v0 }
0x2062   :  { %2174 = vmatpush.msrb.mxu2 %v2154_v57 }
0x2064   :  { %2175 = vmatpush.msrb.mxu2 %v2153_v36 }
0x2066   :  { %2176 = vmatpush.msrb.mxu2 %v2152_v63 }
0x2067   :  { %2328 = vmatmul.msk.f32.vlgmr.msra.gmra.mxu2 %vm375_vm9, %v1369_v59 }
0x2068   :  { %2235 = vmatpush.msra.mxu2 %v2215_v45 }
0x206a   :  { %2236 = vmatpush.msra.mxu2 %v2214_v25 }
0x20e2   :  { %v1944_v32 = vpop.f32.mrf.mxu2 }
0x20e3   :  { %v1947_v14 = vadd.f32 %v1944_v32, %v1519_v12 }
0x20e5   :  { %2526 = vtanh.f32 %v1947_v14  ;;  %v2325_v15 = vmul.f32 -1.442695, %v1947_v14 }
0x20e7   :  { %2528 = vpow2.f32 %v2325_v15 }
0x20ea   :  { %v2080_v19 = vpop.f32.mrf.mxu2 }
0x20eb   :  { %v2527_v41 = vpop.eup %2526 }
0x20ec   :  { %1970 = vrot.lane.b32.xlu0 %v2527_v41, %s2636_s6 }
0x20ed   :  { %v2529_v16 = vpop.eup %2528 }
0x20ee   :  { %v1951_v34 = vadd.f32 1.0, %v2529_v16 }
0x20f0   :  { %2530 = vrcp.f32 %v1951_v34  ;;  %v1963_v22 = vand.u32 2147483648, %v1951_v34  ;;  %vm1957_vm3 = vweird.f32 %v1951_v34  ;;  %v1961_v23 = vand.u32 2147483647, %v1951_v34 }
0x20f2   :  { %v1964_v46 = vor.u32 1.1754944e-38, %v1963_v22  ;;  %vm1962_vm5 = vcmp.eq.f32.partialorder %v1961_v23, 8.507059e+37 }
0x20f6   :  { %v2531_v2 = vpop.eup %2530 }
0x20f7   :  { %v1953_v17 = vmul.f32 %v2531_v2, %v1951_v34  ;;  %vm1958_vm2 = vweird.f32 %v2531_v2 }
0x20f8   :  { %vm1959_vm4 = vmor %vm1957_vm3, %vm1958_vm2 }
0x20f9   :  { %v1954_v18 = vsub.f32 1.0, %v1953_v17 }
0x20fb   :  { %v1955_v20 = vmul.f32 %v2531_v2, %v1954_v18 }
0x20fd   :  { %v1956_v39 = vadd.f32 %v2531_v2, %v1955_v20 }
0x20ff   :  { %v1960_v43 = vsel %vm1959_vm4, %v2531_v2, %v1956_v39 }
0x2100   :  { %v1965_v44 = vsel %vm1962_vm5, %v1964_v46, %v1960_v43 }
0x2101   :  { %v1968_v48 = vmul.f32 %v1965_v44, %v1913_v4 }
0x215e   :  { %v1971_v42 = vpop.permute.xlu0 %1970 }
0x215f   :  { %v1973_v47 = vmul.f32 %v1971_v42, %v1965_v44 }
0x2161   :  { %1975 = vrot.lane.b32.xlu1 %v1973_v47, %s2636_s6 }
0x21d3   :  { %v1976_v49 = vpop.permute.xlu1 %1975 }
0x21d4   :  { %v3310_v51 = vadd.f32 %v1976_v49, %v1968_v48 }
0x21d6   :  { %2532 = vtanh.f32 %v3310_v51 }
0x21dc   :  { %v2533_v53 = vpop.eup %2532 }
0x21dd   :  { %1981 = vrot.lane.b32.xlu2 %v2533_v53, %s2636_s6 }
0x2237   :  { %v1982_v54 = vpop.permute.xlu2 %1981 }
0x2238   :  { %v1984_v55 = vmul.f32 %v1982_v54, %v1965_v44 }
0x223a   :  { %1988 = vrot.lane.b32.xlu0 %v1984_v55, %s2637_s5  ;;  %v2151_v55 = vld [vmem:[%s3390_s9 + $0x18] sm:$0xff] }
0x22ac   :  { %v1989_v7 = vpop.permute.xlu0 %1988 }
0x22ad   :  { %2326 = vmatmul.msk.f32.vlgmr.msrb.gmra.mxu3 %vm375_vm9, %v1989_v7 }
0x22ae   :  { %2198 = vmatpush.msrb.mxu3 %v2151_v55 }
0x22b0   :  { %2199 = vmatpush.msrb.mxu3 %v2150_v56 }
0x22b2   :  { %2200 = vmatpush.msrb.mxu3 %v2149_v58 }
0x22b5   :  { %2329 = vmatmul.msk.f32.vlgmr.msra.gmra.mxu3 %vm375_vm9, %v1361_v60 }
0x2330   :  { %v2009_v27 = vpop.f32.mrf.mxu3 }
0x2331   :  { %v2012_v33 = vadd.f32 %v2009_v27, %v1520_v52  ;;  %v2213_v52 = vld [vmem:[%s3392_s11 + $0x8] sm:$0xff]  ;;  %v2212_v27 = vld [vmem:[%s3392_s11] sm:$0xff] }
0x2332   :  { %2237 = vmatpush.msra.mxu2 %v2213_v52 }
0x2333   :  { %2534 = vtanh.f32 %v2012_v33  ;;  %v2327_v31 = vmul.f32 -1.442695, %v2012_v33  ;;  %v2476_v33 = vld [vmem:[%s3391_s10] ss:$0 sm:$0xff] }
0x2334   :  { %2238 = vmatpush.msra.mxu2 %v2212_v27 }
0x2338   :  { %v2103_v38 = vpop.f32.mrf.mxu3 }
0x2339   :  { %v2535_v21 = vpop.eup %2534  ;;  %v2104_v50 = vadd.f32 %v2103_v38, %v2080_v19 }
0x233a   :  { %2035 = vrot.lane.b32.xlu1 %v2535_v21, %s2636_s6 }
0x233b   :  { %v2110_v24 = vadd.f32 %v2475_v28, %v2104_v50 }
0x233d   :  { %2536 = vtanh.f32 %v2110_v24  ;;  %v2330_v30 = vmul.f32 -1.442695, %v2110_v24  ;;  %v2477_v24 = vld [vmem:[%s3393_s12] ss:$0 sm:$0xff] }
0x233f   :  { %2538 = vpow2.f32 %v2330_v30 }
0x2343   :  { %v2537_v29 = vpop.eup %2536 }
0x2344   :  { %2133 = vrot.lane.b32.xlu2 %v2537_v29, %s2636_s6 }
0x2345   :  { %v2539_v9 = vpop.eup %2538 }
0x2346   :  { %v2114_v13 = vadd.f32 1.0, %v2539_v9 }
0x2348   :  { %2540 = vrcp.f32 %v2114_v13  ;;  %v2126_v35 = vand.u32 2147483648, %v2114_v13  ;;  %vm2120_vm7 = vweird.f32 %v2114_v13  ;;  %v2124_v1 = vand.u32 2147483647, %v2114_v13 }
0x2349   :  { %2542 = vpow2.f32 %v2327_v31 }
0x234a   :  { %v2127_v32 = vor.u32 1.1754944e-38, %v2126_v35  ;;  %vm2125_vm11 = vcmp.eq.f32.partialorder %v2124_v1, 8.507059e+37 }
0x234e   :  { %v2541_v26 = vpop.eup %2540 }
0x234f   :  { %v2543_v4 = vpop.eup %2542  ;;  %v2116_v37 = vmul.f32 %v2541_v26, %v2114_v13  ;;  %vm2121_vm6 = vweird.f32 %v2541_v26 }
0x2350   :  { %v2016_v40 = vadd.f32 1.0, %v2543_v4  ;;  %vm2122_vm8 = vmor %vm2120_vm7, %vm2121_vm6 }
0x2351   :  { %v2117_v3 = vsub.f32 1.0, %v2116_v37 }
0x2352   :  { %2544 = vrcp.f32 %v2016_v40  ;;  %v2028_v17 = vand.u32 2147483648, %v2016_v40  ;;  %vm2022_vm13 = vweird.f32 %v2016_v40  ;;  %v2026_v18 = vand.u32 2147483647, %v2016_v40 }
0x2353   :  { %v2118_v5 = vmul.f32 %v2541_v26, %v2117_v3 }
0x2354   :  { %v2029_v39 = vor.u32 1.1754944e-38, %v2028_v17  ;;  %vm2027_vm15 = vcmp.eq.f32.partialorder %v2026_v18, 8.507059e+37 }
0x2355   :  { %v2119_v10 = vadd.f32 %v2541_v26, %v2118_v5 }
0x2357   :  { %v2123_v12 = vsel %vm2122_vm8, %v2541_v26, %v2119_v10 }
0x2358   :  { %v2545_v6 = vpop.eup %2544  ;;  %v2128_v15 = vsel %vm2125_vm11, %v2127_v32, %v2123_v12 }
0x2359   :  { %v2018_v11 = vmul.f32 %v2545_v6, %v2016_v40  ;;  %vm2023_vm12 = vweird.f32 %v2545_v6  ;;  %v2131_v46 = vmul.f32 0.0, %v2128_v15 }
0x235a   :  { %vm2024_vm14 = vmor %vm2022_vm13, %vm2023_vm12 }
0x235b   :  { %v2019_v14 = vsub.f32 1.0, %v2018_v11 }
0x235d   :  { %v2020_v34 = vmul.f32 %v2545_v6, %v2019_v14 }
0x235f   :  { %v2021_v2 = vadd.f32 %v2545_v6, %v2020_v34 }
0x2361   :  { %v2025_v20 = vsel %vm2024_vm14, %v2545_v6, %v2021_v2 }
0x2362   :  { %v2030_v23 = vsel %vm2027_vm15, %v2029_v39, %v2025_v20 }
0x2363   :  { %v2033_v48 = vmul.f32 %v2030_v23, %v3310_v51  ;;  %v2148_v51 = vld [vmem:[%s3390_s9] sm:$0xff] }
0x2364   :  { %2201 = vmatpush.msrb.mxu3 %v2148_v51 }
0x239e   :  { %v2134_v41 = vpop.permute.xlu2 %2133 }
0x239f   :  { %v2136_v16 = vmul.f32 %v2134_v41, %v2128_v15 }
0x23a1   :  { %2138 = vrot.lane.b32.xlu1 %v2136_v16, %s2636_s6 }
0x23ac   :  { %v2036_v22 = vpop.permute.xlu1 %2035 }
0x23ad   :  { %v2038_v43 = vmul.f32 %v2036_v22, %v2030_v23 }
0x23af   :  { %2040 = vrot.lane.b32.xlu0 %v2038_v43, %s2636_s6 }
0x2413   :  { %v2139_v42 = vpop.permute.xlu1 %2138 }
0x2414   :  { %v2141_v44 = vadd.f32 %v2139_v42, %v2131_v46 }
0x2416   :  { %2546 = vtanh.f32 %v2141_v44 }
0x241c   :  { %v2547_v47 = vpop.eup %2546 }
0x241d   :  { %2144 = vrot.lane.b32.xlu0 %v2547_v47, %s2636_s6 }
0x2421   :  { %v2041_v49 = vpop.permute.xlu0 %2040 }
0x2422   :  { %v2043_v53 = vadd.f32 %v2041_v49, %v2033_v48 }
0x2424   :  { %2548 = vtanh.f32 %v2043_v53 }
0x242a   :  { %v2549_v54 = vpop.eup %2548 }
0x242b   :  { %2046 = vrot.lane.b32.xlu2 %v2549_v54, %s2636_s6 }
0x2485   :  { %v2047_v59 = vpop.permute.xlu2 %2046 }
0x2486   :  { %v2049_v60 = vmul.f32 %v2047_v59, %v2030_v23 }
0x2488   :  { %2182 = vrot.lane.b32.xlu2 %v2049_v60, %s2637_s5 }
0x248f   :  { %v2145_v61 = vpop.permute.xlu0 %2144 }
0x2490   :  { %v2147_v62 = vmul.f32 %v2145_v61, %v2128_v15 }
0x2492   :  { %2157 = vrot.lane.b32.xlu1 %v2147_v62, %s2637_s5 }
0x24e2   :  { %v2183_v7 = vpop.permute.xlu2 %2182 }
0x24e3   :  { %2332 = vmatmul.msk.f32.vlgmr.msrb.gmra.mxu3 %vm375_vm9, %v2183_v7 }
0x2504   :  { %v2158_v8 = vpop.permute.xlu1 %2157 }
0x2505   :  { %2331 = vmatmul.msk.f32.vlgmr.msrb.gmra.mxu2 %vm375_vm9, %v2158_v8 }
0x2566   :  { %v2203_v19 = vpop.f32.mrf.mxu3 }
0x2588   :  { %v2178_v28 = vpop.f32.mrf.mxu2 }
0x2589   :  { %v2204_v38 = vadd.f32 %v2203_v19, %v2178_v28 }
0x258b   :  { %v2210_v21 = vadd.f32 %v2476_v33, %v2204_v38 }
0x258d   :  { %v2211_v50 = vmax.f32 %v2210_v21, 0.0 }
0x258f   :  { %2333 = vmatmul.msk.f32.vlgmr.msra.gmra.mxu2 %vm375_vm9, %v2211_v50 }
0x2612   :  { %v2240_v29 = vpop.f32.mrf.mxu2 }
0x2613   :  { %v2241_v30 = vadd.f32 %v2477_v24, %v2240_v29 }
0x2615   :  { %2244 = vst.msk [vmem:[%s3394_s13] sm:$0xff] %vm2243_vm0, %v2241_v30 }
0x2616   :  { %2249 = vsyncpa [#allocation5], 1 }
0x2617   :  { %2250 = vsyncpa [#allocation7], 1 }

</bundles_post_ra>
